<compile_context>
chip_gen: v7x
topology: tpu7x:2x2x1
jax: 0.10.0
libtpu: 0.0.40
codegen_flags: <defaults>
</compile_context>

<pallas_src>
import jax
import jax.numpy as jnp
from jax.experimental import pallas as pl
from jax.experimental.pallas import tpu as pltpu

EPS = 1e-5


def _im2col_3x3(pad_ref, col_ref, B, H, W, C):
    """pad_ref: (B, H+2, W+2, C) VMEM scratch with a zeroed 1-px halo.
    col_ref:  (B*H*W, 9*C) VMEM scratch; column block `tap` holds the shifted
    window for kernel tap (dh, dw), tap = dh*3 + dw."""
    for dh in range(3):
        for dw in range(3):
            tap = dh * 3 + dw
            win = pad_ref[:, dh:dh + H, dw:dw + W, :].reshape(B * H * W, C)
            col_ref[:, tap * C:(tap + 1) * C] = win


def _bn_train_affine(y, gamma, beta):
    """Training-mode BatchNorm2d on a (B*H*W, C) f32 matrix, folded into one FMA:
    scale = gamma*rsqrt(var+eps), shift = beta - mean*scale."""
    mean = jnp.mean(y, axis=0, keepdims=True)
    var = jnp.mean(jnp.square(y - mean), axis=0, keepdims=True)
    scale = gamma * jax.lax.rsqrt(var + EPS)
    shift = beta - mean * scale
    return y * scale + shift


def _residual_block_kernel(x_ref, w1_ref, g1_ref, be1_ref, w2_ref, g2_ref,
                           be2_ref, o_ref, pad_ref, col_ref):
    B, H, W, C = x_ref.shape

    # Zero the padded scratch once: the interior is fully overwritten by both
    # stages, so the 1-pixel halo stays zero for both convolutions.
    pad_ref[...] = jnp.zeros(pad_ref.shape, pad_ref.dtype)

    x = x_ref[...]  # f32, reused for the residual add

    # ---- Stage 1: conv1 (3x3, pad 1) -> BN1 -> ReLU, entirely in VMEM ----
    pad_ref[:, 1:H + 1, 1:W + 1, :] = x.astype(pad_ref.dtype)
    _im2col_3x3(pad_ref, col_ref, B, H, W, C)
    # Conv bias omitted: train-mode BN subtracts the per-channel mean right after,
    # so the bias cancels exactly.
    y = jnp.dot(col_ref[...], w1_ref[...], preferred_element_type=jnp.float32)
    y = _bn_train_affine(y, g1_ref[...], be1_ref[...])
    y = jnp.maximum(y, 0.0)

    # ---- Stage 2: conv2 (3x3, pad 1) -> BN2 -> +x -> ReLU ----
    pad_ref[:, 1:H + 1, 1:W + 1, :] = y.reshape(B, H, W, C).astype(pad_ref.dtype)
    _im2col_3x3(pad_ref, col_ref, B, H, W, C)
    y2 = jnp.dot(col_ref[...], w2_ref[...], preferred_element_type=jnp.float32)
    y2 = _bn_train_affine(y2, g2_ref[...], be2_ref[...])

    out = jnp.maximum(y2 + x.reshape(B * H * W, C), 0.0)
    o_ref[...] = out.reshape(B, H, W, C)


@jax.jit
def residual_block_pallas(x_nchw, params):
    """Forward pass of ResidualBlock. x_nchw: (B, C, H, W) float32."""
    (w1, b1, g1, be1, w2, b2, g2, be2) = params  # conv weights in torch OIHW
    del b1, b2  # exactly cancelled by train-mode BN mean subtraction

    x = jnp.transpose(x_nchw, (0, 2, 3, 1)).astype(jnp.float32)  # -> NHWC
    B, H, W, C = x.shape

    def w_mat(w):
        # OIHW (Cout, Cin, 3, 3) -> (9*Cin, Cout), row index = (dh*3+dw)*Cin + cin,
        # matching the im2col column layout; bf16 for the MXU.
        cout, cin = w.shape[0], w.shape[1]
        return (jnp.transpose(w, (2, 3, 1, 0))
                .reshape(9 * cin, cout).astype(jnp.bfloat16))

    row = lambda v: v.reshape(1, -1).astype(jnp.float32)
    vmem = pl.BlockSpec(memory_space=pltpu.MemorySpace.VMEM)

    out = pl.pallas_call(
        _residual_block_kernel,
        out_shape=jax.ShapeDtypeStruct((B, H, W, C), jnp.float32),
        in_specs=[vmem] * 7,
        out_specs=vmem,
        scratch_shapes=[
            pltpu.VMEM((B, H + 2, W + 2, C), jnp.bfloat16),   # padded activations
            pltpu.VMEM((B * H * W, 9 * C), jnp.bfloat16),     # im2col matrix
        ],
    )(x, w_mat(w1), row(g1), row(be1), w_mat(w2), row(g2), row(be2))

    return jnp.transpose(out, (0, 3, 1, 2))  # back to NCHW


def residual_block_reference(x_nchw, params):
    """Pure-JAX f32 reference (matches PyTorch train-mode forward, incl. conv bias)."""
    (w1, b1, g1, be1, w2, b2, g2, be2) = params

    def conv(x, w, b):
        y = jax.lax.conv_general_dilated(
            x, w, window_strides=(1, 1), padding=((1, 1), (1, 1)),
            dimension_numbers=("NCHW", "OIHW", "NCHW"),
            precision=jax.lax.Precision.HIGHEST)
        return y + b[None, :, None, None]

    def bn(y, g, be):
        mean = jnp.mean(y, axis=(0, 2, 3), keepdims=True)
        var = jnp.mean(jnp.square(y - mean), axis=(0, 2, 3), keepdims=True)
        return ((y - mean) * jax.lax.rsqrt(var + EPS)
                * g[None, :, None, None] + be[None, :, None, None])

    y = jax.nn.relu(bn(conv(x_nchw, w1, b1), g1, be1))
    y = bn(conv(y, w2, b2), g2, be2)
    return jax.nn.relu(y + x_nchw)


def make_params(key, c_in, c_out):
    ks = jax.random.split(key, 8)
    w1 = 0.05 * jax.random.normal(ks[0], (c_out, c_in, 3, 3), jnp.float32)
    b1 = 0.05 * jax.random.normal(ks[1], (c_out,), jnp.float32)
    g1 = 1.0 + 0.1 * jax.random.normal(ks[2], (c_out,), jnp.float32)
    be1 = 0.1 * jax.random.normal(ks[3], (c_out,), jnp.float32)
    w2 = 0.05 * jax.random.normal(ks[4], (c_out, c_out, 3, 3), jnp.float32)
    b2 = 0.05 * jax.random.normal(ks[5], (c_out,), jnp.float32)
    g2 = 1.0 + 0.1 * jax.random.normal(ks[6], (c_out,), jnp.float32)
    be2 = 0.1 * jax.random.normal(ks[7], (c_out,), jnp.float32)
    return (w1, b1, g1, be1, w2, b2, g2, be2)


if __name__ == "__main__":
    # Small shapes consistent with the module (in_channel == num_channel required
    # by the residual add). Channels = 128 to fill TPU lanes.
    B, C, H, W = 2, 128, 8, 8

    key = jax.random.PRNGKey(0)
    k_x, k_p = jax.random.split(key)
    x = jax.random.normal(k_x, (B, C, H, W), jnp.float32)
    params = make_params(k_p, C, C)

    out = jax.block_until_ready(residual_block_pallas(x, params))
    ref = jax.block_until_ready(residual_block_reference(x, params))

    assert out.shape == (B, C, H, W) and out.dtype == jnp.float32
    assert bool(jnp.all(jnp.isfinite(out)))
    err = jnp.abs(out - ref)
    max_err = float(jnp.max(err))
    mean_err = float(jnp.mean(err))
    # bf16 MXU operands (f32 accumulation) vs. an all-f32 reference: allow a
    # slightly wider absolute tolerance on activations of O(1).
    assert max_err < 5e-2, f"mismatch vs reference: max abs err {max_err}"
    assert mean_err < 1e-2, f"mismatch vs reference: mean abs err {mean_err}"

    print("KERNEL_OK")
</pallas_src>

<mosaic_0001>
module attributes {stable_mosaic.version = 11 : i64} {
  func.func @_residual_block_kernel(%arg0: memref<2x8x8x128xf32, #tpu.memory_space<vmem>>, %arg1: memref<1152x128xbf16, #tpu.memory_space<vmem>>, %arg2: memref<1x128xf32, #tpu.memory_space<vmem>>, %arg3: memref<1x128xf32, #tpu.memory_space<vmem>>, %arg4: memref<1152x128xbf16, #tpu.memory_space<vmem>>, %arg5: memref<1x128xf32, #tpu.memory_space<vmem>>, %arg6: memref<1x128xf32, #tpu.memory_space<vmem>>, %arg7: memref<2x8x8x128xf32, #tpu.memory_space<vmem>>, %arg8: memref<2x10x10x128xbf16, #tpu.memory_space<vmem>>, %arg9: memref<128x1152xbf16, #tpu.memory_space<vmem>>) attributes {dimension_semantics = [], scalar_prefetch = 0 : i64, scratch_operands = 2 : i64, tpu.core_type = #tpu.core_type<tc>} {
    %cst = arith.constant 0.000000e+00 : bf16
    %0 = vector.broadcast %cst : bf16 to vector<2x10x10x128xbf16>
    %c0 = arith.constant 0 : index
    %c0_0 = arith.constant 0 : index
    %c0_1 = arith.constant 0 : index
    %c0_2 = arith.constant 0 : index
    %1 = vector.load %arg8[%c0, %c0_0, %c0_1, %c0_2] : memref<2x10x10x128xbf16, #tpu.memory_space<vmem>>, vector<2x10x10x128xbf16>
    tpu.vector_store %arg8[%c0, %c0_0, %c0_1, %c0_2], %0 {strides = array<i32>} : memref<2x10x10x128xbf16, #tpu.memory_space<vmem>>, vector<2x10x10x128xbf16>,
    %c0_3 = arith.constant 0 : index
    %c0_4 = arith.constant 0 : index
    %c0_5 = arith.constant 0 : index
    %c0_6 = arith.constant 0 : index
    %2 = vector.load %arg0[%c0_3, %c0_4, %c0_5, %c0_6] : memref<2x8x8x128xf32, #tpu.memory_space<vmem>>, vector<2x8x8x128xf32>
    %3 = arith.truncf %2 : vector<2x8x8x128xf32> to vector<2x8x8x128xbf16>
    %c0_7 = arith.constant 0 : index
    %c1 = arith.constant 1 : index
    %c1_8 = arith.constant 1 : index
    %c0_9 = arith.constant 0 : index
    %4 = vector.load %arg8[%c0_7, %c1, %c1_8, %c0_9] : memref<2x10x10x128xbf16, #tpu.memory_space<vmem>>, vector<2x8x8x128xbf16>
    tpu.vector_store %arg8[%c0_7, %c1, %c1_8, %c0_9], %3 {strides = array<i32>} : memref<2x10x10x128xbf16, #tpu.memory_space<vmem>>, vector<2x8x8x128xbf16>,
    %c0_10 = arith.constant 0 : index
    %c0_11 = arith.constant 0 : index
    %c0_12 = arith.constant 0 : index
    %c0_13 = arith.constant 0 : index
    %5 = vector.load %arg8[%c0_10, %c0_11, %c0_12, %c0_13] : memref<2x10x10x128xbf16, #tpu.memory_space<vmem>>, vector<2x8x8x128xbf16>
    %6 = vector.shape_cast %5 : vector<2x8x8x128xbf16> to vector<128x128xbf16>
    %c0_14 = arith.constant 0 : index
    %c0_15 = arith.constant 0 : index
    %7 = vector.load %arg9[%c0_14, %c0_15] : memref<128x1152xbf16, #tpu.memory_space<vmem>>, vector<128x128xbf16>
    tpu.vector_store %arg9[%c0_14, %c0_15], %6 {strides = array<i32>} : memref<128x1152xbf16, #tpu.memory_space<vmem>>, vector<128x128xbf16>,
    %c0_16 = arith.constant 0 : index
    %c0_17 = arith.constant 0 : index
    %c1_18 = arith.constant 1 : index
    %c0_19 = arith.constant 0 : index
    %8 = vector.load %arg8[%c0_16, %c0_17, %c1_18, %c0_19] : memref<2x10x10x128xbf16, #tpu.memory_space<vmem>>, vector<2x8x8x128xbf16>
    %9 = vector.shape_cast %8 : vector<2x8x8x128xbf16> to vector<128x128xbf16>
    %c0_20 = arith.constant 0 : index
    %c128 = arith.constant 128 : index
    %10 = vector.load %arg9[%c0_20, %c128] : memref<128x1152xbf16, #tpu.memory_space<vmem>>, vector<128x128xbf16>
    tpu.vector_store %arg9[%c0_20, %c128], %9 {strides = array<i32>} : memref<128x1152xbf16, #tpu.memory_space<vmem>>, vector<128x128xbf16>,
    %c0_21 = arith.constant 0 : index
    %c0_22 = arith.constant 0 : index
    %c2 = arith.constant 2 : index
    %c0_23 = arith.constant 0 : index
    %11 = vector.load %arg8[%c0_21, %c0_22, %c2, %c0_23] : memref<2x10x10x128xbf16, #tpu.memory_space<vmem>>, vector<2x8x8x128xbf16>
    %12 = vector.shape_cast %11 : vector<2x8x8x128xbf16> to vector<128x128xbf16>
    %c0_24 = arith.constant 0 : index
    %c256 = arith.constant 256 : index
    %13 = vector.load %arg9[%c0_24, %c256] : memref<128x1152xbf16, #tpu.memory_space<vmem>>, vector<128x128xbf16>
    tpu.vector_store %arg9[%c0_24, %c256], %12 {strides = array<i32>} : memref<128x1152xbf16, #tpu.memory_space<vmem>>, vector<128x128xbf16>,
    %c0_25 = arith.constant 0 : index
    %c1_26 = arith.constant 1 : index
    %c0_27 = arith.constant 0 : index
    %c0_28 = arith.constant 0 : index
    %14 = vector.load %arg8[%c0_25, %c1_26, %c0_27, %c0_28] : memref<2x10x10x128xbf16, #tpu.memory_space<vmem>>, vector<2x8x8x128xbf16>
    %15 = vector.shape_cast %14 : vector<2x8x8x128xbf16> to vector<128x128xbf16>
    %c0_29 = arith.constant 0 : index
    %c384 = arith.constant 384 : index
    %16 = vector.load %arg9[%c0_29, %c384] : memref<128x1152xbf16, #tpu.memory_space<vmem>>, vector<128x128xbf16>
    tpu.vector_store %arg9[%c0_29, %c384], %15 {strides = array<i32>} : memref<128x1152xbf16, #tpu.memory_space<vmem>>, vector<128x128xbf16>,
    %c0_30 = arith.constant 0 : index
    %c1_31 = arith.constant 1 : index
    %c1_32 = arith.constant 1 : index
    %c0_33 = arith.constant 0 : index
    %17 = vector.load %arg8[%c0_30, %c1_31, %c1_32, %c0_33] : memref<2x10x10x128xbf16, #tpu.memory_space<vmem>>, vector<2x8x8x128xbf16>
    %18 = vector.shape_cast %17 : vector<2x8x8x128xbf16> to vector<128x128xbf16>
    %c0_34 = arith.constant 0 : index
    %c512 = arith.constant 512 : index
    %19 = vector.load %arg9[%c0_34, %c512] : memref<128x1152xbf16, #tpu.memory_space<vmem>>, vector<128x128xbf16>
    tpu.vector_store %arg9[%c0_34, %c512], %18 {strides = array<i32>} : memref<128x1152xbf16, #tpu.memory_space<vmem>>, vector<128x128xbf16>,
    %c0_35 = arith.constant 0 : index
    %c1_36 = arith.constant 1 : index
    %c2_37 = arith.constant 2 : index
    %c0_38 = arith.constant 0 : index
    %20 = vector.load %arg8[%c0_35, %c1_36, %c2_37, %c0_38] : memref<2x10x10x128xbf16, #tpu.memory_space<vmem>>, vector<2x8x8x128xbf16>
    %21 = vector.shape_cast %20 : vector<2x8x8x128xbf16> to vector<128x128xbf16>
    %c0_39 = arith.constant 0 : index
    %c640 = arith.constant 640 : index
    %22 = vector.load %arg9[%c0_39, %c640] : memref<128x1152xbf16, #tpu.memory_space<vmem>>, vector<128x128xbf16>
    tpu.vector_store %arg9[%c0_39, %c640], %21 {strides = array<i32>} : memref<128x1152xbf16, #tpu.memory_space<vmem>>, vector<128x128xbf16>,
    %c0_40 = arith.constant 0 : index
    %c2_41 = arith.constant 2 : index
    %c0_42 = arith.constant 0 : index
    %c0_43 = arith.constant 0 : index
    %23 = vector.load %arg8[%c0_40, %c2_41, %c0_42, %c0_43] : memref<2x10x10x128xbf16, #tpu.memory_space<vmem>>, vector<2x8x8x128xbf16>
    %24 = vector.shape_cast %23 : vector<2x8x8x128xbf16> to vector<128x128xbf16>
    %c0_44 = arith.constant 0 : index
    %c768 = arith.constant 768 : index
    %25 = vector.load %arg9[%c0_44, %c768] : memref<128x1152xbf16, #tpu.memory_space<vmem>>, vector<128x128xbf16>
    tpu.vector_store %arg9[%c0_44, %c768], %24 {strides = array<i32>} : memref<128x1152xbf16, #tpu.memory_space<vmem>>, vector<128x128xbf16>,
    %c0_45 = arith.constant 0 : index
    %c2_46 = arith.constant 2 : index
    %c1_47 = arith.constant 1 : index
    %c0_48 = arith.constant 0 : index
    %26 = vector.load %arg8[%c0_45, %c2_46, %c1_47, %c0_48] : memref<2x10x10x128xbf16, #tpu.memory_space<vmem>>, vector<2x8x8x128xbf16>
    %27 = vector.shape_cast %26 : vector<2x8x8x128xbf16> to vector<128x128xbf16>
    %c0_49 = arith.constant 0 : index
    %c896 = arith.constant 896 : index
    %28 = vector.load %arg9[%c0_49, %c896] : memref<128x1152xbf16, #tpu.memory_space<vmem>>, vector<128x128xbf16>
    tpu.vector_store %arg9[%c0_49, %c896], %27 {strides = array<i32>} : memref<128x1152xbf16, #tpu.memory_space<vmem>>, vector<128x128xbf16>,
    %c0_50 = arith.constant 0 : index
    %c2_51 = arith.constant 2 : index
    %c2_52 = arith.constant 2 : index
    %c0_53 = arith.constant 0 : index
    %29 = vector.load %arg8[%c0_50, %c2_51, %c2_52, %c0_53] : memref<2x10x10x128xbf16, #tpu.memory_space<vmem>>, vector<2x8x8x128xbf16>
    %30 = vector.shape_cast %29 : vector<2x8x8x128xbf16> to vector<128x128xbf16>
    %c0_54 = arith.constant 0 : index
    %c1024 = arith.constant 1024 : index
    %31 = vector.load %arg9[%c0_54, %c1024] : memref<128x1152xbf16, #tpu.memory_space<vmem>>, vector<128x128xbf16>
    tpu.vector_store %arg9[%c0_54, %c1024], %30 {strides = array<i32>} : memref<128x1152xbf16, #tpu.memory_space<vmem>>, vector<128x128xbf16>,
    %c0_55 = arith.constant 0 : index
    %c0_56 = arith.constant 0 : index
    %32 = vector.load %arg9[%c0_55, %c0_56] : memref<128x1152xbf16, #tpu.memory_space<vmem>>, vector<128x1152xbf16>
    %c0_57 = arith.constant 0 : index
    %c0_58 = arith.constant 0 : index
    %33 = vector.load %arg1[%c0_57, %c0_58] : memref<1152x128xbf16, #tpu.memory_space<vmem>>, vector<1152x128xbf16>
    %cst_59 = arith.constant dense<0.000000e+00> : vector<128x128xf32>
    %34 = tpu.matmul %32, %33, %cst_59 {dimension_numbers = #tpu.dot_dimension_numbers<[1], [0], [0], [1], [0, 0, 1, 1], [], []>} : vector<128x1152xbf16>, vector<1152x128xbf16>, vector<128x128xf32> -> vector<128x128xf32>
    %c0_60 = arith.constant 0 : index
    %c0_61 = arith.constant 0 : index
    %35 = vector.load %arg2[%c0_60, %c0_61] : memref<1x128xf32, #tpu.memory_space<vmem>>, vector<1x128xf32>
    %c0_62 = arith.constant 0 : index
    %c0_63 = arith.constant 0 : index
    %36 = vector.load %arg3[%c0_62, %c0_63] : memref<1x128xf32, #tpu.memory_space<vmem>>, vector<1x128xf32>
    %cst_64 = arith.constant dense<0.000000e+00> : vector<128xf32>
    %37 = vector.multi_reduction <add>, %34, %cst_64 [0] : vector<128x128xf32> to vector<128xf32>
    %38 = vector.shape_cast %37 : vector<128xf32> to vector<1x128xf32>
    %cst_65 = arith.constant 1.280000e+02 : f32
    %39 = vector.broadcast %cst_65 : f32 to vector<1x128xf32>
    %40 = arith.divf %38, %39 : vector<1x128xf32>
    %41 = vector.broadcast %40 : vector<1x128xf32> to vector<128x128xf32>
    %42 = arith.subf %34, %41 : vector<128x128xf32>
    %43 = arith.mulf %42, %42 : vector<128x128xf32>
    %cst_66 = arith.constant dense<0.000000e+00> : vector<128xf32>
    %44 = vector.multi_reduction <add>, %43, %cst_66 [0] : vector<128x128xf32> to vector<128xf32>
    %45 = vector.shape_cast %44 : vector<128xf32> to vector<1x128xf32>
    %cst_67 = arith.constant 1.280000e+02 : f32
    %46 = vector.broadcast %cst_67 : f32 to vector<1x128xf32>
    %47 = arith.divf %45, %46 : vector<1x128xf32>
    %cst_68 = arith.constant 9.99999974E-6 : f32
    %48 = vector.broadcast %cst_68 : f32 to vector<1x128xf32>
    %49 = arith.addf %47, %48 : vector<1x128xf32>
    %50 = math.rsqrt %49 : vector<1x128xf32>
    %51 = arith.mulf %35, %50 : vector<1x128xf32>
    %52 = arith.mulf %40, %51 : vector<1x128xf32>
    %53 = arith.subf %36, %52 : vector<1x128xf32>
    %54 = vector.broadcast %51 : vector<1x128xf32> to vector<128x128xf32>
    %55 = arith.mulf %34, %54 : vector<128x128xf32>
    %56 = vector.broadcast %53 : vector<1x128xf32> to vector<128x128xf32>
    %57 = arith.addf %55, %56 : vector<128x128xf32>
    %cst_69 = arith.constant 0.000000e+00 : f32
    %58 = vector.broadcast %cst_69 : f32 to vector<128x128xf32>
    %59 = arith.maximumf %57, %58 : vector<128x128xf32>
    %60 = vector.shape_cast %59 : vector<128x128xf32> to vector<2x8x8x128xf32>
    %61 = arith.truncf %60 : vector<2x8x8x128xf32> to vector<2x8x8x128xbf16>
    %c0_70 = arith.constant 0 : index
    %c1_71 = arith.constant 1 : index
    %c1_72 = arith.constant 1 : index
    %c0_73 = arith.constant 0 : index
    %62 = vector.load %arg8[%c0_70, %c1_71, %c1_72, %c0_73] : memref<2x10x10x128xbf16, #tpu.memory_space<vmem>>, vector<2x8x8x128xbf16>
    tpu.vector_store %arg8[%c0_70, %c1_71, %c1_72, %c0_73], %61 {strides = array<i32>} : memref<2x10x10x128xbf16, #tpu.memory_space<vmem>>, vector<2x8x8x128xbf16>,
    %c0_74 = arith.constant 0 : index
    %c0_75 = arith.constant 0 : index
    %c0_76 = arith.constant 0 : index
    %c0_77 = arith.constant 0 : index
    %63 = vector.load %arg8[%c0_74, %c0_75, %c0_76, %c0_77] : memref<2x10x10x128xbf16, #tpu.memory_space<vmem>>, vector<2x8x8x128xbf16>
    %64 = vector.shape_cast %63 : vector<2x8x8x128xbf16> to vector<128x128xbf16>
    %c0_78 = arith.constant 0 : index
    %c0_79 = arith.constant 0 : index
    %65 = vector.load %arg9[%c0_78, %c0_79] : memref<128x1152xbf16, #tpu.memory_space<vmem>>, vector<128x128xbf16>
    tpu.vector_store %arg9[%c0_78, %c0_79], %64 {strides = array<i32>} : memref<128x1152xbf16, #tpu.memory_space<vmem>>, vector<128x128xbf16>,
    %c0_80 = arith.constant 0 : index
    %c0_81 = arith.constant 0 : index
    %c1_82 = arith.constant 1 : index
    %c0_83 = arith.constant 0 : index
    %66 = vector.load %arg8[%c0_80, %c0_81, %c1_82, %c0_83] : memref<2x10x10x128xbf16, #tpu.memory_space<vmem>>, vector<2x8x8x128xbf16>
    %67 = vector.shape_cast %66 : vector<2x8x8x128xbf16> to vector<128x128xbf16>
    %c0_84 = arith.constant 0 : index
    %c128_85 = arith.constant 128 : index
    %68 = vector.load %arg9[%c0_84, %c128_85] : memref<128x1152xbf16, #tpu.memory_space<vmem>>, vector<128x128xbf16>
    tpu.vector_store %arg9[%c0_84, %c128_85], %67 {strides = array<i32>} : memref<128x1152xbf16, #tpu.memory_space<vmem>>, vector<128x128xbf16>,
    %c0_86 = arith.constant 0 : index
    %c0_87 = arith.constant 0 : index
    %c2_88 = arith.constant 2 : index
    %c0_89 = arith.constant 0 : index
    %69 = vector.load %arg8[%c0_86, %c0_87, %c2_88, %c0_89] : memref<2x10x10x128xbf16, #tpu.memory_space<vmem>>, vector<2x8x8x128xbf16>
    %70 = vector.shape_cast %69 : vector<2x8x8x128xbf16> to vector<128x128xbf16>
    %c0_90 = arith.constant 0 : index
    %c256_91 = arith.constant 256 : index
    %71 = vector.load %arg9[%c0_90, %c256_91] : memref<128x1152xbf16, #tpu.memory_space<vmem>>, vector<128x128xbf16>
    tpu.vector_store %arg9[%c0_90, %c256_91], %70 {strides = array<i32>} : memref<128x1152xbf16, #tpu.memory_space<vmem>>, vector<128x128xbf16>,
    %c0_92 = arith.constant 0 : index
    %c1_93 = arith.constant 1 : index
    %c0_94 = arith.constant 0 : index
    %c0_95 = arith.constant 0 : index
    %72 = vector.load %arg8[%c0_92, %c1_93, %c0_94, %c0_95] : memref<2x10x10x128xbf16, #tpu.memory_space<vmem>>, vector<2x8x8x128xbf16>
    %73 = vector.shape_cast %72 : vector<2x8x8x128xbf16> to vector<128x128xbf16>
    %c0_96 = arith.constant 0 : index
    %c384_97 = arith.constant 384 : index
    %74 = vector.load %arg9[%c0_96, %c384_97] : memref<128x1152xbf16, #tpu.memory_space<vmem>>, vector<128x128xbf16>
    tpu.vector_store %arg9[%c0_96, %c384_97], %73 {strides = array<i32>} : memref<128x1152xbf16, #tpu.memory_space<vmem>>, vector<128x128xbf16>,
    %c0_98 = arith.constant 0 : index
    %c1_99 = arith.constant 1 : index
    %c1_100 = arith.constant 1 : index
    %c0_101 = arith.constant 0 : index
    %75 = vector.load %arg8[%c0_98, %c1_99, %c1_100, %c0_101] : memref<2x10x10x128xbf16, #tpu.memory_space<vmem>>, vector<2x8x8x128xbf16>
    %76 = vector.shape_cast %75 : vector<2x8x8x128xbf16> to vector<128x128xbf16>
    %c0_102 = arith.constant 0 : index
    %c512_103 = arith.constant 512 : index
    %77 = vector.load %arg9[%c0_102, %c512_103] : memref<128x1152xbf16, #tpu.memory_space<vmem>>, vector<128x128xbf16>
    tpu.vector_store %arg9[%c0_102, %c512_103], %76 {strides = array<i32>} : memref<128x1152xbf16, #tpu.memory_space<vmem>>, vector<128x128xbf16>,
    %c0_104 = arith.constant 0 : index
    %c1_105 = arith.constant 1 : index
    %c2_106 = arith.constant 2 : index
    %c0_107 = arith.constant 0 : index
    %78 = vector.load %arg8[%c0_104, %c1_105, %c2_106, %c0_107] : memref<2x10x10x128xbf16, #tpu.memory_space<vmem>>, vector<2x8x8x128xbf16>
    %79 = vector.shape_cast %78 : vector<2x8x8x128xbf16> to vector<128x128xbf16>
    %c0_108 = arith.constant 0 : index
    %c640_109 = arith.constant 640 : index
    %80 = vector.load %arg9[%c0_108, %c640_109] : memref<128x1152xbf16, #tpu.memory_space<vmem>>, vector<128x128xbf16>
    tpu.vector_store %arg9[%c0_108, %c640_109], %79 {strides = array<i32>} : memref<128x1152xbf16, #tpu.memory_space<vmem>>, vector<128x128xbf16>,
    %c0_110 = arith.constant 0 : index
    %c2_111 = arith.constant 2 : index
    %c0_112 = arith.constant 0 : index
    %c0_113 = arith.constant 0 : index
    %81 = vector.load %arg8[%c0_110, %c2_111, %c0_112, %c0_113] : memref<2x10x10x128xbf16, #tpu.memory_space<vmem>>, vector<2x8x8x128xbf16>
    %82 = vector.shape_cast %81 : vector<2x8x8x128xbf16> to vector<128x128xbf16>
    %c0_114 = arith.constant 0 : index
    %c768_115 = arith.constant 768 : index
    %83 = vector.load %arg9[%c0_114, %c768_115] : memref<128x1152xbf16, #tpu.memory_space<vmem>>, vector<128x128xbf16>
    tpu.vector_store %arg9[%c0_114, %c768_115], %82 {strides = array<i32>} : memref<128x1152xbf16, #tpu.memory_space<vmem>>, vector<128x128xbf16>,
    %c0_116 = arith.constant 0 : index
    %c2_117 = arith.constant 2 : index
    %c1_118 = arith.constant 1 : index
    %c0_119 = arith.constant 0 : index
    %84 = vector.load %arg8[%c0_116, %c2_117, %c1_118, %c0_119] : memref<2x10x10x128xbf16, #tpu.memory_space<vmem>>, vector<2x8x8x128xbf16>
    %85 = vector.shape_cast %84 : vector<2x8x8x128xbf16> to vector<128x128xbf16>
    %c0_120 = arith.constant 0 : index
    %c896_121 = arith.constant 896 : index
    %86 = vector.load %arg9[%c0_120, %c896_121] : memref<128x1152xbf16, #tpu.memory_space<vmem>>, vector<128x128xbf16>
    tpu.vector_store %arg9[%c0_120, %c896_121], %85 {strides = array<i32>} : memref<128x1152xbf16, #tpu.memory_space<vmem>>, vector<128x128xbf16>,
    %c0_122 = arith.constant 0 : index
    %c2_123 = arith.constant 2 : index
    %c2_124 = arith.constant 2 : index
    %c0_125 = arith.constant 0 : index
    %87 = vector.load %arg8[%c0_122, %c2_123, %c2_124, %c0_125] : memref<2x10x10x128xbf16, #tpu.memory_space<vmem>>, vector<2x8x8x128xbf16>
    %88 = vector.shape_cast %87 : vector<2x8x8x128xbf16> to vector<128x128xbf16>
    %c0_126 = arith.constant 0 : index
    %c1024_127 = arith.constant 1024 : index
    %89 = vector.load %arg9[%c0_126, %c1024_127] : memref<128x1152xbf16, #tpu.memory_space<vmem>>, vector<128x128xbf16>
    tpu.vector_store %arg9[%c0_126, %c1024_127], %88 {strides = array<i32>} : memref<128x1152xbf16, #tpu.memory_space<vmem>>, vector<128x128xbf16>,
    %c0_128 = arith.constant 0 : index
    %c0_129 = arith.constant 0 : index
    %90 = vector.load %arg9[%c0_128, %c0_129] : memref<128x1152xbf16, #tpu.memory_space<vmem>>, vector<128x1152xbf16>
    %c0_130 = arith.constant 0 : index
    %c0_131 = arith.constant 0 : index
    %91 = vector.load %arg4[%c0_130, %c0_131] : memref<1152x128xbf16, #tpu.memory_space<vmem>>, vector<1152x128xbf16>
    %cst_132 = arith.constant dense<0.000000e+00> : vector<128x128xf32>
    %92 = tpu.matmul %90, %91, %cst_132 {dimension_numbers = #tpu.dot_dimension_numbers<[1], [0], [0], [1], [0, 0, 1, 1], [], []>} : vector<128x1152xbf16>, vector<1152x128xbf16>, vector<128x128xf32> -> vector<128x128xf32>
    %c0_133 = arith.constant 0 : index
    %c0_134 = arith.constant 0 : index
    %93 = vector.load %arg5[%c0_133, %c0_134] : memref<1x128xf32, #tpu.memory_space<vmem>>, vector<1x128xf32>
    %c0_135 = arith.constant 0 : index
    %c0_136 = arith.constant 0 : index
    %94 = vector.load %arg6[%c0_135, %c0_136] : memref<1x128xf32, #tpu.memory_space<vmem>>, vector<1x128xf32>
    %cst_137 = arith.constant dense<0.000000e+00> : vector<128xf32>
    %95 = vector.multi_reduction <add>, %92, %cst_137 [0] : vector<128x128xf32> to vector<128xf32>
    %96 = vector.shape_cast %95 : vector<128xf32> to vector<1x128xf32>
    %cst_138 = arith.constant 1.280000e+02 : f32
    %97 = vector.broadcast %cst_138 : f32 to vector<1x128xf32>
    %98 = arith.divf %96, %97 : vector<1x128xf32>
    %99 = vector.broadcast %98 : vector<1x128xf32> to vector<128x128xf32>
    %100 = arith.subf %92, %99 : vector<128x128xf32>
    %101 = arith.mulf %100, %100 : vector<128x128xf32>
    %cst_139 = arith.constant dense<0.000000e+00> : vector<128xf32>
    %102 = vector.multi_reduction <add>, %101, %cst_139 [0] : vector<128x128xf32> to vector<128xf32>
    %103 = vector.shape_cast %102 : vector<128xf32> to vector<1x128xf32>
    %cst_140 = arith.constant 1.280000e+02 : f32
    %104 = vector.broadcast %cst_140 : f32 to vector<1x128xf32>
    %105 = arith.divf %103, %104 : vector<1x128xf32>
    %cst_141 = arith.constant 9.99999974E-6 : f32
    %106 = vector.broadcast %cst_141 : f32 to vector<1x128xf32>
    %107 = arith.addf %105, %106 : vector<1x128xf32>
    %108 = math.rsqrt %107 : vector<1x128xf32>
    %109 = arith.mulf %93, %108 : vector<1x128xf32>
    %110 = arith.mulf %98, %109 : vector<1x128xf32>
    %111 = arith.subf %94, %110 : vector<1x128xf32>
    %112 = vector.broadcast %109 : vector<1x128xf32> to vector<128x128xf32>
    %113 = arith.mulf %92, %112 : vector<128x128xf32>
    %114 = vector.broadcast %111 : vector<1x128xf32> to vector<128x128xf32>
    %115 = arith.addf %113, %114 : vector<128x128xf32>
    %116 = vector.shape_cast %2 : vector<2x8x8x128xf32> to vector<128x128xf32>
    %117 = arith.addf %115, %116 : vector<128x128xf32>
    %cst_142 = arith.constant 0.000000e+00 : f32
    %118 = vector.broadcast %cst_142 : f32 to vector<128x128xf32>
    %119 = arith.maximumf %117, %118 : vector<128x128xf32>
    %120 = vector.shape_cast %119 : vector<128x128xf32> to vector<2x8x8x128xf32>
    %c0_143 = arith.constant 0 : index
    %c0_144 = arith.constant 0 : index
    %c0_145 = arith.constant 0 : index
    %c0_146 = arith.constant 0 : index
    %121 = vector.load %arg7[%c0_143, %c0_144, %c0_145, %c0_146] : memref<2x8x8x128xf32, #tpu.memory_space<vmem>>, vector<2x8x8x128xf32>
    tpu.vector_store %arg7[%c0_143, %c0_144, %c0_145, %c0_146], %120 {strides = array<i32>} : memref<2x8x8x128xf32, #tpu.memory_space<vmem>>, vector<2x8x8x128xf32>,
    return
  }
}

</mosaic_0001>

<bundles_post_ra>
// kernel: residual_block_pallas.1
= control target key start
LH: loop header
LB: loop body
LE: loop exit
PB: predicated region body
PF: predicated region fallthrough
CT: control target
= control target key end

     0   :  { %v7851_v2 = vmov 0   ;;  %vm309_vm0 = vcmask 1043456   ;;  %vm310_vm1 = vsmask.f32 7938  ;;  %vm315_vm2 = vcmask 1040384   ;;  %s9556_s0 = inlined_call_operand.vmem [shape: f32[2,8,8,128], index: 0, kind: input, shape index: {}]   ;;  %s9557_s1 = inlined_call_operand.vmem [shape: bf16[1152,128], index: 1, kind: input, shape index: {}]   ;;  %s9558_s2 = inlined_call_operand.vmem [shape: f32[1,128], index: 2, kind: input, shape index: {}]   ;;  %s9559_s3 = inlined_call_operand.vmem [shape: f32[1,128], index: 3, kind: input, shape index: {}]   ;;  %s9560_s4 = inlined_call_operand.vmem [shape: bf16[1152,128], index: 4, kind: input, shape index: {}]   ;;  %s9561_s5 = inlined_call_operand.vmem [shape: f32[1,128], index: 5, kind: input, shape index: {}]   ;;  %s9562_s6 = inlined_call_operand.vmem [shape: f32[1,128], index: 6, kind: input, shape index: {}]   ;;  %s9563_s7 = inlined_call_operand.hbm [shape: f32[2,8,8,128], index: 7, kind: output, shape index: {}]  }
   0x1   :  { %v7615_v0 = vld [vmem:[%s9557_s1 + $0x40] sm:$0xff]   ;;  %28 = vst [vmem:[#allocation2] sm:$0xf] %v7851_v2  ;;  %29 = vst [vmem:[#allocation2 + $0x4] sm:$0x1] %v7851_v2  ;;  %v7619_v5 = vld [vmem:[%s9557_s1 + $0x48] sm:$0xff]  }
   0x2   :  { %v7616_v1 = vld [vmem:[%s9557_s1 + $0xc0] sm:$0xff]   ;;  %30 = vst [vmem:[#allocation2 + $0x8] sm:$0xf] %v7851_v2  ;;  %31 = vst [vmem:[#allocation2 + $0xc] sm:$0x1] %v7851_v2  ;;  %7003 = vmatprep.subr.bf16.mxu0 %v7615_v0  ;;  %v7620_v6 = vld [vmem:[%s9557_s1 + $0xc8] sm:$0xff]  }
   0x3   :  { %32 = vst [vmem:[#allocation2 + $0x10] sm:$0xf] %v7851_v2  ;;  %33 = vst [vmem:[#allocation2 + $0x14] sm:$0x1] %v7851_v2  ;;  %v7617_v3 = vld [vmem:[%s9557_s1] sm:$0xff]   ;;  %7067 = vmatprep.subr.bf16.mxu1 %v7616_v1  ;;  %v7621_v7 = vld [vmem:[%s9557_s1 + $0x8] sm:$0xff]  }
   0x4   :  { %34 = vst [vmem:[#allocation2 + $0x18] sm:$0xf] %v7851_v2  ;;  %35 = vst [vmem:[#allocation2 + $0x1c] sm:$0x1] %v7851_v2  ;;  %v7618_v4 = vld [vmem:[%s9557_s1 + $0x80] sm:$0xff]   ;;  %7004 = vmatpush3.bf16.msra.mxu0 %v7617_v3  ;;  %v7622_v8 = vld [vmem:[%s9557_s1 + $0x88] sm:$0xff]  }
   0x5   :  { %36 = vst [vmem:[#allocation2 + $0x20] sm:$0xf] %v7851_v2  ;;  %37 = vst [vmem:[#allocation2 + $0x24] sm:$0x1] %v7851_v2  ;;  %7068 = vmatpush3.bf16.msra.mxu1 %v7618_v4  ;;  %7005 = vmatprep.subr.bf16.mxu0 %v7619_v5  ;;  %v7623_v9 = vld [vmem:[%s9557_s1 + $0x50] sm:$0xff]   ;;  %v7627_v13 = vld [vmem:[%s9557_s1 + $0x58] sm:$0xff]  }
   0x6   :  { %38 = vst [vmem:[#allocation2 + $0x28] sm:$0xf] %v7851_v2  ;;  %39 = vst [vmem:[#allocation2 + $0x2c] sm:$0x1] %v7851_v2  ;;  %7069 = vmatprep.subr.bf16.mxu1 %v7620_v6  ;;  %v7624_v10 = vld [vmem:[%s9557_s1 + $0xd0] sm:$0xff]   ;;  %v7628_v14 = vld [vmem:[%s9557_s1 + $0xd8] sm:$0xff]  }
   0x7   :  { %40 = vst [vmem:[#allocation2 + $0x30] sm:$0xf] %v7851_v2  ;;  %41 = vst [vmem:[#allocation2 + $0x34] sm:$0x1] %v7851_v2  ;;  %v7625_v11 = vld [vmem:[%s9557_s1 + $0x10] sm:$0xff]   ;;  %v7629_v15 = vld [vmem:[%s9557_s1 + $0x18] sm:$0xff]  }
   0x8   :  { %42 = vst [vmem:[#allocation2 + $0x38] sm:$0xf] %v7851_v2  ;;  %43 = vst [vmem:[#allocation2 + $0x3c] sm:$0x1] %v7851_v2  ;;  %7006 = vmatpush3.bf16.msra.mxu0 %v7621_v7  ;;  %v7626_v12 = vld [vmem:[%s9557_s1 + $0x90] sm:$0xff]   ;;  %v7630_v16 = vld [vmem:[%s9557_s1 + $0x98] sm:$0xff]  }
   0x9   :  { %44 = vst [vmem:[#allocation2 + $0x40] sm:$0xf] %v7851_v2  ;;  %45 = vst [vmem:[#allocation2 + $0x44] sm:$0x1] %v7851_v2  ;;  %7070 = vmatpush3.bf16.msra.mxu1 %v7622_v8  ;;  %7007 = vmatprep.subr.bf16.mxu0 %v7623_v9  ;;  %v7631_v17 = vld [vmem:[%s9557_s1 + $0x60] sm:$0xff]   ;;  %v7635_v21 = vld [vmem:[%s9557_s1 + $0x68] sm:$0xff]  }
   0xa   :  { %46 = vst [vmem:[#allocation2 + $0x48] sm:$0xf] %v7851_v2  ;;  %47 = vst [vmem:[#allocation2 + $0x4c] sm:$0x1] %v7851_v2  ;;  %7071 = vmatprep.subr.bf16.mxu1 %v7624_v10  ;;  %v7632_v18 = vld [vmem:[%s9557_s1 + $0xe0] sm:$0xff]   ;;  %v7636_v22 = vld [vmem:[%s9557_s1 + $0xe8] sm:$0xff]  }
   0xb   :  { %48 = vst [vmem:[#allocation2 + $0x50] sm:$0xf] %v7851_v2  ;;  %49 = vst [vmem:[#allocation2 + $0x54] sm:$0x1] %v7851_v2  ;;  %v7633_v19 = vld [vmem:[%s9557_s1 + $0x20] sm:$0xff]   ;;  %v7637_v23 = vld [vmem:[%s9557_s1 + $0x28] sm:$0xff]  }
   0xc   :  { %50 = vst [vmem:[#allocation2 + $0x58] sm:$0xf] %v7851_v2  ;;  %51 = vst [vmem:[#allocation2 + $0x5c] sm:$0x1] %v7851_v2  ;;  %7008 = vmatpush3.bf16.msra.mxu0 %v7625_v11  ;;  %v7634_v20 = vld [vmem:[%s9557_s1 + $0xa0] sm:$0xff]   ;;  %v7638_v24 = vld [vmem:[%s9557_s1 + $0xa8] sm:$0xff]  }
   0xd   :  { %52 = vst [vmem:[#allocation2 + $0x60] sm:$0xf] %v7851_v2  ;;  %53 = vst [vmem:[#allocation2 + $0x64] sm:$0x1] %v7851_v2  ;;  %7072 = vmatpush3.bf16.msra.mxu1 %v7626_v12  ;;  %7009 = vmatprep.subr.bf16.mxu0 %v7627_v13  ;;  %v7639_v25 = vld [vmem:[%s9557_s1 + $0x70] sm:$0xff]   ;;  %v7643_v29 = vld [vmem:[%s9557_s1 + $0x78] sm:$0xff]  }
   0xe   :  { %54 = vst [vmem:[#allocation2 + $0x68] sm:$0xf] %v7851_v2  ;;  %55 = vst [vmem:[#allocation2 + $0x6c] sm:$0x1] %v7851_v2  ;;  %7073 = vmatprep.subr.bf16.mxu1 %v7628_v14  ;;  %v7640_v26 = vld [vmem:[%s9557_s1 + $0xf0] sm:$0xff]   ;;  %v7644_v30 = vld [vmem:[%s9557_s1 + $0xf8] sm:$0xff]  }
   0xf   :  { %56 = vst [vmem:[#allocation2 + $0x70] sm:$0xf] %v7851_v2  ;;  %57 = vst [vmem:[#allocation2 + $0x74] sm:$0x1] %v7851_v2  ;;  %v7641_v27 = vld [vmem:[%s9557_s1 + $0x30] sm:$0xff]   ;;  %v7645_v31 = vld [vmem:[%s9557_s1 + $0x38] sm:$0xff]  }
  0x10   :  { %58 = vst [vmem:[#allocation2 + $0x78] sm:$0xf] %v7851_v2  ;;  %59 = vst [vmem:[#allocation2 + $0x7c] sm:$0x1] %v7851_v2  ;;  %7010 = vmatpush3.bf16.msra.mxu0 %v7629_v15  ;;  %v7642_v28 = vld [vmem:[%s9557_s1 + $0xb0] sm:$0xff]   ;;  %v7646_v32 = vld [vmem:[%s9557_s1 + $0xb8] sm:$0xff]  }
  0x11   :  { %60 = vst [vmem:[#allocation2 + $0x80] sm:$0xf] %v7851_v2  ;;  %61 = vst [vmem:[#allocation2 + $0x84] sm:$0x1] %v7851_v2  ;;  %7074 = vmatpush3.bf16.msra.mxu1 %v7630_v16  ;;  %7011 = vmatprep.subr.bf16.mxu0 %v7631_v17  ;;  %v68_v33 = vld [vmem:[%s9556_s0] sm:$0xff]  ;;  %v69_v34 = vld [vmem:[%s9556_s0 + $0x8] sm:$0xff] }
  0x12   :  { %62 = vst [vmem:[#allocation2 + $0x88] sm:$0xf] %v7851_v2  ;;  %63 = vst [vmem:[#allocation2 + $0x8c] sm:$0x1] %v7851_v2  ;;  %7075 = vmatprep.subr.bf16.mxu1 %v7632_v18  ;;  %v6971_v35 = vpack.c.bf16 %v68_v33, %v68_v33  ;;  %v6972_v36 = vpack.c.bf16 %v69_v34, %v69_v34  ;;  %v483_v37 = vld [vmem:[#allocation2] sm:$0xf] }
  0x13   :  { %64 = vst [vmem:[#allocation2 + $0x90] sm:$0xf] %v7851_v2  ;;  %65 = vst [vmem:[#allocation2 + $0x94] sm:$0x1] %v7851_v2  ;;  %vm316_vm3 = vsmask.f32 256 }
  0x14   :  { %66 = vst [vmem:[#allocation2 + $0x98] sm:$0xf] %v7851_v2  ;;  %67 = vst [vmem:[#allocation2 + $0x9c] sm:$0x1] %v7851_v2  ;;  %7012 = vmatpush3.bf16.msra.mxu0 %v7633_v19  ;;  %v149_v38 = vshrl.u32 %v6971_v35, 16  ;;  %v152_v39 = vshll.u32 %v6971_v35, 16 }
  0x15   :  { %7076 = vmatpush3.bf16.msra.mxu1 %v7634_v20  ;;  %7013 = vmatprep.subr.bf16.mxu0 %v7635_v21  ;;  %v484_v40 = vld [vmem:[#allocation2 + $0x4] sm:$0x1]  ;;  %v312_v41 = vld [vmem:[#allocation2 + $0x8] sm:$0xf]  ;;  %v157_v42 = vshrl.u32 %v6972_v36, 16  ;;  %v160_v43 = vshll.u32 %v6972_v36, 16  ;;  %vm8000_vm4 = vmand %vm309_vm0, %vm310_vm1 }
  0x16   :  { %7077 = vmatprep.subr.bf16.mxu1 %v7636_v22  ;;  %v7649_v44 = vld [vmem:[%s9557_s1 + $0x140] sm:$0xff]   ;;  %v151_v45 = vrot.slane %v149_v38, 7  ;;  %v318_v47 = vld [vmem:[#allocation2 + $0xc] sm:$0x1]  ;;  %v519_v48 = vshrl.u32 %v483_v37, 16  ;;  %v522_v49 = vshll.u32 %v483_v37, 16  ;;  %vm8005_vm5 = vmand %vm315_vm2, %vm316_vm3 }
  0x17   :  { %v159_v51 = vrot.slane %v157_v42, 7  ;;  %v321_v52 = vld [vmem:[#allocation2 + $0x10] sm:$0xf]  ;;  %v528_v56 = vshll.u32 %v484_v40, 16  ;;  %vm846_vm6 = vcmask 1042432   ;;  %v71_v60 = vld [vmem:[%s9556_s0 + $0x18] sm:$0xff] }
  0x18   :  { %7014 = vmatpush3.bf16.msra.mxu0 %v7637_v23  ;;  %v70_v53 = vld [vmem:[%s9556_s0 + $0x10] sm:$0xff]  ;;  %v154_v54 = vor.u32 %v152_v39, %v151_v45  ;;  %v155_v55 = vrot.slane %v151_v45, 4  ;;  %vm515_vm7 = vsmask.f32 3328  ;;  %vm516_vm8 = vsmask.f32 7440 }
  0x19   :  { %7078 = vmatpush3.bf16.msra.mxu1 %v7638_v24  ;;  %7015 = vmatprep.subr.bf16.mxu0 %v7639_v25  ;;  %v162_v57 = vor.u32 %v160_v43, %v159_v51  ;;  %v163_v58 = vrot.slane %v159_v51, 4  ;;  %v6973_v59 = vpack.c.bf16 %v70_v53, %v70_v53  ;;  %v521_v63 = vrot.slane %v519_v48, 4  ;;  %v324_v1 = vld [vmem:[#allocation2 + $0x14] sm:$0x1]  ;;  %v782_v3 = vld [vmem:[#allocation2] sm:$0xe]  ;;  %vm8042_vm11 = vmor %vm515_vm7, %vm516_vm8 }
  0x1a   :  { %7079 = vmatprep.subr.bf16.mxu1 %v7640_v26  ;;  %v313_v61 = vsel %vm8000_vm4, %v154_v54, %v312_v41  ;;  %v319_v62 = vsel %vm8005_vm5, %v155_v55, %v318_v47  ;;  %v524_v0 = vrot.slane %v522_v49, 5  ;;  %v783_v4 = vld [vmem:[#allocation2 + $0x4] sm:$0x1]  ;;  %v6974_v8 = vpack.c.bf16 %v71_v60, %v71_v60  ;;  %v327_v12 = vld [vmem:[#allocation2 + $0x18] sm:$0xf] }
  0x1b   :  { %314 = vst [vmem:[#allocation2 + $0x8] sm:$0xf] %v313_v61  ;;  %320 = vst [vmem:[#allocation2 + $0xc] sm:$0x1] %v319_v62  ;;  %v322_v2 = vsel %vm8000_vm4, %v162_v57, %v321_v52  ;;  %v165_v5 = vshrl.u32 %v6973_v59, 16  ;;  %v168_v6 = vshll.u32 %v6973_v59, 16  ;;  %v325_v7 = vsel %vm8005_vm5, %v163_v58, %v324_v1 }
  0x1c   :  { %7016 = vmatpush3.bf16.msra.mxu0 %v7641_v27  ;;  %323 = vst [vmem:[#allocation2 + $0x10] sm:$0xf] %v322_v2  ;;  %326 = vst [vmem:[#allocation2 + $0x14] sm:$0x1] %v325_v7  ;;  %v8023_v9 = vrot.slane %v528_v56, 5  ;;  %vm847_vm9 = vcmask 1046532   ;;  %v525_v21 = vor.u32 %v524_v0, %v521_v63 }
  0x1d   :  { %7080 = vmatpush3.bf16.msra.mxu1 %v7642_v28  ;;  %7017 = vmatprep.subr.bf16.mxu0 %v7643_v29  ;;  %v167_v10 = vrot.slane %v165_v5, 7  ;;  %v72_v11 = vld [vmem:[%s9556_s0 + $0x20] sm:$0xff]  ;;  %v330_v13 = vld [vmem:[#allocation2 + $0x1c] sm:$0x1]  ;;  %v173_v14 = vshrl.u32 %v6974_v8, 16  ;;  %v176_v15 = vshll.u32 %v6974_v8, 16  ;;  %vm8034_vm10 = vmor %vm846_vm6, %vm847_vm9 }
  0x1e   :  { %7081 = vmatprep.subr.bf16.mxu1 %v7644_v30  ;;  %v6975_v16 = vpack.c.bf16 %v72_v11, %v72_v11  ;;  %v6587_v17 = vrot.slane %v782_v3, 9  ;;  %v851_v18 = vrot.slane %v783_v4, 5  ;;  %v333_v23 = vld [vmem:[#allocation2 + $0x20] sm:$0xf]  ;;  %v336_v27 = vld [vmem:[#allocation2 + $0x24] sm:$0x1] }
  0x1f   :  { %v170_v19 = vor.u32 %v168_v6, %v167_v10  ;;  %v171_v20 = vrot.slane %v167_v10, 4  ;;  %v175_v22 = vrot.slane %v173_v14, 7  ;;  %v526_v36 = vrot.slane %v525_v21, 4  ;;  %v339_v60 = vld [vmem:[#allocation2 + $0x28] sm:$0xf]  ;;  %v7650_v6 = vld [vmem:[%s9557_s1 + $0x100] sm:$0xff]  }
  0x20   :  { %7018 = vmatpush3.bf16.msra.mxu0 %v7645_v31  ;;  %v181_v24 = vshrl.u32 %v6975_v16, 16  ;;  %v184_v39 = vshll.u32 %v6975_v16, 16  ;;  %v852_v48 = vsel %vm8034_vm10, %v6587_v17, %v851_v18  ;;  %v73_v3 = vld [vmem:[%s9556_s0 + $0x28] sm:$0xff] }
  0x21   :  { %7082 = vmatpush3.bf16.msra.mxu1 %v7646_v32  ;;  %7131 = vmatprep.subr.bf16.mxu0 %v7649_v44  ;;  %v328_v25 = vsel %vm8000_vm4, %v170_v19, %v327_v12  ;;  %v331_v26 = vsel %vm8005_vm5, %v171_v20, %v330_v13  ;;  %v178_v30 = vor.u32 %v176_v15, %v175_v22  ;;  %v179_v35 = vrot.slane %v175_v22, 4  ;;  %v7653_v22 = vld [vmem:[%s9557_s1 + $0x148] sm:$0xff]  }
  0x22   :  { %v485_v28 = vld [vmem:[#allocation2 + $0x8] sm:$0xf]  ;;  %v486_v29 = vld [vmem:[#allocation2 + $0xc] sm:$0x1]  ;;  %329 = vst [vmem:[#allocation2 + $0x18] sm:$0xf] %v328_v25  ;;  %v531_v61 = vsel %vm8042_vm11, %v526_v36, %v8023_v9 }
  0x23   :  { %332 = vst [vmem:[#allocation2 + $0x1c] sm:$0x1] %v331_v26  ;;  %v533_v31 = vshrl.u32 %v485_v28, 16  ;;  %v536_v32 = vshll.u32 %v485_v28, 16  ;;  %v542_v33 = vshll.u32 %v486_v29, 16  ;;  %v334_v38 = vsel %vm8000_vm4, %v178_v30, %v333_v23  ;;  %v74_v30 = vld [vmem:[%s9556_s0 + $0x30] sm:$0xff] }
  0x24   :  { %v7647_v37 = vld [vmem:[#allocation2 + $0x8] ss:$8 sps:$4 sm:$0xff]   ;;  %335 = vst [vmem:[#allocation2 + $0x20] sm:$0xf] %v334_v38  ;;  %v8046_v44 = vrot.slane %v181_v24, 7  ;;  %v337_v51 = vsel %vm8005_vm5, %v179_v35, %v336_v27  ;;  %v6976_v29 = vpack.c.bf16 %v73_v3, %v73_v3 }
  0x25   :  { %v535_v41 = vrot.slane %v533_v31, 4  ;;  %v538_v42 = vrot.slane %v536_v32, 5  ;;  %v544_v43 = vrot.slane %v542_v33, 5  ;;  %2803 = vmatprep.mubr.bf16.mxu1 %v7647_v37  ;;  %v784_v45 = vld [vmem:[#allocation2 + $0x8] sm:$0xe] }
  0x26   :  { %v785_v47 = vld [vmem:[#allocation2 + $0xc] sm:$0x1]  ;;  %v487_v49 = vld [vmem:[#allocation2 + $0x10] sm:$0xf]  ;;  %v6588_v53 = vrot.slane %v784_v45, 9  ;;  %v186_v59 = vor.u32 %v184_v39, %v8046_v44  ;;  %v187_v28 = vrot.slane %v8046_v44, 4 }
  0x27   :  { %v539_v52 = vor.u32 %v538_v42, %v535_v41  ;;  %v855_v54 = vrot.slane %v785_v47, 5  ;;  %v488_v55 = vld [vmem:[#allocation2 + $0x14] sm:$0x1]  ;;  %v547_v56 = vshrl.u32 %v487_v49, 16  ;;  %338 = vst [vmem:[#allocation2 + $0x24] sm:$0x1] %v337_v51 }
  0x28   :  { %v550_v57 = vshll.u32 %v487_v49, 16  ;;  %v556_v58 = vshll.u32 %v488_v55, 16  ;;  %v7648_v4 = vld [vmem:[#allocation2] ss:$8 sps:$4 sm:$0xff]   ;;  %v786_v9 = vld [vmem:[#allocation2 + $0x10] sm:$0xe]  ;;  %v340_v13 = vsel %vm8000_vm4, %v186_v59, %v339_v60 }
  0x29   :  { %v540_v62 = vrot.slane %v539_v52, 4  ;;  %v856_v63 = vsel %vm8034_vm10, %v6588_v53, %v855_v54  ;;  %v489_v0 = vld [vmem:[#allocation2 + $0x18] sm:$0xf]  ;;  %v549_v2 = vrot.slane %v547_v56, 4  ;;  %341 = vst [vmem:[#allocation2 + $0x28] sm:$0xf] %v340_v13 }
  0x2a   :  { %v490_v1 = vld [vmem:[#allocation2 + $0x1c] sm:$0x1]  ;;  %v6603_v5 = vcombine.low %v852_v48, %v856_v63  ;;  %v552_v7 = vrot.slane %v550_v57, 5  ;;  %v561_v8 = vshrl.u32 %v489_v0, 16  ;;  %v564_v11 = vshll.u32 %v489_v0, 16  ;;  %v7654_v27 = vld [vmem:[%s9557_s1 + $0x108] sm:$0xff]  }
  0x2b   :  { %v545_v10 = vsel %vm8042_vm11, %v540_v62, %v544_v43  ;;  %v570_v12 = vshll.u32 %v490_v1, 16  ;;  %v558_v16 = vrot.slane %v556_v58, 5  ;;  %v7651_v18 = vld [vmem:[#allocation2 + $0x18] ss:$8 sps:$4 sm:$0xff]   ;;  %v6589_v21 = vrot.slane %v786_v9, 9  ;;  %v7657_v49 = vld [vmem:[%s9557_s1 + $0x150] sm:$0xff]  }
  0x2c   :  { %v6579_v14 = vcombine.low %v531_v61, %v545_v10  ;;  %2804 = vmatmul.mubr.bf16.vlgmr.msra.gmra.mrb[0].mxu1 %v6603_v5  ;;  %v553_v15 = vor.u32 %v552_v7, %v549_v2  ;;  %v563_v17 = vrot.slane %v561_v8, 4  ;;  %v566_v19 = vrot.slane %v564_v11, 5  ;;  %v342_v23 = vld [vmem:[#allocation2 + $0x2c] sm:$0x1]  ;;  %v787_v25 = vld [vmem:[#allocation2 + $0x14] sm:$0x1] }
  0x2d   :  { %v572_v20 = vrot.slane %v570_v12, 5  ;;  %2811 = vmatprep.mubr.bf16.mxu1 %v7651_v18  ;;  %v788_v26 = vld [vmem:[#allocation2 + $0x18] sm:$0xe]  ;;  %v789_v32 = vld [vmem:[#allocation2 + $0x1c] sm:$0x1]  ;;  %v859_v33 = vrot.slane %v787_v25, 5  ;;  %v343_v39 = vsel %vm8005_vm5, %v187_v28, %v342_v23  ;;  %v6977_v63 = vpack.c.bf16 %v74_v30, %v74_v30 }
  0x2e   :  { %2706 = vmatprep.mubr.bf16.mxu0 %v6579_v14  ;;  %v554_v24 = vrot.slane %v553_v15, 4  ;;  %v567_v31 = vor.u32 %v566_v19, %v563_v17  ;;  %v6590_v35 = vrot.slane %v788_v26, 9  ;;  %v491_v36 = vld [vmem:[#allocation2 + $0x20] sm:$0xf]  ;;  %v863_v38 = vrot.slane %v789_v32, 5  ;;  %v75_v56 = vld [vmem:[%s9556_s0 + $0x38] sm:$0xff] }
  0x2f   :  { %2707 = vmatmul.mubr.bf16.vlgmr.msra.gmra.mrb[0].mxu0 %v7648_v4  ;;  %v492_v41 = vld [vmem:[#allocation2 + $0x24] sm:$0x1]  ;;  %v575_v42 = vshrl.u32 %v491_v36, 16  ;;  %v7652_v44 = vld [vmem:[#allocation2 + $0x10] ss:$8 sps:$4 sm:$0xff]   ;;  %v860_v45 = vsel %vm8034_vm10, %v6589_v21, %v859_v33  ;;  %v578_v47 = vshll.u32 %v491_v36, 16  ;;  %v6978_v8 = vpack.c.bf16 %v75_v56, %v75_v56 }
  0x30   :  { %7132 = vmatpush3.bf16.msra.mxu0 %v7650_v6  ;;  %v559_v37 = vsel %vm8042_vm11, %v554_v24, %v558_v16  ;;  %v568_v43 = vrot.slane %v567_v31, 4  ;;  %344 = vst [vmem:[#allocation2 + $0x2c] sm:$0x1] %v343_v39  ;;  %v584_v48 = vshll.u32 %v492_v41, 16  ;;  %v864_v51 = vsel %vm8034_vm10, %v6590_v35, %v863_v38  ;;  %v790_v55 = vld [vmem:[#allocation2 + $0x20] sm:$0xe] }
  0x31   :  { %7133 = vmatprep.subr.bf16.mxu0 %v7653_v22  ;;  %v577_v52 = vrot.slane %v575_v42, 4  ;;  %v189_v53 = vshrl.u32 %v6976_v29, 16  ;;  %v192_v54 = vshll.u32 %v6976_v29, 16  ;;  %v6604_v58 = vcombine.low %v860_v45, %v864_v51  ;;  %v493_v59 = vld [vmem:[#allocation2 + $0x28] sm:$0xf]  ;;  %v7658_v4 = vld [vmem:[%s9557_s1 + $0x110] sm:$0xff]  }
  0x32   :  { %v573_v57 = vsel %vm8042_vm11, %v568_v43, %v572_v20  ;;  %v580_v60 = vrot.slane %v578_v47, 5  ;;  %v345_v61 = vld [vmem:[#allocation2 + $0x30] sm:$0xf]  ;;  %v791_v62 = vld [vmem:[#allocation2 + $0x24] sm:$0x1]  ;;  %v589_v1 = vshrl.u32 %v493_v59, 16 }
  0x33   :  { %v6580_v0 = vcombine.low %v559_v37, %v573_v57  ;;  %v592_v2 = vshll.u32 %v493_v59, 16  ;;  %v191_v3 = vrot.slane %v189_v53, 7  ;;  %v586_v6 = vrot.slane %v584_v48, 5  ;;  %v792_v7 = vld [vmem:[#allocation2 + $0x28] sm:$0xe]  ;;  %v7661_v9 = vld [vmem:[%s9557_s1 + $0x158] sm:$0xff]  }
  0x34   :  { %7134 = vmatpush3.bf16.msra.mxu0 %v7654_v27  ;;  %2812 = vmatmul.mubr.bf16.gmra.mrb[4].mxu1 %v6604_v58  ;;  %v581_v5 = vor.u32 %v580_v60, %v577_v52  ;;  %v591_v10 = vrot.slane %v589_v1, 4  ;;  %v348_v14 = vld [vmem:[#allocation2 + $0x34] sm:$0x1]  ;;  %v6591_v16 = vrot.slane %v790_v55, 9  ;;  %v867_v17 = vrot.slane %v791_v62, 5  ;;  %v7662_v19 = vld [vmem:[%s9557_s1 + $0x118] sm:$0xff]  }
  0x35   :  { %7135 = vmatprep.subr.bf16.mxu0 %v7657_v49  ;;  %2714 = vmatprep.mubr.bf16.mxu0 %v6580_v0  ;;  %v594_v11 = vrot.slane %v592_v2, 5  ;;  %v194_v12 = vor.u32 %v192_v54, %v191_v3  ;;  %v195_v13 = vrot.slane %v191_v3, 4  ;;  %v6592_v18 = vrot.slane %v792_v7, 9  ;;  %v76_v20 = vld [vmem:[%s9556_s0 + $0x40] sm:$0xff]  ;;  %v351_v30 = vld [vmem:[#allocation2 + $0x38] sm:$0xf] }
  0x36   :  { %v582_v15 = vrot.slane %v581_v5, 4  ;;  %v197_v25 = vshrl.u32 %v6977_v63, 16  ;;  %v200_v26 = vshll.u32 %v6977_v63, 16  ;;  %v354_v31 = vld [vmem:[#allocation2 + $0x3c] sm:$0x1]  ;;  %v205_v36 = vshrl.u32 %v6978_v8, 16 }
  0x37   :  { %2715 = vmatmul.mubr.bf16.gmra.mrb[4].mxu0 %v7652_v44  ;;  %v494_v21 = vld [vmem:[#allocation2 + $0x2c] sm:$0x1]  ;;  %v595_v22 = vor.u32 %v594_v11, %v591_v10  ;;  %v346_v23 = vsel %vm8000_vm4, %v194_v12, %v345_v61  ;;  %v349_v35 = vsel %vm8005_vm5, %v195_v13, %v348_v14  ;;  %v868_v38 = vsel %vm8034_vm10, %v6591_v16, %v867_v17  ;;  %v7656_v42 = vld [vmem:[#allocation2 + $0x20] ss:$8 sps:$4 sm:$0xff]   ;;  %v499_v53 = vld [vmem:[#allocation2 + $0x50] sm:$0xf] }
  0x38   :  { %v793_v24 = vld [vmem:[#allocation2 + $0x2c] sm:$0x1]  ;;  %7136 = vmatpush3.bf16.msra.mxu0 %v7658_v4  ;;  %v587_v27 = vsel %vm8042_vm11, %v582_v15, %v586_v6  ;;  %v598_v28 = vshll.u32 %v494_v21, 16  ;;  %347 = vst [vmem:[#allocation2 + $0x30] sm:$0xf] %v346_v23  ;;  %v199_v33 = vrot.slane %v197_v25, 7  ;;  %v6979_v41 = vpack.c.bf16 %v76_v20, %v76_v20 }
  0x39   :  { %v871_v29 = vrot.slane %v793_v24, 5  ;;  %7137 = vmatprep.subr.bf16.mxu0 %v7661_v9  ;;  %v596_v32 = vrot.slane %v595_v22, 4  ;;  %350 = vst [vmem:[#allocation2 + $0x34] sm:$0x1] %v349_v35  ;;  %v208_v39 = vshll.u32 %v6978_v8, 16  ;;  %v8116_v47 = vrot.slane %v205_v36, 7 }
  0x3a   :  { %v600_v37 = vrot.slane %v598_v28, 5  ;;  %v202_v44 = vor.u32 %v200_v26, %v199_v33  ;;  %v203_v45 = vrot.slane %v199_v33, 4  ;;  %v357_v49 = vld [vmem:[#allocation2 + $0x40] sm:$0xf]  ;;  %v213_v51 = vshrl.u32 %v6979_v41, 16  ;;  %v77_v11 = vld [vmem:[%s9556_s0 + $0x48] sm:$0xff] }
  0x3b   :  { %v872_v43 = vsel %vm8034_vm10, %v6592_v18, %v871_v29  ;;  %v216_v52 = vshll.u32 %v6979_v41, 16  ;;  %v210_v57 = vor.u32 %v208_v39, %v8116_v47  ;;  %v363_v60 = vld [vmem:[#allocation2 + $0x58] sm:$0xf]  ;;  %v631_v63 = vshrl.u32 %v499_v53, 16  ;;  %v366_v6 = vld [vmem:[#allocation2 + $0x5c] sm:$0x1] }
  0x3c   :  { %7138 = vmatpush3.bf16.msra.mxu0 %v7662_v19  ;;  %v601_v48 = vsel %vm8042_vm11, %v596_v32, %v600_v37  ;;  %v352_v55 = vsel %vm8000_vm4, %v202_v44, %v351_v30  ;;  %v355_v56 = vsel %vm8005_vm5, %v203_v45, %v354_v31  ;;  %v6605_v58 = vcombine.low %v868_v38, %v872_v43  ;;  %v500_v10 = vld [vmem:[#allocation2 + $0x54] sm:$0x1]  ;;  %v7665_v16 = vld [vmem:[%s9557_s1 + $0x160] sm:$0xff]   ;;  %v798_v44 = vld [vmem:[#allocation2 + $0x50] sm:$0xe] }
  0x3d   :  { %v6581_v54 = vcombine.low %v587_v27, %v601_v48  ;;  %353 = vst [vmem:[#allocation2 + $0x38] sm:$0xf] %v352_v55  ;;  %356 = vst [vmem:[#allocation2 + $0x3c] sm:$0x1] %v355_v56  ;;  %v215_v59 = vrot.slane %v213_v51, 7  ;;  %v358_v62 = vsel %vm8000_vm4, %v210_v57, %v357_v49  ;;  %v634_v2 = vshll.u32 %v499_v53, 16  ;;  %7139 = vmatprep.subr.bf16.mxu0 %v7665_v16 }
  0x3e   :  { %359 = vst [vmem:[#allocation2 + $0x40] sm:$0xf] %v358_v62  ;;  %v633_v15 = vrot.slane %v631_v63, 4  ;;  %v7666_v29 = vld [vmem:[%s9557_s1 + $0x1c0] sm:$0xff]   ;;  %v640_v31 = vshll.u32 %v500_v10, 16  ;;  %v6980_v32 = vpack.c.bf16 %v77_v11, %v77_v11 }
  0x3f   :  { %2722 = vmatprep.mubr.bf16.mxu0 %v6581_v54  ;;  %v7655_v61 = vld [vmem:[#allocation2 + $0x28] ss:$8 sps:$4 sm:$0xff]   ;;  %v218_v1 = vor.u32 %v216_v52, %v215_v59  ;;  %v219_v9 = vrot.slane %v215_v59, 4  ;;  %v636_v19 = vrot.slane %v634_v2, 5  ;;  %7195 = vmatprep.subr.bf16.mxu1 %v7666_v29  ;;  %v7667_v52 = vld [vmem:[%s9557_s1 + $0x120] sm:$0xff]  }
  0x40   :  { %2723 = vmatmul.mubr.bf16.gmra.mrb[8].mxu0 %v7656_v42  ;;  %v495_v0 = vld [vmem:[#allocation2 + $0x30] sm:$0xf]  ;;  %2819 = vmatprep.mubr.bf16.mxu1 %v7655_v61  ;;  %v496_v3 = vld [vmem:[#allocation2 + $0x34] sm:$0x1]  ;;  %v642_v51 = vrot.slane %v640_v31, 5  ;;  %v221_v54 = vshrl.u32 %v6980_v32, 16 }
  0x41   :  { %v603_v4 = vshrl.u32 %v495_v0, 16  ;;  %v606_v5 = vshll.u32 %v495_v0, 16  ;;  %2820 = vmatmul.mubr.bf16.gmra.mrb[8].mxu1 %v6605_v58  ;;  %v794_v7 = vld [vmem:[#allocation2 + $0x30] sm:$0xe]  ;;  %v795_v8 = vld [vmem:[#allocation2 + $0x34] sm:$0x1]  ;;  %v364_v14 = vsel %vm8000_vm4, %v218_v1, %v363_v60  ;;  %v367_v18 = vsel %vm8005_vm5, %v219_v9, %v366_v6  ;;  %7140 = vmatpush3.bf16.msra.mxu0 %v7667_v52 }
  0x42   :  { %v612_v17 = vshll.u32 %v496_v3, 16  ;;  %365 = vst [vmem:[#allocation2 + $0x58] sm:$0xf] %v364_v14  ;;  %v6593_v23 = vrot.slane %v794_v7, 9  ;;  %v875_v24 = vrot.slane %v795_v8, 5  ;;  %v637_v28 = vor.u32 %v636_v19, %v633_v15 }
  0x43   :  { %v605_v12 = vrot.slane %v603_v4, 4  ;;  %v608_v13 = vrot.slane %v606_v5, 5  ;;  %368 = vst [vmem:[#allocation2 + $0x5c] sm:$0x1] %v367_v18  ;;  %v224_v55 = vshll.u32 %v6980_v32, 16  ;;  %v223_v3 = vrot.slane %v221_v54, 7 }
  0x44   :  { %v497_v20 = vld [vmem:[#allocation2 + $0x38] sm:$0xf]  ;;  %v498_v21 = vld [vmem:[#allocation2 + $0x3c] sm:$0x1]  ;;  %v614_v35 = vrot.slane %v612_v17, 5  ;;  %v876_v42 = vsel %vm8034_vm10, %v6593_v23, %v875_v24  ;;  %v8142_v43 = vrot.slane %v637_v28, 4 }
  0x45   :  { %v609_v22 = vor.u32 %v608_v13, %v605_v12  ;;  %v617_v25 = vshrl.u32 %v497_v20, 16  ;;  %v620_v26 = vshll.u32 %v497_v20, 16  ;;  %v626_v27 = vshll.u32 %v498_v21, 16  ;;  %v7659_v30 = vld [vmem:[#allocation2 + $0x38] ss:$8 sps:$4 sm:$0xff]   ;;  %v7669_v20 = vld [vmem:[%s9557_s1 + $0x1c8] sm:$0xff]  }
  0x46   :  { %2827 = vmatprep.mubr.bf16.mxu1 %v7659_v30  ;;  %v796_v39 = vld [vmem:[#allocation2 + $0x38] sm:$0xe]  ;;  %v797_v41 = vld [vmem:[#allocation2 + $0x3c] sm:$0x1]  ;;  %v799_v56 = vld [vmem:[#allocation2 + $0x54] sm:$0x1]  ;;  %v226_v13 = vor.u32 %v224_v55, %v223_v3  ;;  %v643_v23 = vsel %vm8042_vm11, %v8142_v43, %v642_v51 }
  0x47   :  { %v610_v33 = vrot.slane %v609_v22, 4  ;;  %v619_v36 = vrot.slane %v617_v25, 4  ;;  %v622_v37 = vrot.slane %v620_v26, 5  ;;  %v628_v38 = vrot.slane %v626_v27, 5  ;;  %v369_v62 = vld [vmem:[#allocation2 + $0x60] sm:$0xf] }
  0x48   :  { %v6594_v48 = vrot.slane %v796_v39, 9  ;;  %v879_v49 = vrot.slane %v797_v41, 5  ;;  %v7660_v63 = vld [vmem:[#allocation2 + $0x30] ss:$8 sps:$4 sm:$0xff]   ;;  %v7668_v4 = vld [vmem:[%s9557_s1 + $0x180] sm:$0xff]   ;;  %v6595_v9 = vrot.slane %v798_v44, 9  ;;  %v370_v19 = vsel %vm8000_vm4, %v226_v13, %v369_v62 }
  0x49   :  { %v623_v45 = vor.u32 %v622_v37, %v619_v36  ;;  %v501_v53 = vld [vmem:[#allocation2 + $0x58] sm:$0xf]  ;;  %v615_v57 = vsel %vm8042_vm11, %v610_v33, %v614_v35  ;;  %v227_v14 = vrot.slane %v223_v3, 4  ;;  %v883_v15 = vrot.slane %v799_v56, 5  ;;  %7196 = vmatpush3.bf16.msra.mxu1 %v7668_v4  ;;  %371 = vst [vmem:[#allocation2 + $0x60] sm:$0xf] %v370_v19 }
  0x4a   :  { %v880_v59 = vsel %vm8034_vm10, %v6594_v48, %v879_v49  ;;  %v502_v60 = vld [vmem:[#allocation2 + $0x5c] sm:$0x1]  ;;  %v645_v61 = vshrl.u32 %v501_v53, 16  ;;  %v648_v1 = vshll.u32 %v501_v53, 16  ;;  %v800_v7 = vld [vmem:[#allocation2 + $0x58] sm:$0xe]  ;;  %7197 = vmatprep.subr.bf16.mxu1 %v7669_v20 }
  0x4b   :  { %v624_v58 = vrot.slane %v623_v45, 4  ;;  %v6606_v0 = vcombine.low %v876_v42, %v880_v59  ;;  %v654_v2 = vshll.u32 %v502_v60, 16  ;;  %v801_v8 = vld [vmem:[#allocation2 + $0x5c] sm:$0x1]  ;;  %v6596_v16 = vrot.slane %v800_v7, 9  ;;  %v78_v21 = vld [vmem:[%s9556_s0 + $0x50] sm:$0xff] }
  0x4c   :  { %v647_v6 = vrot.slane %v645_v61, 4  ;;  %v650_v11 = vrot.slane %v648_v1, 5  ;;  %v887_v17 = vrot.slane %v801_v8, 5  ;;  %v372_v22 = vld [vmem:[#allocation2 + $0x64] sm:$0x1]  ;;  %v6981_v25 = vpack.c.bf16 %v78_v21, %v78_v21  ;;  %v79_v27 = vld [vmem:[%s9556_s0 + $0x58] sm:$0xff] }
  0x4d   :  { %v629_v5 = vsel %vm8042_vm11, %v624_v58, %v628_v38  ;;  %2828 = vmatmul.mubr.bf16.gmra.mrb[12].mxu1 %v6606_v0  ;;  %v656_v12 = vrot.slane %v654_v2, 5  ;;  %v373_v26 = vsel %vm8005_vm5, %v227_v14, %v372_v22  ;;  %v7664_v28 = vld [vmem:[#allocation2 + $0x50] ss:$8 sps:$4 sm:$0xff]   ;;  %v884_v29 = vsel %vm8034_vm10, %v6595_v9, %v883_v15  ;;  %v7671_v36 = vld [vmem:[%s9557_s1 + $0x188] sm:$0xff]   ;;  %v80_v8 = vld [vmem:[%s9556_s0 + $0x60] sm:$0xff] }
  0x4e   :  { %v6582_v10 = vcombine.low %v615_v57, %v629_v5  ;;  %v651_v18 = vor.u32 %v650_v11, %v647_v6  ;;  %374 = vst [vmem:[#allocation2 + $0x64] sm:$0x1] %v373_v26  ;;  %v6982_v30 = vpack.c.bf16 %v79_v27, %v79_v27  ;;  %v888_v32 = vsel %vm8034_vm10, %v6596_v16, %v887_v17  ;;  %v7673_v37 = vld [vmem:[%s9557_s1 + $0x168] sm:$0xff]   ;;  %v7675_v51 = vld [vmem:[%s9557_s1 + $0x1d0] sm:$0xff]   ;;  %v7677_v7 = vld [vmem:[%s9557_s1 + $0x1d8] sm:$0xff]  }
  0x4f   :  { %v229_v33 = vshrl.u32 %v6981_v25, 16  ;;  %v232_v35 = vshll.u32 %v6981_v25, 16  ;;  %v375_v39 = vld [vmem:[#allocation2 + $0x68] sm:$0xf]  ;;  %v378_v44 = vld [vmem:[#allocation2 + $0x6c] sm:$0x1]  ;;  %7198 = vmatpush3.bf16.msra.mxu1 %v7671_v36  ;;  %7141 = vmatprep.subr.bf16.mxu0 %v7673_v37  ;;  %v6607_v48 = vcombine.low %v884_v29, %v888_v32 }
  0x50   :  { %2730 = vmatprep.mubr.bf16.mxu0 %v6582_v10  ;;  %v652_v24 = vrot.slane %v651_v18, 4  ;;  %v237_v41 = vshrl.u32 %v6982_v30, 16  ;;  %v240_v42 = vshll.u32 %v6982_v30, 16  ;;  %v7674_v45 = vld [vmem:[%s9557_s1 + $0x128] sm:$0xff]   ;;  %v7663_v52 = vld [vmem:[#allocation2 + $0x58] ss:$8 sps:$4 sm:$0xff]   ;;  %7199 = vmatprep.subr.bf16.mxu1 %v7675_v51  ;;  %v6983_v10 = vpack.c.bf16 %v80_v8, %v80_v8 }
  0x51   :  { %2731 = vmatmul.mubr.bf16.gmra.mrb[12].mxu0 %v7660_v63  ;;  %v231_v43 = vrot.slane %v229_v33, 7  ;;  %v381_v54 = vld [vmem:[#allocation2 + $0x70] sm:$0xf]  ;;  %v503_v56 = vld [vmem:[#allocation2 + $0x60] sm:$0xf]  ;;  %2835 = vmatprep.mubr.bf16.mxu1 %v7663_v52  ;;  %v81_v16 = vld [vmem:[%s9556_s0 + $0x68] sm:$0xff] }
  0x52   :  { %v657_v31 = vsel %vm8042_vm11, %v652_v24, %v656_v12  ;;  %v239_v49 = vrot.slane %v237_v41, 7  ;;  %7142 = vmatpush3.bf16.msra.mxu0 %v7674_v45  ;;  %v659_v60 = vshrl.u32 %v503_v56, 16  ;;  %v662_v61 = vshll.u32 %v503_v56, 16  ;;  %v802_v1 = vld [vmem:[#allocation2 + $0x60] sm:$0xe]  ;;  %v7676_v5 = vld [vmem:[%s9557_s1 + $0x190] sm:$0xff]  }
  0x53   :  { %v6583_v38 = vcombine.low %v643_v23, %v657_v31  ;;  %v234_v53 = vor.u32 %v232_v35, %v231_v43  ;;  %v235_v55 = vrot.slane %v231_v43, 4  ;;  %7200 = vmatpush3.bf16.msra.mxu1 %v7676_v5  ;;  %v384_v11 = vld [vmem:[#allocation2 + $0x74] sm:$0x1]  ;;  %v6597_v12 = vrot.slane %v802_v1, 9  ;;  %v7679_v17 = vld [vmem:[%s9557_s1 + $0x198] sm:$0xff]  }
  0x54   :  { %v242_v57 = vor.u32 %v240_v42, %v239_v49  ;;  %v243_v62 = vrot.slane %v239_v49, 4  ;;  %v661_v3 = vrot.slane %v659_v60, 4  ;;  %v664_v4 = vrot.slane %v662_v61, 5  ;;  %7201 = vmatprep.subr.bf16.mxu1 %v7677_v7  ;;  %v7681_v19 = vld [vmem:[%s9557_s1 + $0x170] sm:$0xff]   ;;  %v387_v29 = vld [vmem:[#allocation2 + $0x78] sm:$0xf] }
  0x55   :  { %2738 = vmatprep.mubr.bf16.mxu0 %v6583_v38  ;;  %v376_v58 = vsel %vm8000_vm4, %v234_v53, %v375_v39  ;;  %v504_v59 = vld [vmem:[#allocation2 + $0x64] sm:$0x1]  ;;  %2836 = vmatmul.mubr.bf16.gmra.mrb[16].mxu1 %v6607_v48  ;;  %v379_v63 = vsel %vm8005_vm5, %v235_v55, %v378_v44  ;;  %v245_v15 = vshrl.u32 %v6983_v10, 16  ;;  %v248_v22 = vshll.u32 %v6983_v10, 16  ;;  %v390_v32 = vld [vmem:[#allocation2 + $0x7c] sm:$0x1] }
  0x56   :  { %377 = vst [vmem:[#allocation2 + $0x68] sm:$0xf] %v376_v58  ;;  %v382_v0 = vsel %vm8000_vm4, %v242_v57, %v381_v54  ;;  %v803_v2 = vld [vmem:[#allocation2 + $0x64] sm:$0x1]  ;;  %380 = vst [vmem:[#allocation2 + $0x6c] sm:$0x1] %v379_v63  ;;  %v665_v9 = vor.u32 %v664_v4, %v661_v3  ;;  %v385_v13 = vsel %vm8005_vm5, %v243_v62, %v384_v11  ;;  %7143 = vmatprep.subr.bf16.mxu0 %v7681_v19 }
  0x57   :  { %383 = vst [vmem:[#allocation2 + $0x70] sm:$0xf] %v382_v0  ;;  %v668_v6 = vshll.u32 %v504_v59, 16  ;;  %v891_v14 = vrot.slane %v803_v2, 5  ;;  %386 = vst [vmem:[#allocation2 + $0x74] sm:$0x1] %v385_v13  ;;  %7202 = vmatpush3.bf16.msra.mxu1 %v7679_v17  ;;  %v6984_v33 = vpack.c.bf16 %v81_v16, %v81_v16 }
  0x58   :  { %v666_v21 = vrot.slane %v665_v9, 4  ;;  %v7682_v61 = vld [vmem:[%s9557_s1 + $0x130] sm:$0xff]   ;;  %v393_v2 = vld [vmem:[#allocation2 + $0x80] sm:$0xf]  ;;  %v7685_v10 = vld [vmem:[%s9557_s1 + $0x1e8] sm:$0xff]  }
  0x59   :  { %2739 = vmatmul.mubr.bf16.gmra.mrb[16].mxu0 %v7664_v28  ;;  %v670_v18 = vrot.slane %v668_v6, 5  ;;  %v247_v28 = vrot.slane %v245_v15, 7  ;;  %v892_v38 = vsel %vm8034_vm10, %v6597_v12, %v891_v14  ;;  %v253_v59 = vshrl.u32 %v6984_v33, 16  ;;  %v7683_v3 = vld [vmem:[%s9557_s1 + $0x1e0] sm:$0xff]   ;;  %v82_v13 = vld [vmem:[%s9556_s0 + $0x70] sm:$0xff]  ;;  %v83_v17 = vld [vmem:[%s9556_s0 + $0x78] sm:$0xff] }
  0x5a   :  { %v256_v1 = vshll.u32 %v6984_v33, 16  ;;  %7144 = vmatpush3.bf16.msra.mxu0 %v7682_v61  ;;  %v7684_v7 = vld [vmem:[%s9557_s1 + $0x1a0] sm:$0xff]   ;;  %7203 = vmatprep.subr.bf16.mxu1 %v7683_v3  ;;  %v6985_v16 = vpack.c.bf16 %v82_v13, %v82_v13  ;;  %v7689_v61 = vld [vmem:[%s9557_s1 + $0x178] sm:$0xff]  }
  0x5b   :  { %v250_v39 = vor.u32 %v248_v22, %v247_v28  ;;  %v251_v41 = vrot.slane %v247_v28, 4  ;;  %v671_v42 = vsel %vm8042_vm11, %v666_v21, %v670_v18  ;;  %v255_v5 = vrot.slane %v253_v59, 7  ;;  %7204 = vmatpush3.bf16.msra.mxu1 %v7684_v7  ;;  %v396_v19 = vld [vmem:[#allocation2 + $0x84] sm:$0x1]  ;;  %v7690_v3 = vld [vmem:[%s9557_s1 + $0x138] sm:$0xff]   ;;  %7145 = vmatprep.subr.bf16.mxu0 %v7689_v61  ;;  %v7691_v7 = vld [vmem:[%s9557_s1 + $0x1f0] sm:$0xff]  }
  0x5c   :  { %7205 = vmatprep.subr.bf16.mxu1 %v7685_v10  ;;  %v1028_v61 = vld [vmem:[#allocation2 + $0x14] sm:$0x1] }
  0x5d   :  { %v505_v20 = vld [vmem:[#allocation2 + $0x68] sm:$0xf]  ;;  %v506_v23 = vld [vmem:[#allocation2 + $0x6c] sm:$0x1]  ;;  %v388_v51 = vsel %vm8000_vm4, %v250_v39, %v387_v29  ;;  %v391_v52 = vsel %vm8005_vm5, %v251_v41, %v390_v32  ;;  %v258_v11 = vor.u32 %v256_v1, %v255_v5  ;;  %v259_v12 = vrot.slane %v255_v5, 4 }
  0x5e   :  { %v673_v24 = vshrl.u32 %v505_v20, 16  ;;  %v676_v25 = vshll.u32 %v505_v20, 16  ;;  %v682_v26 = vshll.u32 %v506_v23, 16  ;;  %v7670_v27 = vld [vmem:[#allocation2 + $0x68] ss:$8 sps:$4 sm:$0xff]   ;;  %v6986_v23 = vpack.c.bf16 %v83_v17, %v83_v17  ;;  %7146 = vmatpush3.bf16.msra.mxu0 %v7690_v3  ;;  %v7693_v17 = vld [vmem:[%s9557_s1 + $0x1f8] sm:$0xff]  }
  0x5f   :  { %2843 = vmatprep.mubr.bf16.mxu1 %v7670_v27  ;;  %v804_v36 = vld [vmem:[#allocation2 + $0x68] sm:$0xe]  ;;  %v805_v37 = vld [vmem:[#allocation2 + $0x6c] sm:$0x1]  ;;  %v507_v48 = vld [vmem:[#allocation2 + $0x70] sm:$0xf]  ;;  %v394_v18 = vsel %vm8000_vm4, %v258_v11, %v393_v2  ;;  %v397_v22 = vsel %vm8005_vm5, %v259_v12, %v396_v19 }
  0x60   :  { %v675_v30 = vrot.slane %v673_v24, 4  ;;  %v678_v31 = vrot.slane %v676_v25, 5  ;;  %v684_v35 = vrot.slane %v682_v26, 5  ;;  %v6598_v44 = vrot.slane %v804_v36, 9  ;;  %v508_v49 = vld [vmem:[#allocation2 + $0x74] sm:$0x1] }
  0x61   :  { %v895_v45 = vrot.slane %v805_v37, 5  ;;  %v687_v53 = vshrl.u32 %v507_v48, 16  ;;  %v690_v54 = vshll.u32 %v507_v48, 16  ;;  %v7672_v56 = vld [vmem:[#allocation2 + $0x60] ss:$8 sps:$4 sm:$0xff]   ;;  %v696_v58 = vshll.u32 %v508_v49, 16 }
  0x62   :  { %v679_v43 = vor.u32 %v678_v31, %v675_v30  ;;  %389 = vst [vmem:[#allocation2 + $0x78] sm:$0xf] %v388_v51  ;;  %392 = vst [vmem:[#allocation2 + $0x7c] sm:$0x1] %v391_v52  ;;  %v806_v60 = vld [vmem:[#allocation2 + $0x70] sm:$0xe] }
  0x63   :  { %v896_v57 = vsel %vm8034_vm10, %v6598_v44, %v895_v45  ;;  %v689_v63 = vrot.slane %v687_v53, 4  ;;  %v692_v0 = vrot.slane %v690_v54, 5  ;;  %v807_v6 = vld [vmem:[#allocation2 + $0x74] sm:$0x1]  ;;  %v6599_v9 = vrot.slane %v806_v60, 9  ;;  %v7687_v51 = vld [vmem:[%s9557_s1 + $0x1a8] sm:$0xff]  }
  0x64   :  { %v680_v55 = vrot.slane %v679_v43, 4  ;;  %v6608_v62 = vcombine.low %v892_v38, %v896_v57  ;;  %v899_v15 = vrot.slane %v807_v6, 5  ;;  %395 = vst [vmem:[#allocation2 + $0x80] sm:$0xf] %v394_v18  ;;  %v261_v27 = vshrl.u32 %v6985_v16, 16  ;;  %7206 = vmatpush3.bf16.msra.mxu1 %v7687_v51 }
  0x65   :  { %v693_v14 = vor.u32 %v692_v0, %v689_v63  ;;  %398 = vst [vmem:[#allocation2 + $0x84] sm:$0x1] %v397_v22  ;;  %v698_v29 = vrot.slane %v696_v58, 5  ;;  %v399_v38 = vld [vmem:[#allocation2 + $0x88] sm:$0xf]  ;;  %v269_v44 = vshrl.u32 %v6986_v23, 16  ;;  %7207 = vmatprep.subr.bf16.mxu1 %v7691_v7 }
  0x66   :  { %v685_v4 = vsel %vm8042_vm11, %v680_v55, %v684_v35  ;;  %2844 = vmatmul.mubr.bf16.gmra.mrb[20].mxu1 %v6608_v62  ;;  %v900_v31 = vsel %vm8034_vm10, %v6599_v9, %v899_v15  ;;  %v263_v41 = vrot.slane %v261_v27, 7  ;;  %v402_v43 = vld [vmem:[#allocation2 + $0x8c] sm:$0x1]  ;;  %v272_v48 = vshll.u32 %v6986_v23, 16  ;;  %v405_v49 = vld [vmem:[#allocation2 + $0x90] sm:$0xf] }
  0x67   :  { %v6584_v8 = vcombine.low %v671_v42, %v685_v4  ;;  %v694_v28 = vrot.slane %v693_v14, 4  ;;  %v264_v42 = vshll.u32 %v6985_v16, 16  ;;  %v8257_v55 = vrot.slane %v269_v44, 7  ;;  %v7692_v15 = vld [vmem:[%s9557_s1 + $0x1b0] sm:$0xff]   ;;  %v1321_v18 = vld [vmem:[#allocation2 + $0x8] sm:$0xe] }
  0x68   :  { %v267_v54 = vrot.slane %v263_v41, 4  ;;  %7208 = vmatpush3.bf16.msra.mxu1 %v7692_v15  ;;  %v211_v19 = vrot.slane %v8116_v47, 4  ;;  %v1322_v23 = vld [vmem:[#allocation2 + $0xc] sm:$0x1]  ;;  %v6627_v27 = vrot.slane %v1321_v18, 9  ;;  %v8304_v7 = vld [vmem:[%s9557_s1 + $0x200] sm:$0xff]  }
  0x69   :  { %2746 = vmatprep.mubr.bf16.mxu0 %v6584_v8  ;;  %v509_v20 = vld [vmem:[#allocation2 + $0x78] sm:$0xf]  ;;  %v510_v21 = vld [vmem:[#allocation2 + $0x7c] sm:$0x1]  ;;  %v266_v53 = vor.u32 %v264_v42, %v263_v41  ;;  %v274_v2 = vor.u32 %v272_v48, %v8257_v55  ;;  %7209 = vmatprep.subr.bf16.mxu1 %v7693_v17  ;;  %v1324_v42 = vld [vmem:[#allocation2 + $0x14] sm:$0x1] }
  0x6a   :  { %2747 = vmatmul.mubr.bf16.gmra.mrb[20].mxu0 %v7672_v56  ;;  %v701_v24 = vshrl.u32 %v509_v20, 16  ;;  %v704_v25 = vshll.u32 %v509_v20, 16  ;;  %v710_v26 = vshll.u32 %v510_v21, 16  ;;  %v808_v30 = vld [vmem:[#allocation2 + $0x78] sm:$0xe]  ;;  %v699_v56 = vsel %vm8042_vm11, %v694_v28, %v698_v29  ;;  %7547 = vmatprep.subr.bf16.mxu0 %v8304_v7 }
  0x6b   :  { %v809_v36 = vld [vmem:[#allocation2 + $0x7c] sm:$0x1]  ;;  %v6600_v37 = vrot.slane %v808_v30, 9  ;;  %v7678_v58 = vld [vmem:[#allocation2 + $0x78] ss:$8 sps:$4 sm:$0xff]   ;;  %v400_v62 = vsel %vm8000_vm4, %v266_v53, %v399_v38  ;;  %v403_v63 = vsel %vm8005_vm5, %v267_v54, %v402_v43  ;;  %v406_v10 = vsel %vm8000_vm4, %v274_v2, %v405_v49 }
  0x6c   :  { %v703_v32 = vrot.slane %v701_v24, 4  ;;  %v706_v33 = vrot.slane %v704_v25, 5  ;;  %v712_v35 = vrot.slane %v710_v26, 5  ;;  %v903_v39 = vrot.slane %v809_v36, 5  ;;  %v7680_v59 = vld [vmem:[#allocation2 + $0x70] ss:$8 sps:$4 sm:$0xff]   ;;  %2851 = vmatprep.mubr.bf16.mxu1 %v7678_v58 }
  0x6d   :  { %v511_v0 = vld [vmem:[#allocation2 + $0x80] sm:$0xf]  ;;  %v512_v1 = vld [vmem:[#allocation2 + $0x84] sm:$0x1]  ;;  %401 = vst [vmem:[#allocation2 + $0x88] sm:$0xf] %v400_v62 }
  0x6e   :  { %v707_v45 = vor.u32 %v706_v33, %v703_v32  ;;  %v904_v52 = vsel %vm8034_vm10, %v6600_v37, %v903_v39  ;;  %404 = vst [vmem:[#allocation2 + $0x8c] sm:$0x1] %v403_v63  ;;  %v715_v5 = vshrl.u32 %v511_v0, 16  ;;  %v718_v6 = vshll.u32 %v511_v0, 16  ;;  %v810_v11 = vld [vmem:[#allocation2 + $0x80] sm:$0xe] }
  0x6f   :  { %v6609_v60 = vcombine.low %v900_v31, %v904_v52  ;;  %v724_v9 = vshll.u32 %v512_v1, 16  ;;  %407 = vst [vmem:[#allocation2 + $0x90] sm:$0xf] %v406_v10  ;;  %v811_v14 = vld [vmem:[#allocation2 + $0x84] sm:$0x1]  ;;  %v6601_v21 = vrot.slane %v810_v11, 9 }
  0x70   :  { %v708_v57 = vrot.slane %v707_v45, 4  ;;  %v717_v12 = vrot.slane %v715_v5, 4  ;;  %v720_v13 = vrot.slane %v718_v6, 5  ;;  %v907_v22 = vrot.slane %v811_v14, 5  ;;  %v7694_v31 = vld [vmem:[%s9557_s1 + $0x1b8] sm:$0xff]  }
  0x71   :  { %2852 = vmatmul.mubr.bf16.gmra.mrb[24].mxu1 %v6609_v60  ;;  %v726_v20 = vrot.slane %v724_v9, 5  ;;  %v1323_v37 = vld [vmem:[#allocation2 + $0x10] sm:$0xe]  ;;  %v1387_v38 = vrot.slane %v1322_v23, 5  ;;  %v1391_v52 = vrot.slane %v1324_v42, 5  ;;  %v1081_v15 = vshll.u32 %v1028_v61, 16 }
  0x72   :  { %v713_v4 = vsel %vm8042_vm11, %v708_v57, %v712_v35  ;;  %v721_v16 = vor.u32 %v720_v13, %v717_v12  ;;  %7210 = vmatpush3.bf16.msra.mxu1 %v7694_v31  ;;  %v908_v44 = vsel %vm8034_vm10, %v6601_v21, %v907_v22  ;;  %v6628_v51 = vrot.slane %v1323_v37, 9  ;;  %v1025_v53 = vld [vmem:[#allocation2 + $0x8] sm:$0xf]  ;;  %v1026_v54 = vld [vmem:[#allocation2 + $0xc] sm:$0x1] }
  0x73   :  { %v6585_v8 = vcombine.low %v699_v56, %v713_v4  ;;  %v1388_v49 = vsel %vm8034_vm10, %v6627_v27, %v1387_v38  ;;  %v1027_v60 = vld [vmem:[#allocation2 + $0x10] sm:$0xf]  ;;  %v1058_v62 = vshrl.u32 %v1025_v53, 16  ;;  %v1061_v1 = vshll.u32 %v1025_v53, 16  ;;  %v1563_v13 = vld [vmem:[#allocation2 + $0x14] sm:$0x1] }
  0x74   :  { %v513_v24 = vld [vmem:[#allocation2 + $0x88] sm:$0xf]  ;;  %v722_v26 = vrot.slane %v721_v16, 4  ;;  %v1392_v0 = vsel %vm8034_vm10, %v6628_v51, %v1391_v52  ;;  %v1067_v2 = vshll.u32 %v1026_v54, 16  ;;  %v1072_v6 = vshrl.u32 %v1027_v60, 16 }
  0x75   :  { %2754 = vmatprep.mubr.bf16.mxu0 %v6585_v8  ;;  %v514_v25 = vld [vmem:[#allocation2 + $0x8c] sm:$0x1]  ;;  %v729_v28 = vshrl.u32 %v513_v24, 16  ;;  %v732_v29 = vshll.u32 %v513_v24, 16  ;;  %v812_v39 = vld [vmem:[#allocation2 + $0x88] sm:$0xe]  ;;  %v6643_v4 = vcombine.low %v1388_v49, %v1392_v0 }
  0x76   :  { %2755 = vmatmul.mubr.bf16.gmra.mrb[24].mxu0 %v7680_v59  ;;  %v738_v30 = vshll.u32 %v514_v25, 16  ;;  %v7686_v32 = vld [vmem:[#allocation2 + $0x88] ss:$8 sps:$4 sm:$0xff]   ;;  %v813_v41 = vld [vmem:[#allocation2 + $0x8c] sm:$0x1]  ;;  %v6602_v45 = vrot.slane %v812_v39, 9  ;;  %v727_v56 = vsel %vm8042_vm11, %v722_v26, %v726_v20 }
  0x77   :  { %v731_v33 = vrot.slane %v729_v28, 4  ;;  %v734_v35 = vrot.slane %v732_v29, 5  ;;  %2859 = vmatprep.mubr.bf16.mxu1 %v7686_v32  ;;  %v911_v48 = vrot.slane %v813_v41, 5  ;;  %v7688_v58 = vld [vmem:[#allocation2 + $0x80] ss:$8 sps:$4 sm:$0xff]   ;;  %v1060_v5 = vrot.slane %v1058_v62, 4 }
  0x78   :  { %v740_v36 = vrot.slane %v738_v30, 5  ;;  %v1562_v8 = vld [vmem:[#allocation2 + $0x10] sm:$0xf]  ;;  %v1063_v10 = vrot.slane %v1061_v1, 5  ;;  %v1069_v11 = vrot.slane %v1067_v2, 5  ;;  %v1075_v12 = vshll.u32 %v1027_v60, 16 }
  0x79   :  { %v735_v43 = vor.u32 %v734_v35, %v731_v33  ;;  %v912_v59 = vsel %vm8034_vm10, %v6602_v45, %v911_v48  ;;  %v1074_v14 = vrot.slane %v1072_v6, 4  ;;  %v1564_v16 = vld [vmem:[#allocation2 + $0x18] sm:$0xf]  ;;  %v1565_v17 = vld [vmem:[#allocation2 + $0x1c] sm:$0x1]  ;;  %v1595_v21 = vshrl.u32 %v1562_v8, 16 }
  0x7a   :  { %v6610_v63 = vcombine.low %v908_v44, %v912_v59  ;;  %v1064_v18 = vor.u32 %v1063_v10, %v1060_v5  ;;  %v1077_v20 = vrot.slane %v1075_v12, 5  ;;  %v1598_v22 = vshll.u32 %v1562_v8, 16  ;;  %v1326_v41 = vld [vmem:[#allocation2 + $0x1c] sm:$0x1]  ;;  %v1327_v42 = vld [vmem:[#allocation2 + $0x20] sm:$0xe] }
  0x7b   :  { %v736_v57 = vrot.slane %v735_v43, 4  ;;  %v1083_v23 = vrot.slane %v1081_v15, 5  ;;  %v1604_v24 = vshll.u32 %v1563_v13, 16  ;;  %v1609_v25 = vshrl.u32 %v1564_v16, 16  ;;  %v1328_v48 = vld [vmem:[#allocation2 + $0x24] sm:$0x1] }
  0x7c   :  { %2860 = vmatmul.mubr.bf16.gmra.mrb[28].mxu1 %v6610_v63  ;;  %v1612_v26 = vshll.u32 %v1564_v16, 16  ;;  %v1065_v27 = vrot.slane %v1064_v18, 4  ;;  %v1078_v28 = vor.u32 %v1077_v20, %v1074_v14  ;;  %v1597_v29 = vrot.slane %v1595_v21, 4  ;;  %v7697_v52 = vld [vmem:[%s9557_s1 + $0x208] sm:$0xff]   ;;  %v7696_v61 = vld [vmem:[#allocation2 + $0x10] ss:$8 sps:$4 sm:$0xff]  }
  0x7d   :  { %v741_v3 = vsel %vm8042_vm11, %v736_v57, %v740_v36  ;;  %v1600_v30 = vrot.slane %v1598_v22, 5  ;;  %v1606_v31 = vrot.slane %v1604_v24, 5  ;;  %v1611_v32 = vrot.slane %v1609_v25, 4  ;;  %v1325_v36 = vld [vmem:[#allocation2 + $0x18] sm:$0xe]  ;;  %v7699_v18 = vld [vmem:[%s9557_s1 + $0x210] sm:$0xff]  }
  0x7e   :  { %v6586_v9 = vcombine.low %v727_v56, %v741_v3  ;;  %v1614_v33 = vrot.slane %v1612_v26, 5  ;;  %v1618_v35 = vshll.u32 %v1565_v17, 16  ;;  %v1070_v37 = vsel %vm8042_vm11, %v1065_v27, %v1069_v11  ;;  %v1029_v57 = vld [vmem:[#allocation2 + $0x18] sm:$0xf]  ;;  %v1031_v63 = vld [vmem:[#allocation2 + $0x20] sm:$0xf] }
  0x7f   :  { %v1079_v38 = vrot.slane %v1078_v28, 4  ;;  %v1601_v39 = vor.u32 %v1600_v30, %v1597_v29  ;;  %v6629_v43 = vrot.slane %v1325_v36, 9  ;;  %v1395_v49 = vrot.slane %v1326_v41, 5  ;;  %v1032_v0 = vld [vmem:[#allocation2 + $0x24] sm:$0x1] }
  0x80   :  { %2762 = vmatprep.mubr.bf16.mxu0 %v6586_v9  ;;  %v1615_v44 = vor.u32 %v1614_v33, %v1611_v32  ;;  %v1620_v45 = vrot.slane %v1618_v35, 5  ;;  %v6630_v51 = vrot.slane %v1327_v42, 9  ;;  %v1399_v56 = vrot.slane %v1328_v48, 5  ;;  %v1566_v11 = vld [vmem:[#allocation2 + $0x20] sm:$0xf] }
  0x81   :  { %2763 = vmatmul.mubr.bf16.gmra.mrb[28].mxu0 %v7688_v58  ;;  %v1084_v53 = vsel %vm8042_vm11, %v1079_v38, %v1083_v23  ;;  %v1602_v54 = vrot.slane %v1601_v39, 4  ;;  %v1030_v58 = vld [vmem:[#allocation2 + $0x1c] sm:$0x1]  ;;  %v1396_v62 = vsel %vm8034_vm10, %v6629_v43, %v1395_v49  ;;  %v1086_v1 = vshrl.u32 %v1029_v57, 16  ;;  %v1567_v12 = vld [vmem:[#allocation2 + $0x24] sm:$0x1] }
  0x82   :  { %2900 = vmatprep.mubr.bf16.mxu0 %v6643_v4  ;;  %v6619_v59 = vcombine.low %v1070_v37, %v1084_v53  ;;  %v1616_v60 = vrot.slane %v1615_v44, 4  ;;  %v1400_v3 = vsel %vm8034_vm10, %v6630_v51, %v1399_v56  ;;  %v1089_v4 = vshll.u32 %v1029_v57, 16  ;;  %v1568_v17 = vld [vmem:[#allocation2 + $0x28] sm:$0xf]  ;;  %v1569_v22 = vld [vmem:[#allocation2 + $0x2c] sm:$0x1] }
  0x83   :  { %v1607_v2 = vsel %vm8042_vm11, %v1602_v54, %v1606_v31  ;;  %v1095_v5 = vshll.u32 %v1030_v58, 16  ;;  %v6644_v8 = vcombine.low %v1396_v62, %v1400_v3  ;;  %v1088_v9 = vrot.slane %v1086_v1, 4  ;;  %v7701_v37 = vld [vmem:[%s9557_s1 + $0x218] sm:$0xff]   ;;  %v1329_v42 = vld [vmem:[#allocation2 + $0x28] sm:$0xe] }
  0x84   :  { %v1621_v6 = vsel %vm8042_vm11, %v1616_v60, %v1620_v45  ;;  %v1100_v10 = vshrl.u32 %v1031_v63, 16  ;;  %v1091_v14 = vrot.slane %v1089_v4, 5  ;;  %v1103_v16 = vshll.u32 %v1031_v63, 16  ;;  %v1330_v43 = vld [vmem:[#allocation2 + $0x2c] sm:$0x1] }
  0x85   :  { %v6659_v13 = vcombine.low %v1607_v2, %v1621_v6  ;;  %v1097_v15 = vrot.slane %v1095_v5, 5  ;;  %v1109_v21 = vshll.u32 %v1032_v0, 16  ;;  %v1623_v23 = vshrl.u32 %v1566_v11, 16  ;;  %v1331_v48 = vld [vmem:[#allocation2 + $0x30] sm:$0xe]  ;;  %v7703_v5 = vld [vmem:[%s9557_s1 + $0x220] sm:$0xff]  }
  0x86   :  { %v1102_v20 = vrot.slane %v1100_v10, 4  ;;  %v1626_v24 = vshll.u32 %v1566_v11, 16  ;;  %v1092_v25 = vor.u32 %v1091_v14, %v1088_v9  ;;  %v1105_v26 = vrot.slane %v1103_v16, 5  ;;  %v1332_v49 = vld [vmem:[#allocation2 + $0x34] sm:$0x1] }
  0x87   :  { %2997 = vmatprep.mubr.bf16.mxu1 %v6659_v13  ;;  %v1632_v27 = vshll.u32 %v1567_v12, 16  ;;  %v1111_v28 = vrot.slane %v1109_v21, 5  ;;  %v1625_v29 = vrot.slane %v1623_v23, 4  ;;  %v1640_v31 = vshll.u32 %v1568_v17, 16  ;;  %v1033_v57 = vld [vmem:[#allocation2 + $0x28] sm:$0xf] }
  0x88   :  { %2998 = vmatmul.mubr.bf16.vlgmr.msra.gmra.mrb[32].mxu1 %v7696_v61  ;;  %v1628_v30 = vrot.slane %v1626_v24, 5  ;;  %v1093_v32 = vrot.slane %v1092_v25, 4  ;;  %v1106_v33 = vor.u32 %v1105_v26, %v1102_v20  ;;  %v1646_v41 = vshll.u32 %v1569_v22, 16  ;;  %v1034_v61 = vld [vmem:[#allocation2 + $0x2c] sm:$0x1] }
  0x89   :  { %2901 = vmatmul.mubr.bf16.vlgmr.msra.gmra.mrb[32].mxu0 %v6619_v59  ;;  %v1634_v35 = vrot.slane %v1632_v27, 5  ;;  %v1642_v39 = vrot.slane %v1640_v31, 5  ;;  %v6631_v51 = vrot.slane %v1329_v42, 9  ;;  %v1403_v56 = vrot.slane %v1330_v43, 5  ;;  %v1035_v62 = vld [vmem:[#allocation2 + $0x30] sm:$0xf] }
  0x8a   :  { %7548 = vmatpush3.bf16.msra.mxu0 %v8304_v7  ;;  %2908 = vmatprep.mubr.bf16.mxu0 %v6644_v8  ;;  %v1637_v7 = vshrl.u32 %v1568_v17, 16  ;;  %v1629_v38 = vor.u32 %v1628_v30, %v1625_v29  ;;  %v1098_v44 = vsel %vm8042_vm11, %v1093_v32, %v1097_v15  ;;  %v1107_v45 = vrot.slane %v1106_v33, 4  ;;  %v7698_v2 = vld [vmem:[#allocation2 + $0x20] ss:$8 sps:$4 sm:$0xff]   ;;  %v1036_v4 = vld [vmem:[#allocation2 + $0x34] sm:$0x1] }
  0x8b   :  { %7549 = vmatprep.subr.bf16.mxu0 %v7697_v52  ;;  %v6632_v59 = vrot.slane %v1331_v48, 9  ;;  %v1407_v60 = vrot.slane %v1332_v49, 5  ;;  %v1404_v3 = vsel %vm8034_vm10, %v6631_v51, %v1403_v56  ;;  %v1114_v8 = vshrl.u32 %v1033_v57, 16  ;;  %v1570_v15 = vld [vmem:[#allocation2 + $0x30] sm:$0xf]  ;;  %v7705_v23 = vld [vmem:[%s9557_s1 + $0x228] sm:$0xff]  }
  0x8c   :  { %v1639_v36 = vrot.slane %v1637_v7, 4  ;;  %v1630_v53 = vrot.slane %v1629_v38, 4  ;;  %v1112_v58 = vsel %vm8042_vm11, %v1107_v45, %v1111_v28  ;;  %v1117_v9 = vshll.u32 %v1033_v57, 16  ;;  %v1571_v16 = vld [vmem:[#allocation2 + $0x34] sm:$0x1] }
  0x8d   :  { %v6620_v63 = vcombine.low %v1098_v44, %v1112_v58  ;;  %v1408_v6 = vsel %vm8034_vm10, %v6632_v59, %v1407_v60  ;;  %v1123_v10 = vshll.u32 %v1034_v61, 16  ;;  %v1128_v13 = vshrl.u32 %v1035_v62, 16  ;;  %v1572_v22 = vld [vmem:[#allocation2 + $0x38] sm:$0xf]  ;;  %v1573_v27 = vld [vmem:[#allocation2 + $0x3c] sm:$0x1] }
  0x8e   :  { %7550 = vmatpush3.bf16.msra.mxu0 %v7697_v52  ;;  %v1643_v54 = vor.u32 %v1642_v39, %v1639_v36  ;;  %v1648_v52 = vrot.slane %v1646_v41, 5  ;;  %v1635_v0 = vsel %vm8042_vm11, %v1630_v53, %v1634_v35  ;;  %v6645_v12 = vcombine.low %v1404_v3, %v1408_v6  ;;  %v7707_v41 = vld [vmem:[%s9557_s1 + $0x230] sm:$0xff]   ;;  %v360_v48 = vld [vmem:[#allocation2 + $0x44] sm:$0x1]  ;;  %v1335_v56 = vld [vmem:[#allocation2 + $0x40] sm:$0xe] }
  0x8f   :  { %7551 = vmatprep.subr.bf16.mxu0 %v7699_v18  ;;  %v1131_v14 = vshll.u32 %v1035_v62, 16  ;;  %v1119_v20 = vrot.slane %v1117_v9, 5  ;;  %v1125_v21 = vrot.slane %v1123_v10, 5  ;;  %v1130_v24 = vrot.slane %v1128_v13, 4  ;;  %v1037_v61 = vld [vmem:[#allocation2 + $0x38] sm:$0xf] }
  0x90   :  { %v1644_v1 = vrot.slane %v1643_v54, 4  ;;  %v1137_v26 = vshll.u32 %v1036_v4, 16  ;;  %v1651_v7 = vshrl.u32 %v1570_v15, 16  ;;  %v1654_v29 = vshll.u32 %v1570_v15, 16  ;;  %v1333_v54 = vld [vmem:[#allocation2 + $0x38] sm:$0xe] }
  0x91   :  { %2909 = vmatmul.mubr.bf16.gmra.mrb[36].mxu0 %v6620_v63  ;;  %v1133_v25 = vrot.slane %v1131_v14, 5  ;;  %v1660_v30 = vshll.u32 %v1571_v16, 16  ;;  %v1665_v31 = vshrl.u32 %v1572_v22, 16  ;;  %v1668_v36 = vshll.u32 %v1572_v22, 16  ;;  %v1038_v62 = vld [vmem:[#allocation2 + $0x3c] sm:$0x1] }
  0x92   :  { %7552 = vmatpush3.bf16.msra.mxu0 %v7699_v18  ;;  %v1649_v11 = vsel %vm8042_vm11, %v1644_v1, %v1648_v52  ;;  %v1116_v18 = vrot.slane %v1114_v8, 4  ;;  %2916 = vmatprep.mubr.bf16.mxu0 %v6645_v12  ;;  %v1139_v33 = vrot.slane %v1137_v26, 5  ;;  %v1653_v35 = vrot.slane %v1651_v7, 4  ;;  %v1334_v52 = vld [vmem:[#allocation2 + $0x3c] sm:$0x1] }
  0x93   :  { %7553 = vmatprep.subr.bf16.mxu0 %v7701_v37  ;;  %v6660_v17 = vcombine.low %v1635_v0, %v1649_v11  ;;  %v1134_v32 = vor.u32 %v1133_v25, %v1130_v24  ;;  %v1656_v38 = vrot.slane %v1654_v29, 5  ;;  %v1667_v39 = vrot.slane %v1665_v31, 4  ;;  %v1039_v47 = vld [vmem:[#allocation2 + $0x40] sm:$0xf]  ;;  %v7700_v4 = vld [vmem:[#allocation2 + $0x30] ss:$8 sps:$4 sm:$0xff]  }
  0x94   :  { %v1120_v28 = vor.u32 %v1119_v20, %v1116_v18  ;;  %v1662_v43 = vrot.slane %v1660_v30, 5  ;;  %v1670_v44 = vrot.slane %v1668_v36, 5  ;;  %v1674_v45 = vshll.u32 %v1573_v27, 16  ;;  %v1574_v12 = vld [vmem:[#allocation2 + $0x40] sm:$0xf] }
  0x95   :  { %3005 = vmatprep.mubr.bf16.mxu1 %v6660_v17  ;;  %v1135_v42 = vrot.slane %v1134_v32, 4  ;;  %v1657_v51 = vor.u32 %v1656_v38, %v1653_v35  ;;  %v361_v53 = vsel %vm8005_vm5, %v211_v19, %v360_v48  ;;  %v6633_v60 = vrot.slane %v1333_v54, 9  ;;  %v7709_v19 = vld [vmem:[%s9557_s1 + $0x238] sm:$0xff]   ;;  %v1576_v17 = vld [vmem:[#allocation2 + $0x48] sm:$0xf] }
  0x96   :  { %7554 = vmatpush3.bf16.msra.mxu0 %v7701_v37  ;;  %3006 = vmatmul.mubr.bf16.gmra.mrb[36].mxu1 %v7698_v2  ;;  %v1121_v37 = vrot.slane %v1120_v28, 4  ;;  %v1671_v58 = vor.u32 %v1670_v44, %v1667_v39  ;;  %v1676_v59 = vrot.slane %v1674_v45, 5  ;;  %362 = vst [vmem:[#allocation2 + $0x44] sm:$0x1] %v361_v53  ;;  %v1411_v1 = vrot.slane %v1334_v52, 5 }
  0x97   :  { %7555 = vmatprep.subr.bf16.mxu0 %v7703_v5  ;;  %v1140_v57 = vsel %vm8042_vm11, %v1135_v42, %v1139_v33  ;;  %v1658_v0 = vrot.slane %v1657_v51, 4  ;;  %v6634_v2 = vrot.slane %v1335_v56, 9  ;;  %v1145_v6 = vshll.u32 %v1037_v61, 16  ;;  %v1577_v24 = vld [vmem:[#allocation2 + $0x4c] sm:$0x1] }
  0x98   :  { %v1126_v49 = vsel %vm8042_vm11, %v1121_v37, %v1125_v21  ;;  %v1672_v3 = vrot.slane %v1671_v58, 4  ;;  %v1151_v8 = vshll.u32 %v1038_v62, 16  ;;  %v1156_v10 = vshrl.u32 %v1039_v47, 16  ;;  %v1337_v48 = vld [vmem:[#allocation2 + $0x58] sm:$0xe] }
  0x99   :  { %v6621_v63 = vcombine.low %v1126_v49, %v1140_v57  ;;  %v1663_v9 = vsel %vm8042_vm11, %v1658_v0, %v1662_v43  ;;  %v1159_v11 = vshll.u32 %v1039_v47, 16  ;;  %v1147_v15 = vrot.slane %v1145_v6, 5  ;;  %v1338_v49 = vld [vmem:[#allocation2 + $0x5c] sm:$0x1]  ;;  %v1339_v56 = vld [vmem:[#allocation2 + $0x60] sm:$0xe] }
  0x9a   :  { %7556 = vmatpush3.bf16.msra.mxu0 %v7703_v5  ;;  %v1142_v5 = vshrl.u32 %v1037_v61, 16  ;;  %v1677_v13 = vsel %vm8042_vm11, %v1672_v3, %v1676_v59  ;;  %v1153_v16 = vrot.slane %v1151_v8, 5  ;;  %v1158_v20 = vrot.slane %v1156_v10, 4  ;;  %v1340_v57 = vld [vmem:[#allocation2 + $0x64] sm:$0x1] }
  0x9b   :  { %7557 = vmatprep.subr.bf16.mxu0 %v7705_v23  ;;  %2917 = vmatmul.mubr.bf16.gmra.mrb[40].mxu0 %v6621_v63  ;;  %v6661_v18 = vcombine.low %v1663_v9, %v1677_v13  ;;  %v1161_v21 = vrot.slane %v1159_v11, 5  ;;  %v1679_v22 = vshrl.u32 %v1574_v12, 16  ;;  %v1682_v25 = vshll.u32 %v1574_v12, 16  ;;  %v1041_v62 = vld [vmem:[#allocation2 + $0x58] sm:$0xf] }
  0x9c   :  { %v1144_v14 = vrot.slane %v1142_v5, 4  ;;  %v1693_v26 = vshrl.u32 %v1576_v17, 16  ;;  %v1696_v27 = vshll.u32 %v1576_v17, 16  ;;  %v1412_v28 = vsel %vm8034_vm10, %v6633_v60, %v1411_v1  ;;  %v1042_v63 = vld [vmem:[#allocation2 + $0x5c] sm:$0x1] }
  0x9d   :  { %3013 = vmatprep.mubr.bf16.mxu1 %v6661_v18  ;;  %v1336_v7 = vld [vmem:[#allocation2 + $0x44] sm:$0x1]  ;;  %v1162_v30 = vor.u32 %v1161_v21, %v1158_v20  ;;  %v1681_v36 = vrot.slane %v1679_v22, 4  ;;  %v1684_v38 = vrot.slane %v1682_v25, 5  ;;  %v1702_v52 = vshll.u32 %v1577_v24, 16 }
  0x9e   :  { %7558 = vmatpush3.bf16.msra.mxu0 %v7705_v23  ;;  %v1148_v23 = vor.u32 %v1147_v15, %v1144_v14  ;;  %v1040_v29 = vld [vmem:[#allocation2 + $0x44] sm:$0x1]  ;;  %3014 = vmatmul.mubr.bf16.gmra.mrb[40].mxu1 %v7700_v4  ;;  %v1415_v32 = vrot.slane %v1336_v7, 5  ;;  %v1698_v45 = vrot.slane %v1696_v27, 5  ;;  %v6635_v60 = vrot.slane %v1337_v48, 9 }
  0x9f   :  { %7559 = vmatprep.subr.bf16.mxu0 %v7707_v41  ;;  %v1575_v31 = vld [vmem:[#allocation2 + $0x44] sm:$0x1]  ;;  %v1165_v35 = vshll.u32 %v1040_v29, 16  ;;  %v1163_v37 = vrot.slane %v1162_v30, 4  ;;  %v1685_v53 = vor.u32 %v1684_v38, %v1681_v36  ;;  %v1419_v61 = vrot.slane %v1338_v49, 5 }
  0xa0   :  { %v1149_v33 = vrot.slane %v1148_v23, 4  ;;  %v1688_v39 = vshll.u32 %v1575_v31, 16  ;;  %v1416_v42 = vsel %vm8034_vm10, %v6634_v2, %v1415_v32  ;;  %v1704_v2 = vrot.slane %v1702_v52, 5  ;;  %v7702_v4 = vld [vmem:[#allocation2 + $0x40] ss:$8 sps:$4 sm:$0xff]  }
  0xa1   :  { %v1167_v44 = vrot.slane %v1165_v35, 5  ;;  %v6646_v51 = vcombine.low %v1412_v28, %v1416_v42  ;;  %v1686_v1 = vrot.slane %v1685_v53, 4  ;;  %v6636_v47 = vrot.slane %v1339_v56, 9  ;;  %v1044_v8 = vld [vmem:[#allocation2 + $0x64] sm:$0x1] }
  0xa2   :  { %7560 = vmatpush3.bf16.msra.mxu0 %v7707_v41  ;;  %v1695_v41 = vrot.slane %v1693_v26, 4  ;;  %v1154_v43 = vsel %vm8042_vm11, %v1149_v33, %v1153_v16  ;;  %v1690_v54 = vrot.slane %v1688_v39, 5  ;;  %v1420_v5 = vsel %vm8034_vm10, %v6635_v60, %v1419_v61  ;;  %v1578_v18 = vld [vmem:[#allocation2 + $0x60] sm:$0xf]  ;;  %v1579_v24 = vld [vmem:[#allocation2 + $0x64] sm:$0x1] }
  0xa3   :  { %7561 = vmatprep.subr.bf16.mxu0 %v7709_v19  ;;  %v1168_v58 = vsel %vm8042_vm11, %v1163_v37, %v1167_v44  ;;  %2924 = vmatprep.mubr.bf16.mxu0 %v6646_v51  ;;  %v1423_v6 = vrot.slane %v1340_v57, 5  ;;  %v1170_v9 = vshrl.u32 %v1041_v62, 16  ;;  %v1173_v11 = vshll.u32 %v1041_v62, 16  ;;  %v1580_v25 = vld [vmem:[#allocation2 + $0x68] sm:$0xf] }
  0xa4   :  { %v1699_v59 = vor.u32 %v1698_v45, %v1695_v41  ;;  %v6622_v0 = vcombine.low %v1154_v43, %v1168_v58  ;;  %v1691_v10 = vsel %vm8042_vm11, %v1686_v1, %v1690_v54  ;;  %v1179_v12 = vshll.u32 %v1042_v63, 16  ;;  %v1581_v28 = vld [vmem:[#allocation2 + $0x6c] sm:$0x1]  ;;  %v1341_v51 = vld [vmem:[#allocation2 + $0x68] sm:$0xe] }
  0xa5   :  { %v1424_v15 = vsel %vm8034_vm10, %v6636_v47, %v1423_v6  ;;  %v1172_v16 = vrot.slane %v1170_v9, 4  ;;  %v1175_v22 = vrot.slane %v1173_v11, 5  ;;  %v1193_v7 = vshll.u32 %v1044_v8, 16  ;;  %v1342_v52 = vld [vmem:[#allocation2 + $0x6c] sm:$0x1] }
  0xa6   :  { %7562 = vmatpush3.bf16.msra.mxu0 %v7709_v19  ;;  %v1043_v19 = vld [vmem:[#allocation2 + $0x60] sm:$0xf]  ;;  %v1700_v3 = vrot.slane %v1699_v59, 4  ;;  %v6647_v21 = vcombine.low %v1420_v5, %v1424_v15  ;;  %v1181_v23 = vrot.slane %v1179_v12, 5  ;;  %v1707_v29 = vshrl.u32 %v1578_v18, 16 }
  0xa7   :  { %2925 = vmatmul.mubr.bf16.gmra.mrb[44].mxu0 %v6622_v0  ;;  %v1184_v13 = vshrl.u32 %v1043_v19, 16  ;;  %v1187_v17 = vshll.u32 %v1043_v19, 16  ;;  %v1176_v30 = vor.u32 %v1175_v22, %v1172_v16  ;;  %v1710_v31 = vshll.u32 %v1578_v18, 16  ;;  %v1343_v56 = vld [vmem:[#allocation2 + $0x70] sm:$0xe] }
  0xa8   :  { %v1705_v14 = vsel %vm8042_vm11, %v1700_v3, %v1704_v2  ;;  %2932 = vmatprep.mubr.bf16.mxu0 %v6647_v21  ;;  %v1716_v32 = vshll.u32 %v1579_v24, 16  ;;  %v1721_v33 = vshrl.u32 %v1580_v25, 16  ;;  %v1195_v36 = vrot.slane %v1193_v7, 5  ;;  %v1344_v57 = vld [vmem:[#allocation2 + $0x74] sm:$0x1] }
  0xa9   :  { %v6662_v20 = vcombine.low %v1691_v10, %v1705_v14  ;;  %v1186_v26 = vrot.slane %v1184_v13, 4  ;;  %v1189_v27 = vrot.slane %v1187_v17, 5  ;;  %v1709_v37 = vrot.slane %v1707_v29, 4  ;;  %v1045_v62 = vld [vmem:[#allocation2 + $0x68] sm:$0xf] }
  0xaa   :  { %v1724_v38 = vshll.u32 %v1580_v25, 16  ;;  %v275_v39 = vrot.slane %v8257_v55, 4  ;;  %v1177_v41 = vrot.slane %v1176_v30, 4  ;;  %v1712_v42 = vrot.slane %v1710_v31, 5  ;;  %v1046_v63 = vld [vmem:[#allocation2 + $0x6c] sm:$0x1] }
  0xab   :  { %3021 = vmatprep.mubr.bf16.mxu1 %v6662_v20  ;;  %v1190_v35 = vor.u32 %v1189_v27, %v1186_v26  ;;  %v1723_v43 = vrot.slane %v1721_v33, 4  ;;  %v1718_v45 = vrot.slane %v1716_v32, 5  ;;  %v1730_v49 = vshll.u32 %v1581_v28, 16  ;;  %v1047_v19 = vld [vmem:[#allocation2 + $0x70] sm:$0xf] }
  0xac   :  { %3022 = vmatmul.mubr.bf16.gmra.mrb[44].mxu1 %v7702_v4  ;;  %v1726_v48 = vrot.slane %v1724_v38, 5  ;;  %v1182_v53 = vsel %vm8042_vm11, %v1177_v41, %v1181_v23  ;;  %v1713_v54 = vor.u32 %v1712_v42, %v1709_v37  ;;  %v6637_v61 = vrot.slane %v1341_v51, 9  ;;  %v7704_v4 = vld [vmem:[#allocation2 + $0x60] ss:$8 sps:$4 sm:$0xff]   ;;  %v1048_v6 = vld [vmem:[#allocation2 + $0x74] sm:$0x1] }
  0xad   :  { %v1191_v44 = vrot.slane %v1190_v35, 4  ;;  %v1732_v60 = vrot.slane %v1730_v49, 5  ;;  %v1427_v2 = vrot.slane %v1342_v52, 5  ;;  %v6638_v47 = vrot.slane %v1343_v56, 9  ;;  %v1582_v18 = vld [vmem:[#allocation2 + $0x70] sm:$0xf] }
  0xae   :  { %v1727_v59 = vor.u32 %v1726_v48, %v1723_v43  ;;  %v1714_v1 = vrot.slane %v1713_v54, 4  ;;  %v1431_v5 = vrot.slane %v1344_v57, 5  ;;  %v1198_v8 = vshrl.u32 %v1045_v62, 16  ;;  %v1583_v20 = vld [vmem:[#allocation2 + $0x74] sm:$0x1] }
  0xaf   :  { %v1196_v58 = vsel %vm8042_vm11, %v1191_v44, %v1195_v36  ;;  %v1201_v9 = vshll.u32 %v1045_v62, 16  ;;  %v1428_v11 = vsel %vm8034_vm10, %v6637_v61, %v1427_v2  ;;  %v1207_v12 = vshll.u32 %v1046_v63, 16  ;;  %v1584_v25 = vld [vmem:[#allocation2 + $0x78] sm:$0xf]  ;;  %v1585_v26 = vld [vmem:[#allocation2 + $0x7c] sm:$0x1] }
  0xb0   :  { %v6623_v0 = vcombine.low %v1182_v53, %v1196_v58  ;;  %v1728_v3 = vrot.slane %v1727_v59, 4  ;;  %v1719_v10 = vsel %vm8042_vm11, %v1714_v1, %v1718_v45  ;;  %v1212_v13 = vshrl.u32 %v1047_v19, 16  ;;  %v1345_v45 = vld [vmem:[#allocation2 + $0x78] sm:$0xe]  ;;  %v1346_v53 = vld [vmem:[#allocation2 + $0x7c] sm:$0x1] }
  0xb1   :  { %v1432_v15 = vsel %vm8034_vm10, %v6638_v47, %v1431_v5  ;;  %v1200_v16 = vrot.slane %v1198_v8, 4  ;;  %v1203_v17 = vrot.slane %v1201_v9, 5  ;;  %v1209_v23 = vrot.slane %v1207_v12, 5  ;;  %v1347_v54 = vld [vmem:[#allocation2 + $0x80] sm:$0xe] }
  0xb2   :  { %2933 = vmatmul.mubr.bf16.gmra.mrb[48].mxu0 %v6623_v0  ;;  %v1733_v14 = vsel %vm8042_vm11, %v1728_v3, %v1732_v60  ;;  %v6648_v22 = vcombine.low %v1428_v11, %v1432_v15  ;;  %v1214_v24 = vrot.slane %v1212_v13, 4  ;;  %v1215_v7 = vshll.u32 %v1047_v19, 16  ;;  %v1348_v58 = vld [vmem:[#allocation2 + $0x84] sm:$0x1]  ;;  %v1049_v61 = vld [vmem:[#allocation2 + $0x78] sm:$0xf] }
  0xb3   :  { %v6663_v21 = vcombine.low %v1719_v10, %v1733_v14  ;;  %v1204_v27 = vor.u32 %v1203_v17, %v1200_v16  ;;  %v1221_v28 = vshll.u32 %v1048_v6, 16  ;;  %v1735_v29 = vshrl.u32 %v1582_v18, 16  ;;  %v1050_v1 = vld [vmem:[#allocation2 + $0x7c] sm:$0x1]  ;;  %v7706_v3 = vld [vmem:[#allocation2 + $0x70] ss:$8 sps:$4 sm:$0xff]  }
  0xb4   :  { %2940 = vmatprep.mubr.bf16.mxu0 %v6648_v22  ;;  %v1738_v30 = vshll.u32 %v1582_v18, 16  ;;  %v1744_v31 = vshll.u32 %v1583_v20, 16  ;;  %v1749_v32 = vshrl.u32 %v1584_v25, 16  ;;  %v1752_v33 = vshll.u32 %v1584_v25, 16  ;;  %v1051_v5 = vld [vmem:[#allocation2 + $0x80] sm:$0xf] }
  0xb5   :  { %3029 = vmatprep.mubr.bf16.mxu1 %v6663_v21  ;;  %v1205_v35 = vrot.slane %v1204_v27, 4  ;;  %v1217_v36 = vrot.slane %v1215_v7, 5  ;;  %v1223_v37 = vrot.slane %v1221_v28, 5  ;;  %v1737_v38 = vrot.slane %v1735_v29, 4  ;;  %v1052_v6 = vld [vmem:[#allocation2 + $0x84] sm:$0x1] }
  0xb6   :  { %3030 = vmatmul.mubr.bf16.gmra.mrb[48].mxu1 %v7704_v4  ;;  %v1740_v41 = vrot.slane %v1738_v30, 5  ;;  %v1746_v42 = vrot.slane %v1744_v31, 5  ;;  %v1751_v43 = vrot.slane %v1749_v32, 4  ;;  %v1754_v44 = vrot.slane %v1752_v33, 5  ;;  %v1586_v16 = vld [vmem:[#allocation2 + $0x80] sm:$0xf] }
  0xb7   :  { %v1210_v48 = vsel %vm8042_vm11, %v1205_v35, %v1209_v23  ;;  %v1218_v49 = vor.u32 %v1217_v36, %v1214_v24  ;;  %v1758_v51 = vshll.u32 %v1585_v26, 16  ;;  %v6639_v52 = vrot.slane %v1345_v45, 9  ;;  %v1587_v17 = vld [vmem:[#allocation2 + $0x84] sm:$0x1]  ;;  %v1588_v18 = vld [vmem:[#allocation2 + $0x88] sm:$0xf] }
  0xb8   :  { %v1741_v56 = vor.u32 %v1740_v41, %v1737_v38  ;;  %v1755_v57 = vor.u32 %v1754_v44, %v1751_v43  ;;  %v1435_v59 = vrot.slane %v1346_v53, 5  ;;  %v6640_v60 = vrot.slane %v1347_v54, 9  ;;  %v1589_v24 = vld [vmem:[#allocation2 + $0x8c] sm:$0x1]  ;;  %v408_v43 = vld [vmem:[#allocation2 + $0x94] sm:$0x1] }
  0xb9   :  { %v1219_v62 = vrot.slane %v1218_v49, 4  ;;  %v1760_v63 = vrot.slane %v1758_v51, 5  ;;  %v1439_v0 = vrot.slane %v1348_v58, 5  ;;  %v1226_v2 = vshrl.u32 %v1049_v61, 16  ;;  %v1349_v51 = vld [vmem:[#allocation2 + $0x88] sm:$0xe] }
  0xba   :  { %v1742_v47 = vrot.slane %v1741_v56, 4  ;;  %v1756_v19 = vrot.slane %v1755_v57, 4  ;;  %v1436_v4 = vsel %vm8034_vm10, %v6639_v52, %v1435_v59  ;;  %v1229_v11 = vshll.u32 %v1049_v61, 16  ;;  %v1350_v53 = vld [vmem:[#allocation2 + $0x8c] sm:$0x1] }
  0xbb   :  { %v1224_v8 = vsel %vm8042_vm11, %v1219_v62, %v1223_v37  ;;  %v1440_v9 = vsel %vm8034_vm10, %v6640_v60, %v1439_v0  ;;  %v1228_v10 = vrot.slane %v1226_v2, 4  ;;  %v1235_v22 = vshll.u32 %v1050_v1, 16  ;;  %v1351_v57 = vld [vmem:[#allocation2 + $0x90] sm:$0xe]  ;;  %v1054_v1 = vld [vmem:[#allocation2 + $0x8c] sm:$0x1] }
  0xbc   :  { %v6624_v12 = vcombine.low %v1210_v48, %v1224_v8  ;;  %v1747_v13 = vsel %vm8042_vm11, %v1742_v47, %v1746_v42  ;;  %v1761_v14 = vsel %vm8042_vm11, %v1756_v19, %v1760_v63  ;;  %v6649_v15 = vcombine.low %v1436_v4, %v1440_v9  ;;  %v1053_v63 = vld [vmem:[#allocation2 + $0x88] sm:$0xf]  ;;  %v1055_v2 = vld [vmem:[#allocation2 + $0x90] sm:$0xf] }
  0xbd   :  { %v6664_v20 = vcombine.low %v1747_v13, %v1761_v14  ;;  %v1231_v21 = vrot.slane %v1229_v11, 5  ;;  %v1240_v23 = vshrl.u32 %v1051_v5, 16  ;;  %v1243_v25 = vshll.u32 %v1051_v5, 16  ;;  %v1592_v14 = vld [vmem:[#allocation2 + $0x98] sm:$0xf] }
  0xbe   :  { %2941 = vmatmul.mubr.bf16.gmra.mrb[52].mxu0 %v6624_v12  ;;  %v1249_v26 = vshll.u32 %v1052_v6, 16  ;;  %v1763_v27 = vshrl.u32 %v1586_v16, 16  ;;  %v1766_v7 = vshll.u32 %v1586_v16, 16  ;;  %v1237_v29 = vrot.slane %v1235_v22, 5 }
  0xbf   :  { %3037 = vmatprep.mubr.bf16.mxu1 %v6664_v20  ;;  %2948 = vmatprep.mubr.bf16.mxu0 %v6649_v15  ;;  %v1232_v28 = vor.u32 %v1231_v21, %v1228_v10  ;;  %v1242_v30 = vrot.slane %v1240_v23, 4  ;;  %v1772_v31 = vshll.u32 %v1587_v17, 16  ;;  %v1245_v32 = vrot.slane %v1243_v25, 5  ;;  %v1590_v10 = vld [vmem:[#allocation2 + $0x90] sm:$0xf] }
  0xc0   :  { %3038 = vmatmul.mubr.bf16.gmra.mrb[52].mxu1 %v7706_v3  ;;  %v1251_v33 = vrot.slane %v1249_v26, 5  ;;  %v1765_v35 = vrot.slane %v1763_v27, 4  ;;  %v1768_v36 = vrot.slane %v1766_v7, 5  ;;  %v1777_v41 = vshrl.u32 %v1588_v18, 16  ;;  %v7708_v17 = vld [vmem:[#allocation2 + $0x80] ss:$8 sps:$4 sm:$0xff]  }
  0xc1   :  { %v1233_v37 = vrot.slane %v1232_v28, 4  ;;  %v1774_v38 = vrot.slane %v1772_v31, 5  ;;  %v1780_v42 = vshll.u32 %v1588_v18, 16  ;;  %v1246_v44 = vor.u32 %v1245_v32, %v1242_v30  ;;  %v1593_v7 = vld [vmem:[#allocation2 + $0x9c] sm:$0x1] }
  0xc2   :  { %v1769_v45 = vor.u32 %v1768_v36, %v1765_v35  ;;  %v1786_v48 = vshll.u32 %v1589_v24, 16  ;;  %v409_v49 = vsel %vm8005_vm5, %v275_v39, %v408_v43  ;;  %v1779_v52 = vrot.slane %v1777_v41, 4 }
  0xc3   :  { %v1238_v54 = vsel %vm8042_vm11, %v1233_v37, %v1237_v29  ;;  %v1782_v56 = vrot.slane %v1780_v42, 5  ;;  %410 = vst [vmem:[#allocation2 + $0x94] sm:$0x1] %v409_v49  ;;  %v6641_v58 = vrot.slane %v1349_v51, 9  ;;  %v1247_v59 = vrot.slane %v1246_v44, 4 }
  0xc4   :  { %v1770_v60 = vrot.slane %v1769_v45, 4  ;;  %v1788_v61 = vrot.slane %v1786_v48, 5  ;;  %v1443_v62 = vrot.slane %v1350_v53, 5  ;;  %v6642_v55 = vrot.slane %v1351_v57, 9  ;;  %v1858_v51 = vld [vmem:[#allocation2 + $0x10] sm:$0xe] }
  0xc5   :  { %v1783_v0 = vor.u32 %v1782_v56, %v1779_v52  ;;  %v1254_v39 = vshrl.u32 %v1053_v63, 16  ;;  %v1252_v47 = vsel %vm8042_vm11, %v1247_v59, %v1251_v33  ;;  %v1257_v4 = vshll.u32 %v1053_v63, 16  ;;  %v1859_v53 = vld [vmem:[#allocation2 + $0x14] sm:$0x1]  ;;  %v1860_v57 = vld [vmem:[#allocation2 + $0x18] sm:$0xe] }
  0xc6   :  { %v1775_v19 = vsel %vm8042_vm11, %v1770_v60, %v1774_v38  ;;  %v1444_v3 = vsel %vm8034_vm10, %v6641_v58, %v1443_v62  ;;  %v6625_v5 = vcombine.low %v1238_v54, %v1252_v47  ;;  %v1263_v9 = vshll.u32 %v1054_v1, 16  ;;  %v1861_v60 = vld [vmem:[#allocation2 + $0x1c] sm:$0x1]  ;;  %v1862_v63 = vld [vmem:[#allocation2 + $0x20] sm:$0xe] }
  0xc7   :  { %v1784_v6 = vrot.slane %v1783_v0, 4  ;;  %v1256_v8 = vrot.slane %v1254_v39, 4  ;;  %v1259_v11 = vrot.slane %v1257_v4, 5  ;;  %v1268_v12 = vshrl.u32 %v1055_v2, 16  ;;  %v1864_v39 = vld [vmem:[#allocation2 + $0x28] sm:$0xe] }
  0xc8   :  { %v1271_v13 = vshll.u32 %v1055_v2, 16  ;;  %v1791_v15 = vshrl.u32 %v1590_v10, 16  ;;  %2949 = vmatmul.mubr.bf16.gmra.mrb[56].mxu0 %v6625_v5  ;;  %v1265_v18 = vrot.slane %v1263_v9, 5  ;;  %v1794_v20 = vshll.u32 %v1590_v10, 16  ;;  %v1863_v2 = vld [vmem:[#allocation2 + $0x24] sm:$0x1] }
  0xc9   :  { %v1789_v16 = vsel %vm8042_vm11, %v1784_v6, %v1788_v61  ;;  %v1805_v21 = vshrl.u32 %v1592_v14, 16  ;;  %v1260_v25 = vor.u32 %v1259_v11, %v1256_v8  ;;  %v1270_v26 = vrot.slane %v1268_v12, 4  ;;  %v7710_v9 = vld [vmem:[#allocation2 + $0x90] ss:$8 sps:$4 sm:$0xff]  }
  0xca   :  { %v6665_v22 = vcombine.low %v1775_v19, %v1789_v16  ;;  %v1352_v23 = vld [vmem:[#allocation2 + $0x94] sm:$0x1]  ;;  %v1273_v27 = vrot.slane %v1271_v13, 5  ;;  %v1793_v31 = vrot.slane %v1791_v15, 4  ;;  %v1796_v32 = vrot.slane %v1794_v20, 5 }
  0xcb   :  { %v1056_v24 = vld [vmem:[#allocation2 + $0x94] sm:$0x1]  ;;  %v1447_v28 = vrot.slane %v1352_v23, 5  ;;  %v1261_v33 = vrot.slane %v1260_v25, 4  ;;  %v1807_v37 = vrot.slane %v1805_v21, 4  ;;  %v1808_v43 = vshll.u32 %v1592_v14, 16 }
  0xcc   :  { %v1277_v29 = vshll.u32 %v1056_v24, 16  ;;  %v1591_v30 = vld [vmem:[#allocation2 + $0x94] sm:$0x1]  ;;  %3045 = vmatprep.mubr.bf16.mxu1 %v6665_v22  ;;  %v1274_v35 = vor.u32 %v1273_v27, %v1270_v26  ;;  %v1797_v42 = vor.u32 %v1796_v32, %v1793_v31  ;;  %v1814_v56 = vshll.u32 %v1593_v7, 16  ;;  %v1866_v12 = vld [vmem:[#allocation2 + $0x30] sm:$0xe] }
  0xcd   :  { %v1800_v36 = vshll.u32 %v1591_v30, 16  ;;  %3046 = vmatmul.mubr.bf16.gmra.mrb[56].mxu1 %v7708_v17  ;;  %v1448_v38 = vsel %vm8034_vm10, %v6642_v55, %v1447_v28  ;;  %v1266_v45 = vsel %vm8042_vm11, %v1261_v33, %v1265_v18  ;;  %v1810_v52 = vrot.slane %v1808_v43, 5  ;;  %v1867_v15 = vld [vmem:[#allocation2 + $0x34] sm:$0x1]  ;;  %v1868_v16 = vld [vmem:[#allocation2 + $0x38] sm:$0xe] }
  0xce   :  { %v1279_v41 = vrot.slane %v1277_v29, 5  ;;  %v6650_v44 = vcombine.low %v1444_v3, %v1448_v38  ;;  %v1275_v48 = vrot.slane %v1274_v35, 4  ;;  %v1798_v54 = vrot.slane %v1797_v42, 4  ;;  %v1865_v3 = vld [vmem:[#allocation2 + $0x2c] sm:$0x1] }
  0xcf   :  { %v1802_v49 = vrot.slane %v1800_v36, 5  ;;  %v6667_v58 = vrot.slane %v1858_v51, 9  ;;  %v1924_v61 = vrot.slane %v1859_v53, 5  ;;  %v6668_v62 = vrot.slane %v1860_v57, 9  ;;  %v1869_v17 = vld [vmem:[#allocation2 + $0x3c] sm:$0x1] }
  0xd0   :  { %2956 = vmatprep.mubr.bf16.mxu0 %v6650_v44  ;;  %v1280_v59 = vsel %vm8042_vm11, %v1275_v48, %v1279_v41  ;;  %v1811_v55 = vor.u32 %v1810_v52, %v1807_v37  ;;  %v1816_v1 = vrot.slane %v1814_v56, 5  ;;  %v1928_v19 = vrot.slane %v1861_v60, 5  ;;  %v1870_v23 = vld [vmem:[#allocation2 + $0x40] sm:$0xe]  ;;  %v1871_v24 = vld [vmem:[#allocation2 + $0x44] sm:$0x1] }
  0xd1   :  { %v6626_v0 = vcombine.low %v1266_v45, %v1280_v59  ;;  %v1925_v47 = vsel %vm8034_vm10, %v6667_v58, %v1924_v61  ;;  %v6669_v4 = vrot.slane %v1862_v63, 9  ;;  %v1932_v5 = vrot.slane %v1863_v2, 5  ;;  %v1872_v28 = vld [vmem:[#allocation2 + $0x48] sm:$0xe]  ;;  %v1873_v29 = vld [vmem:[#allocation2 + $0x4c] sm:$0x1] }
  0xd2   :  { %v1803_v6 = vsel %vm8042_vm11, %v1798_v54, %v1802_v49  ;;  %v1812_v8 = vrot.slane %v1811_v55, 4  ;;  %v6670_v10 = vrot.slane %v1864_v39, 9  ;;  %v1936_v11 = vrot.slane %v1865_v3, 5  ;;  %v1874_v35 = vld [vmem:[#allocation2 + $0x60] sm:$0xe] }
  0xd3   :  { %2957 = vmatmul.mubr.bf16.gmra.mrb[60].mxu0 %v6626_v0  ;;  %v1929_v13 = vsel %vm8034_vm10, %v6668_v62, %v1928_v19  ;;  %v1933_v14 = vsel %vm8034_vm10, %v6669_v4, %v1932_v5  ;;  %v6671_v22 = vrot.slane %v1866_v12, 9  ;;  %v1940_v27 = vrot.slane %v1867_v15, 5  ;;  %v1875_v38 = vld [vmem:[#allocation2 + $0x64] sm:$0x1]  ;;  %v1876_v41 = vld [vmem:[#allocation2 + $0x68] sm:$0xe] }
  0xd4   :  { %v1817_v18 = vsel %vm8042_vm11, %v1812_v8, %v1816_v1  ;;  %v6683_v20 = vcombine.low %v1925_v47, %v1929_v13  ;;  %v1937_v21 = vsel %vm8034_vm10, %v6670_v10, %v1936_v11  ;;  %v6672_v7 = vrot.slane %v1868_v16, 9  ;;  %v1877_v44 = vld [vmem:[#allocation2 + $0x6c] sm:$0x1]  ;;  %v1878_v49 = vld [vmem:[#allocation2 + $0x70] sm:$0xe] }
  0xd5   :  { %v6666_v25 = vcombine.low %v1803_v6, %v1817_v18  ;;  %v6684_v26 = vcombine.low %v1933_v14, %v1937_v21  ;;  %v1944_v30 = vrot.slane %v1869_v17, 5  ;;  %v6673_v31 = vrot.slane %v1870_v23, 9  ;;  %v1879_v54 = vld [vmem:[#allocation2 + $0x74] sm:$0x1]  ;;  %v1880_v52 = vld [vmem:[#allocation2 + $0x78] sm:$0xe] }
  0xd6   :  { %7563 = vmatprep.mubr.bf16.mxu0 %v6683_v20  ;;  %v1948_v32 = vrot.slane %v1871_v24, 5  ;;  %v6674_v33 = vrot.slane %v1872_v28, 9  ;;  %v1941_v36 = vsel %vm8034_vm10, %v6671_v22, %v1940_v27  ;;  %v1952_v37 = vrot.slane %v1873_v29, 5  ;;  %v1881_v56 = vld [vmem:[#allocation2 + $0x7c] sm:$0x1] }
  0xd7   :  { %3053 = vmatprep.mubr.bf16.mxu1 %v6666_v25  ;;  %v6675_v42 = vrot.slane %v1874_v35, 9  ;;  %v1945_v43 = vsel %vm8034_vm10, %v6672_v7, %v1944_v30  ;;  %v1956_v45 = vrot.slane %v1875_v38, 5  ;;  %v6676_v48 = vrot.slane %v1876_v41, 9  ;;  %v1882_v59 = vld [vmem:[#allocation2 + $0x80] sm:$0xe] }
  0xd8   :  { %3054 = vmatmul.mubr.bf16.gmra.mrb[60].mxu1 %v7710_v9  ;;  %v6685_v51 = vcombine.low %v1941_v36, %v1945_v43  ;;  %v1960_v53 = vrot.slane %v1877_v44, 5  ;;  %v6677_v57 = vrot.slane %v1878_v49, 9  ;;  %v1964_v58 = vrot.slane %v1879_v54, 5  ;;  %v1883_v0 = vld [vmem:[#allocation2 + $0x84] sm:$0x1] }
  0xd9   :  { %v1949_v60 = vsel %vm8034_vm10, %v6673_v31, %v1948_v32  ;;  %v1953_v61 = vsel %vm8034_vm10, %v6674_v33, %v1952_v37  ;;  %v6678_v62 = vrot.slane %v1880_v52, 9  ;;  %v1968_v63 = vrot.slane %v1881_v56, 5  ;;  %v1884_v55 = vld [vmem:[#allocation2 + $0x88] sm:$0xe]  ;;  %v1885_v39 = vld [vmem:[#allocation2 + $0x8c] sm:$0x1] }
  0xda   :  { %v1957_v1 = vsel %vm8034_vm10, %v6675_v42, %v1956_v45  ;;  %v1961_v2 = vsel %vm8034_vm10, %v6676_v48, %v1960_v53  ;;  %v6679_v47 = vrot.slane %v1882_v59, 9  ;;  %v1972_v19 = vrot.slane %v1883_v0, 5  ;;  %v1886_v3 = vld [vmem:[#allocation2 + $0x90] sm:$0xe]  ;;  %v1887_v6 = vld [vmem:[#allocation2 + $0x94] sm:$0x1] }
  0xdb   :  { %7564 = vmatmul.mubr.bf16.vlgmr.msra.gmra.mrb[64].mxu0 %v6684_v26  ;;  %v6680_v4 = vrot.slane %v1884_v55, 9  ;;  %v1976_v5 = vrot.slane %v1885_v39, 5  ;;  %v1888_v8 = vld [vmem:[#allocation2 + $0x98] sm:$0xe]  ;;  %v6686_v9 = vcombine.low %v1949_v60, %v1953_v61  ;;  %v1889_v10 = vld [vmem:[#allocation2 + $0x9c] sm:$0x1]  ;;  %v6687_v13 = vcombine.low %v1957_v1, %v1961_v2 }
  0xdc   :  { %7567 = vmatprep.mubr.bf16.mxu0 %v6685_v51  ;;  %v6681_v11 = vrot.slane %v1886_v3, 9  ;;  %v1980_v12 = vrot.slane %v1887_v6, 5  ;;  %v6682_v14 = vrot.slane %v1888_v8, 9  ;;  %v1984_v15 = vrot.slane %v1889_v10, 5 }
  0xdd   :  { %v1965_v16 = vsel %vm8034_vm10, %v6677_v57, %v1964_v58  ;;  %v1969_v17 = vsel %vm8034_vm10, %v6678_v62, %v1968_v63  ;;  %v1973_v18 = vsel %vm8034_vm10, %v6679_v47, %v1972_v19  ;;  %v1977_v20 = vsel %vm8034_vm10, %v6680_v4, %v1976_v5 }
  0xde   :  { %v6688_v21 = vcombine.low %v1965_v16, %v1969_v17  ;;  %v6689_v22 = vcombine.low %v1973_v18, %v1977_v20  ;;  %v1981_v27 = vsel %vm8034_vm10, %v6681_v11, %v1980_v12  ;;  %v1985_v7 = vsel %vm8034_vm10, %v6682_v14, %v1984_v15 }
  0xdf   :  { %v6690_v35 = vcombine.low %v1981_v27, %v1985_v7 }
  0xe3   :  { %7568 = vmatmul.mubr.bf16.gmra.mrb[68].mxu0 %v6686_v9 }
  0xe4   :  { %7571 = vmatprep.mubr.bf16.mxu0 %v6687_v13 }
  0xeb   :  { %7572 = vmatmul.mubr.bf16.gmra.mrb[72].mxu0 %v6688_v21 }
  0xec   :  { %7575 = vmatprep.mubr.bf16.mxu0 %v6689_v22 }
  0xf3   :  { %7576 = vmatmul.mubr.bf16.gmra.mrb[76].mxu0 %v6690_v35 }
  0xff   :  { %v7083_v23 = vpop.f32.mrb[0].mxu1 }
 0x100   :  { %v7084_v24 = vpop.f32.mrb[1].mxu1 }
 0x101   :  { %v7085_v25 = vadd.f32 %v7084_v24, %v7083_v23  ;;  %v7086_v26 = vpop.f32.mrb[2].mxu1 }
 0x102   :  { %v7019_v28 = vpop.f32.mrb[0].mxu0  ;;  %v7087_v29 = vpop.f32.mrb[3].mxu1 }
 0x103   :  { %v7020_v30 = vpop.f32.mrb[1].mxu0  ;;  %v7088_v31 = vadd.f32 %v7087_v29, %v7086_v26 }
 0x104   :  { %v7021_v32 = vadd.f32 %v7020_v30, %v7019_v28  ;;  %v7022_v33 = vpop.f32.mrb[2].mxu0 }
 0x105   :  { %v7023_v36 = vpop.f32.mrb[3].mxu0 }
 0x106   :  { %v8462_v37 = vadd.f32 %v7085_v25, %v7021_v32  ;;  %v7024_v38 = vadd.f32 %v7023_v36, %v7022_v33 }
 0x107   :  { %v7089_v42 = vpop.f32.mrb[4].mxu1 }
 0x108   :  { %v8464_v41 = vadd.f32 %v7088_v31, %v7024_v38  ;;  %v7090_v43 = vpop.f32.mrb[5].mxu1 }
 0x109   :  { %v7091_v45 = vadd.f32 %v7090_v43, %v7089_v42  ;;  %v7092_v48 = vpop.f32.mrb[6].mxu1 }
 0x10a   :  { %v7025_v44 = vpop.f32.mrb[4].mxu0  ;;  %v7093_v51 = vpop.f32.mrb[7].mxu1 }
 0x10b   :  { %v7026_v49 = vpop.f32.mrb[5].mxu0  ;;  %v7094_v52 = vadd.f32 %v7093_v51, %v7092_v48 }
 0x10c   :  { %v7027_v53 = vadd.f32 %v7026_v49, %v7025_v44  ;;  %v7028_v54 = vpop.f32.mrb[6].mxu0 }
 0x10d   :  { %v7029_v56 = vpop.f32.mrb[7].mxu0 }
 0x10e   :  { %v8466_v57 = vadd.f32 %v7091_v45, %v7027_v53  ;;  %v7030_v58 = vadd.f32 %v7029_v56, %v7028_v54 }
 0x110   :  { %v8468_v59 = vadd.f32 %v7094_v52, %v7030_v58 }
 0x113   :  { %v7031_v60 = vpop.f32.mrb[8].mxu0 }
 0x114   :  { %v7032_v61 = vpop.f32.mrb[9].mxu0  ;;  %v7095_v62 = vpop.f32.mrb[8].mxu1 }
 0x115   :  { %v7033_v63 = vadd.f32 %v7032_v61, %v7031_v60  ;;  %v7034_v0 = vpop.f32.mrb[10].mxu0  ;;  %v7096_v55 = vpop.f32.mrb[9].mxu1 }
 0x116   :  { %v7035_v1 = vpop.f32.mrb[11].mxu0  ;;  %v7097_v2 = vadd.f32 %v7096_v55, %v7095_v62  ;;  %v7098_v39 = vpop.f32.mrb[10].mxu1 }
 0x117   :  { %v7036_v47 = vadd.f32 %v7035_v1, %v7034_v0  ;;  %v7099_v19 = vpop.f32.mrb[11].mxu1 }
 0x118   :  { %v8470_v3 = vadd.f32 %v7097_v2, %v7033_v63  ;;  %v7100_v4 = vadd.f32 %v7099_v19, %v7098_v39 }
 0x11a   :  { %v8472_v5 = vadd.f32 %v7100_v4, %v7036_v47 }
 0x120   :  { %v7101_v6 = vpop.f32.mrb[12].mxu1 }
 0x121   :  { %v7102_v8 = vpop.f32.mrb[13].mxu1 }
 0x122   :  { %v7103_v9 = vadd.f32 %v7102_v8, %v7101_v6  ;;  %v7104_v10 = vpop.f32.mrb[14].mxu1 }
 0x123   :  { %v7105_v12 = vpop.f32.mrb[15].mxu1 }
 0x124   :  { %v7037_v11 = vpop.f32.mrb[12].mxu0  ;;  %v7106_v14 = vadd.f32 %v7105_v12, %v7104_v10 }
 0x125   :  { %v7038_v13 = vpop.f32.mrb[13].mxu0 }
 0x126   :  { %v7039_v15 = vadd.f32 %v7038_v13, %v7037_v11  ;;  %v7040_v16 = vpop.f32.mrb[14].mxu0 }
 0x127   :  { %v7041_v17 = vpop.f32.mrb[15].mxu0 }
 0x128   :  { %v8474_v18 = vadd.f32 %v7103_v9, %v7039_v15  ;;  %v7042_v20 = vadd.f32 %v7041_v17, %v7040_v16  ;;  %v7107_v24 = vpop.f32.mrb[16].mxu1 }
 0x129   :  { %v7108_v27 = vpop.f32.mrb[17].mxu1 }
 0x12a   :  { %v8476_v21 = vadd.f32 %v7106_v14, %v7042_v20 }
 0x12c   :  { %v7043_v22 = vpop.f32.mrb[16].mxu0 }
 0x12d   :  { %v7044_v23 = vpop.f32.mrb[17].mxu0 }
 0x12e   :  { %v7045_v25 = vadd.f32 %v7044_v23, %v7043_v22  ;;  %v7046_v26 = vpop.f32.mrb[18].mxu0 }
 0x12f   :  { %v7047_v7 = vpop.f32.mrb[19].mxu0 }
 0x130   :  { %12 = vsyncpa [#allocation5], 0  ;;  %v7109_v28 = vadd.f32 %v7108_v27, %v7107_v24  ;;  %v7110_v29 = vpop.f32.mrb[18].mxu1  ;;  %v7048_v30 = vadd.f32 %v7047_v7, %v7046_v26  ;;  %s7852_s1 = smov [#allocation4]  }
 0x131   :  { %v7111_v31 = vpop.f32.mrb[19].mxu1  ;;  %s6544_s16 = sshll.u32 %s7852_s1, 4  ;;  %s6545_s16 = int_to_ptr.vmem [resolvable:$true] %s6544_s16 }
 0x132   :  { %v8478_v32 = vadd.f32 %v7109_v28, %v7045_v25  ;;  %v7112_v33 = vadd.f32 %v7111_v31, %v7110_v29  ;;  %p7832_p1 = scmp.lt.s32.totalorder %s6545_s16, %s6545_s16 }
 0x134   :  { %v8480_v35 = vadd.f32 %v7112_v33, %v7048_v30 }
 0x139   :  { %v7113_v36 = vpop.f32.mrb[20].mxu1 }
 0x13a   :  { %v7114_v38 = vpop.f32.mrb[21].mxu1 }
 0x13b   :  { %v7115_v42 = vadd.f32 %v7114_v38, %v7113_v36  ;;  %v7116_v43 = vpop.f32.mrb[22].mxu1 }
 0x13c   :  { %v7117_v45 = vpop.f32.mrb[23].mxu1 }
 0x13d   :  { %v7049_v44 = vpop.f32.mrb[20].mxu0  ;;  %v7118_v49 = vadd.f32 %v7117_v45, %v7116_v43 }
 0x13e   :  { %v7050_v48 = vpop.f32.mrb[21].mxu0 }
 0x13f   :  { %v7051_v51 = vadd.f32 %v7050_v48, %v7049_v44  ;;  %v7052_v53 = vpop.f32.mrb[22].mxu0 }
 0x140   :  { %v7053_v54 = vpop.f32.mrb[23].mxu0 }
 0x141   :  { %v8482_v52 = vadd.f32 %v7115_v42, %v7051_v51  ;;  %v7054_v56 = vadd.f32 %v7053_v54, %v7052_v53 }
 0x143   :  { %v8484_v58 = vadd.f32 %v7118_v49, %v7054_v56 }
 0x144   :  { %v7119_v60 = vpop.f32.mrb[24].mxu1 }
 0x145   :  { %v7120_v61 = vpop.f32.mrb[25].mxu1 }
 0x146   :  { %v7121_v62 = vadd.f32 %v7120_v61, %v7119_v60  ;;  %v7122_v63 = vpop.f32.mrb[26].mxu1 }
 0x147   :  { %v7123_v55 = vpop.f32.mrb[27].mxu1 }
 0x148   :  { %v7124_v2 = vadd.f32 %v7123_v55, %v7122_v63 }
 0x149   :  { %v7055_v0 = vpop.f32.mrb[24].mxu0 }
 0x14a   :  { %v7056_v1 = vpop.f32.mrb[25].mxu0 }
 0x14b   :  { %v7057_v39 = vadd.f32 %v7056_v1, %v7055_v0  ;;  %v7058_v47 = vpop.f32.mrb[26].mxu0 }
 0x14c   :  { %v7059_v19 = vpop.f32.mrb[27].mxu0 }
 0x14d   :  { %v8486_v4 = vadd.f32 %v7121_v62, %v7057_v39  ;;  %v7060_v6 = vadd.f32 %v7059_v19, %v7058_v47 }
 0x14f   :  { %v8488_v8 = vadd.f32 %v7124_v2, %v7060_v6  ;;  %v7125_v9 = vpop.f32.mrb[28].mxu1 }
 0x150   :  { %v7126_v10 = vpop.f32.mrb[29].mxu1 }
 0x151   :  { %v7127_v11 = vadd.f32 %v7126_v10, %v7125_v9  ;;  %v7128_v12 = vpop.f32.mrb[30].mxu1 }
 0x152   :  { %v7129_v14 = vpop.f32.mrb[31].mxu1 }
 0x153   :  { %v7130_v16 = vadd.f32 %v7129_v14, %v7128_v12 }
 0x154   :  { %v7061_v13 = vpop.f32.mrb[28].mxu0 }
 0x155   :  { %v7062_v15 = vpop.f32.mrb[29].mxu0 }
 0x156   :  { %v7063_v17 = vadd.f32 %v7062_v15, %v7061_v13  ;;  %v7064_v20 = vpop.f32.mrb[30].mxu0 }
 0x157   :  { %v7065_v22 = vpop.f32.mrb[31].mxu0 }
 0x158   :  { %v8490_v23 = vadd.f32 %v7127_v11, %v7063_v17  ;;  %v7066_v24 = vadd.f32 %v7065_v22, %v7064_v20 }
 0x15a   :  { %v8492_v25 = vadd.f32 %v7130_v16, %v7066_v24 }
 0x15b   :  { %v7211_v31 = vpop.f32.mrb[32].mxu1 }
 0x15c   :  { %v7147_v26 = vpop.f32.mrb[32].mxu0  ;;  %v7212_v36 = vpop.f32.mrb[33].mxu1 }
 0x15d   :  { %v7148_v27 = vpop.f32.mrb[33].mxu0  ;;  %v7213_v42 = vadd.f32 %v7212_v36, %v7211_v31  ;;  %v7214_v43 = vpop.f32.mrb[34].mxu1 }
 0x15e   :  { %v7149_v7 = vadd.f32 %v7148_v27, %v7147_v26  ;;  %v7150_v28 = vpop.f32.mrb[34].mxu0  ;;  %v7215_v44 = vpop.f32.mrb[35].mxu1 }
 0x15f   :  { %v7151_v29 = vpop.f32.mrb[35].mxu0  ;;  %v7216_v45 = vadd.f32 %v7215_v44, %v7214_v43 }
 0x160   :  { %v2903_v30 = vadd.f32 %v7149_v7, %v8462_v37  ;;  %v7152_v33 = vadd.f32 %v7151_v29, %v7150_v28 }
 0x162   :  { %v2906_v38 = vadd.f32 %v7152_v33, %v8464_v41  ;;  %v8496_v48 = vadd.f32 %v7213_v42, %v2903_v30 }
 0x164   :  { %v8498_v49 = vadd.f32 %v7216_v45, %v2906_v38  ;;  %v7153_v51 = vpop.f32.mrb[36].mxu0 }
 0x165   :  { %v7154_v53 = vpop.f32.mrb[37].mxu0 }
 0x166   :  { %v7155_v54 = vadd.f32 %v7154_v53, %v7153_v51  ;;  %v7156_v56 = vpop.f32.mrb[38].mxu0 }
 0x167   :  { %v7157_v60 = vpop.f32.mrb[39].mxu0 }
 0x168   :  { %v2911_v37 = vadd.f32 %v7155_v54, %v8466_v57  ;;  %v7158_v62 = vadd.f32 %v7157_v60, %v7156_v56 }
 0x169   :  { %v7217_v61 = vpop.f32.mrb[36].mxu1 }
 0x16a   :  { %v7218_v63 = vpop.f32.mrb[37].mxu1  ;;  %v2914_v41 = vadd.f32 %v7158_v62, %v8468_v59 }
 0x16b   :  { %v7219_v0 = vadd.f32 %v7218_v63, %v7217_v61  ;;  %v7220_v55 = vpop.f32.mrb[38].mxu1 }
 0x16c   :  { %v7221_v1 = vpop.f32.mrb[39].mxu1 }
 0x16d   :  { %v7222_v2 = vadd.f32 %v7221_v1, %v7220_v55  ;;  %v8502_v39 = vadd.f32 %v7219_v0, %v2911_v37 }
 0x16e   :  { %v7159_v19 = vpop.f32.mrb[40].mxu0 }
 0x16f   :  { %v8504_v47 = vadd.f32 %v7222_v2, %v2914_v41  ;;  %v7160_v6 = vpop.f32.mrb[41].mxu0 }
 0x170   :  { %v7161_v9 = vadd.f32 %v7160_v6, %v7159_v19  ;;  %v7162_v10 = vpop.f32.mrb[42].mxu0 }
 0x171   :  { %v7163_v11 = vpop.f32.mrb[43].mxu0  ;;  %v7223_v13 = vpop.f32.mrb[40].mxu1 }
 0x172   :  { %v2919_v57 = vadd.f32 %v7161_v9, %v8470_v3  ;;  %v7164_v12 = vadd.f32 %v7163_v11, %v7162_v10  ;;  %v7224_v59 = vpop.f32.mrb[41].mxu1 }
 0x173   :  { %v7225_v15 = vadd.f32 %v7224_v59, %v7223_v13  ;;  %v7226_v16 = vpop.f32.mrb[42].mxu1 }
 0x174   :  { %v2922_v14 = vadd.f32 %v7164_v12, %v8472_v5  ;;  %v7227_v17 = vpop.f32.mrb[43].mxu1 }
 0x175   :  { %v7228_v20 = vadd.f32 %v7227_v17, %v7226_v16  ;;  %v8508_v22 = vadd.f32 %v7225_v15, %v2919_v57 }
 0x177   :  { %v8510_v24 = vadd.f32 %v7228_v20, %v2922_v14 }
 0x17a   :  { %v7165_v26 = vpop.f32.mrb[44].mxu0 }
 0x17b   :  { %v7166_v27 = vpop.f32.mrb[45].mxu0 }
 0x17c   :  { %v7167_v7 = vadd.f32 %v7166_v27, %v7165_v26  ;;  %v7168_v28 = vpop.f32.mrb[46].mxu0 }
 0x17d   :  { %v7169_v29 = vpop.f32.mrb[47].mxu0 }
 0x17e   :  { %v2927_v3 = vadd.f32 %v7167_v7, %v8474_v18  ;;  %v7170_v30 = vadd.f32 %v7169_v29, %v7168_v28 }
 0x17f   :  { %v7229_v31 = vpop.f32.mrb[44].mxu1 }
 0x180   :  { %v2930_v5 = vadd.f32 %v7170_v30, %v8476_v21  ;;  %v7230_v33 = vpop.f32.mrb[45].mxu1 }
 0x181   :  { %v7231_v36 = vadd.f32 %v7230_v33, %v7229_v31  ;;  %v7232_v38 = vpop.f32.mrb[46].mxu1 }
 0x182   :  { %v7233_v42 = vpop.f32.mrb[47].mxu1 }
 0x183   :  { %v7234_v43 = vadd.f32 %v7233_v42, %v7232_v38  ;;  %v8514_v44 = vadd.f32 %v7231_v36, %v2927_v3  ;;  %v7720_v42 = vld [vmem:[%s9560_s4 + $0x80] sm:$0xff]  }
 0x185   :  { %v8516_v45 = vadd.f32 %v7234_v43, %v2930_v5  ;;  %v7171_v51 = vpop.f32.mrb[48].mxu0 }
 0x186   :  { %v7172_v53 = vpop.f32.mrb[49].mxu0 }
 0x187   :  { %v7173_v54 = vadd.f32 %v7172_v53, %v7171_v51  ;;  %v7174_v56 = vpop.f32.mrb[50].mxu0 }
 0x188   :  { %v7175_v60 = vpop.f32.mrb[51].mxu0 }
 0x189   :  { %v2935_v18 = vadd.f32 %v7173_v54, %v8478_v32  ;;  %v7176_v37 = vadd.f32 %v7175_v60, %v7174_v56  ;;  %v7235_v61 = vpop.f32.mrb[48].mxu1  ;;  %v7722_v56 = vld [vmem:[%s9560_s4 + $0x88] sm:$0xff]  }
 0x18a   :  { %v7236_v62 = vpop.f32.mrb[49].mxu1 }
 0x18b   :  { %v2938_v21 = vadd.f32 %v7176_v37, %v8480_v35  ;;  %v7237_v63 = vadd.f32 %v7236_v62, %v7235_v61  ;;  %v7238_v41 = vpop.f32.mrb[50].mxu1  ;;  %v7711_v61 = vld [vmem:[%s9560_s4 + $0x40] sm:$0xff]  }
 0x18c   :  { %v7239_v0 = vpop.f32.mrb[51].mxu1  ;;  %7275 = vmatprep.subr.bf16.mxu1 %v7711_v61 }
 0x18d   :  { %v7240_v55 = vadd.f32 %v7239_v0, %v7238_v41  ;;  %v8520_v1 = vadd.f32 %v7237_v63, %v2935_v18  ;;  %v7712_v63 = vld [vmem:[%s9560_s4] sm:$0xff]   ;;  %v7725_v41 = vld [vmem:[%s9560_s4 + $0xd0] sm:$0xff]  }
 0x18e   :  { %v7726_v0 = vld [vmem:[%s9560_s4 + $0x90] sm:$0xff]   ;;  %7276 = vmatpush3.bf16.msra.mxu1 %v7712_v63 }
 0x18f   :  { %v8522_v2 = vadd.f32 %v7240_v55, %v2938_v21 }
 0x191   :  { %v7177_v19 = vpop.f32.mrb[52].mxu0 }
 0x192   :  { %v7178_v6 = vpop.f32.mrb[53].mxu0 }
 0x193   :  { %v7179_v9 = vadd.f32 %v7178_v6, %v7177_v19  ;;  %v7180_v10 = vpop.f32.mrb[54].mxu0  ;;  %v7241_v11 = vpop.f32.mrb[52].mxu1  ;;  %v7713_v6 = vld [vmem:[%s9560_s4 + $0x48] sm:$0xff]  }
 0x194   :  { %v7181_v57 = vpop.f32.mrb[55].mxu0  ;;  %v7242_v32 = vpop.f32.mrb[53].mxu1  ;;  %7277 = vmatprep.subr.bf16.mxu1 %v7713_v6 }
 0x195   :  { %v2943_v12 = vadd.f32 %v7179_v9, %v8482_v52  ;;  %v7182_v13 = vadd.f32 %v7181_v57, %v7180_v10  ;;  %v7243_v35 = vadd.f32 %v7242_v32, %v7241_v11  ;;  %v7244_v14 = vpop.f32.mrb[54].mxu1  ;;  %v7714_v57 = vld [vmem:[%s9560_s4 + $0x8] sm:$0xff]   ;;  %v7727_v32 = vld [vmem:[%s9560_s4 + $0xd8] sm:$0xff]  }
 0x196   :  { %v7245_v59 = vpop.f32.mrb[55].mxu1  ;;  %7278 = vmatpush3.bf16.msra.mxu1 %v7714_v57 }
 0x197   :  { %v2946_v15 = vadd.f32 %v7182_v13, %v8484_v58  ;;  %v7246_v16 = vadd.f32 %v7245_v59, %v7244_v14  ;;  %v8526_v17 = vadd.f32 %v7243_v35, %v2943_v12  ;;  %v7719_v58 = vld [vmem:[%s9560_s4 + $0xc0] sm:$0xff]   ;;  %v7728_v35 = vld [vmem:[%s9560_s4 + $0x98] sm:$0xff]  }
 0x198   :  { %7339 = vmatprep.subr.bf16.mxu0 %v7719_v58  ;;  %v7733_v58 = vld [vmem:[%s9560_s4 + $0xe8] sm:$0xff]  }
 0x199   :  { %v8528_v20 = vadd.f32 %v7246_v16, %v2946_v15  ;;  %7340 = vmatpush3.bf16.msra.mxu0 %v7720_v42 }
 0x19b   :  { %v7183_v26 = vpop.f32.mrb[56].mxu0 }
 0x19c   :  { %v7184_v27 = vpop.f32.mrb[57].mxu0 }
 0x19d   :  { %v7185_v7 = vadd.f32 %v7184_v27, %v7183_v26  ;;  %v7186_v28 = vpop.f32.mrb[58].mxu0  ;;  %v7715_v27 = vld [vmem:[%s9560_s4 + $0x50] sm:$0xff]  }
 0x19e   :  { %v7187_v29 = vpop.f32.mrb[59].mxu0  ;;  %7279 = vmatprep.subr.bf16.mxu1 %v7715_v27 }
 0x19f   :  { %v2951_v3 = vadd.f32 %v7185_v7, %v8486_v4  ;;  %v7188_v52 = vadd.f32 %v7187_v29, %v7186_v28  ;;  %v7732_v29 = vld [vmem:[%s9560_s4 + $0xa0] sm:$0xff]  }
 0x1a0   :  { %v7247_v30 = vpop.f32.mrb[56].mxu1 }
 0x1a1   :  { %v7248_v31 = vpop.f32.mrb[57].mxu1  ;;  %v2954_v5 = vadd.f32 %v7188_v52, %v8488_v8  ;;  %v7721_v8 = vld [vmem:[%s9560_s4 + $0xc8] sm:$0xff]  }
 0x1a2   :  { %v7249_v33 = vadd.f32 %v7248_v31, %v7247_v30  ;;  %v7250_v36 = vpop.f32.mrb[58].mxu1  ;;  %7341 = vmatprep.subr.bf16.mxu0 %v7721_v8  ;;  %v7718_v31 = vld [vmem:[%s9560_s4 + $0x18] sm:$0xff]  }
 0x1a3   :  { %v7251_v38 = vpop.f32.mrb[59].mxu1  ;;  %7342 = vmatpush3.bf16.msra.mxu0 %v7722_v56  ;;  %v7737_v56 = vld [vmem:[%s9560_s4 + $0xf0] sm:$0xff]  }
 0x1a4   :  { %v7252_v43 = vadd.f32 %v7251_v38, %v7250_v36  ;;  %v8538_v51 = vadd.f32 %v7249_v33, %v2951_v3  ;;  %7343 = vmatprep.subr.bf16.mxu0 %v7725_v41  ;;  %v7740_v41 = vld [vmem:[%s9560_s4 + $0xb8] sm:$0xff]  }
 0x1a6   :  { %v7189_v4 = vpop.f32.mrb[60].mxu0  ;;  %v8540_v53 = vadd.f32 %v7252_v43, %v2954_v5  ;;  %v7723_v5 = vld [vmem:[%s9560_s4 + $0x60] sm:$0xff]  }
 0x1a7   :  { %v7190_v54 = vpop.f32.mrb[61].mxu0  ;;  %7344 = vmatpush3.bf16.msra.mxu0 %v7726_v0 }
 0x1a8   :  { %v7191_v60 = vadd.f32 %v7190_v54, %v7189_v4  ;;  %v7192_v18 = vpop.f32.mrb[62].mxu0  ;;  %7345 = vmatprep.subr.bf16.mxu0 %v7727_v32  ;;  %v7724_v4 = vld [vmem:[%s9560_s4 + $0x20] sm:$0xff]  }
 0x1a9   :  { %v7193_v37 = vpop.f32.mrb[63].mxu0 }
 0x1aa   :  { %v2959_v21 = vadd.f32 %v7191_v60, %v8490_v23  ;;  %v7194_v62 = vadd.f32 %v7193_v37, %v7192_v18  ;;  %v7739_v37 = vld [vmem:[%s9560_s4 + $0xf8] sm:$0xff]  }
 0x1ab   :  { %v7253_v55 = vpop.f32.mrb[60].mxu1  ;;  %7346 = vmatpush3.bf16.msra.mxu0 %v7728_v35 }
 0x1ac   :  { %v2962_v19 = vadd.f32 %v7194_v62, %v8492_v25  ;;  %v7254_v23 = vpop.f32.mrb[61].mxu1 }
 0x1ad   :  { %v7255_v9 = vadd.f32 %v7254_v23, %v7253_v55  ;;  %v7256_v10 = vpop.f32.mrb[62].mxu1 }
 0x1ae   :  { %v7565_v11 = vpop.f32.mrb[64].mxu0  ;;  %v7257_v25 = vpop.f32.mrb[63].mxu1 }
 0x1af   :  { %v8572_v12 = vadd.f32 %v7565_v11, %v8502_v39  ;;  %v3096_v13 = vpop.f32.mrb[65].mxu0  ;;  %v7258_v14 = vadd.f32 %v7257_v25, %v7256_v10  ;;  %v8580_v16 = vadd.f32 %v7255_v9, %v2959_v21  ;;  %v7730_v21 = vld [vmem:[%s9560_s4 + $0x28] sm:$0xff]   ;;  %v7736_v9 = vld [vmem:[%s9560_s4 + $0x30] sm:$0xff]  }
 0x1b0   :  { %v8578_v59 = vadd.f32 %v3096_v13, %v8496_v48  ;;  %v7566_v15 = vpop.f32.mrb[66].mxu0  ;;  %v7716_v48 = vld [vmem:[%s9560_s4 + $0x10] sm:$0xff]  }
 0x1b1   :  { %v8583_v26 = vadd.f32 %v7566_v15, %v8504_v47  ;;  %v3099_v39 = vpop.f32.mrb[67].mxu0  ;;  %v8591_v28 = vadd.f32 %v7258_v14, %v2962_v19  ;;  %v7731_v47 = vld [vmem:[%s9560_s4 + $0xe0] sm:$0xff]   ;;  %7280 = vmatpush3.bf16.msra.mxu1 %v7716_v48 }
 0x1b2   :  { %v8589_v7 = vadd.f32 %v3099_v39, %v8498_v49  ;;  %7347 = vmatprep.subr.bf16.mxu0 %v7731_v47  ;;  %v7717_v49 = vld [vmem:[%s9560_s4 + $0x58] sm:$0xff]  }
 0x1b3   :  { %7348 = vmatpush3.bf16.msra.mxu0 %v7732_v29  ;;  %7281 = vmatprep.subr.bf16.mxu1 %v7717_v49 }
 0x1b4   :  { %v3161_v3 = vadd.f32 %v8589_v7, %v8578_v59  ;;  %7349 = vmatprep.subr.bf16.mxu0 %v7733_v58 }
 0x1b5   :  { %7282 = vmatpush3.bf16.msra.mxu1 %v7718_v31 }
 0x1b6   :  { %v3162_v30 = vadd.f32 %v3161_v3, %v8572_v12  ;;  %v7569_v52 = vpop.f32.mrb[68].mxu0  ;;  %7283 = vmatprep.subr.bf16.mxu1 %v7723_v5 }
 0x1b7   :  { %v8615_v33 = vadd.f32 %v7569_v52, %v8514_v44  ;;  %v3112_v36 = vpop.f32.mrb[69].mxu0  ;;  %v7734_v44 = vld [vmem:[%s9560_s4 + $0xa8] sm:$0xff]  }
 0x1b8   :  { %v8621_v38 = vadd.f32 %v3112_v36, %v8508_v22  ;;  %v3163_v42 = vadd.f32 %v3162_v30, %v8583_v26  ;;  %v7570_v43 = vpop.f32.mrb[70].mxu0  ;;  %v7729_v22 = vld [vmem:[%s9560_s4 + $0x68] sm:$0xff]   ;;  %7350 = vmatpush3.bf16.msra.mxu0 %v7734_v44 }
 0x1b9   :  { %v8631_v8 = vadd.f32 %v7570_v43, %v8516_v45  ;;  %v3115_v54 = vpop.f32.mrb[71].mxu0  ;;  %v7738_v45 = vld [vmem:[%s9560_s4 + $0xb0] sm:$0xff]   ;;  %7351 = vmatprep.subr.bf16.mxu0 %v7737_v56  ;;  %7284 = vmatpush3.bf16.msra.mxu1 %v7724_v4 }
 0x1ba   :  { %v3164_v60 = vadd.f32 %v3163_v42, %v8621_v38  ;;  %v8641_v18 = vadd.f32 %v3115_v54, %v8510_v24  ;;  %7285 = vmatprep.subr.bf16.mxu1 %v7729_v22  ;;  %v7735_v24 = vld [vmem:[%s9560_s4 + $0x70] sm:$0xff]  }
 0x1bc   :  { %v3165_v61 = vadd.f32 %v3164_v60, %v8641_v18  ;;  %7352 = vmatpush3.bf16.msra.mxu0 %v7738_v45 }
 0x1bd   :  { %7353 = vmatprep.subr.bf16.mxu0 %v7739_v37  ;;  %7286 = vmatpush3.bf16.msra.mxu1 %v7730_v21 }
 0x1be   :  { %v3166_v62 = vadd.f32 %v3165_v61, %v8615_v33  ;;  %v7573_v63 = vpop.f32.mrb[72].mxu0  ;;  %7287 = vmatprep.subr.bf16.mxu1 %v7735_v24 }
 0x1bf   :  { %v8661_v0 = vadd.f32 %v7573_v63, %v8526_v17  ;;  %v3128_v55 = vpop.f32.mrb[73].mxu0  ;;  %v7742_v17 = vld [vmem:[%s9560_s4 + $0x78] sm:$0xff]  }
 0x1c0   :  { %v8664_v19 = vadd.f32 %v3128_v55, %v8520_v1  ;;  %v3167_v23 = vadd.f32 %v3166_v62, %v8631_v8  ;;  %v7574_v6 = vpop.f32.mrb[74].mxu0  ;;  %7354 = vmatpush3.bf16.msra.mxu0 %v7740_v41 }
 0x1c1   :  { %v8671_v10 = vadd.f32 %v7574_v6, %v8528_v20  ;;  %v3131_v11 = vpop.f32.mrb[75].mxu0  ;;  %7288 = vmatpush3.bf16.msra.mxu1 %v7736_v9  ;;  %v7743_v20 = vld [vmem:[%s9560_s4 + $0x38] sm:$0xff]  }
 0x1c2   :  { %v3168_v1 = vadd.f32 %v3167_v23, %v8664_v19  ;;  %v8678_v57 = vadd.f32 %v3131_v11, %v8522_v2  ;;  %7289 = vmatprep.subr.bf16.mxu1 %v7742_v17 }
 0x1c4   :  { %v3169_v32 = vadd.f32 %v3168_v1, %v8678_v57 }
 0x1c5   :  { %7290 = vmatpush3.bf16.msra.mxu1 %v7743_v20 }
 0x1c6   :  { %v3170_v25 = vadd.f32 %v3169_v32, %v8661_v0  ;;  %v7577_v13 = vpop.f32.mrb[76].mxu0  ;;  %v7760_v32 = vld [vmem:[%s9560_s4 + $0x1c0] sm:$0xff]  }
 0x1c7   :  { %v8686_v35 = vadd.f32 %v7577_v13, %v8580_v16  ;;  %v3144_v14 = vpop.f32.mrb[77].mxu0  ;;  %7467 = vmatprep.subr.bf16.mxu0 %v7760_v32 }
 0x1c8   :  { %v8689_v15 = vadd.f32 %v3144_v14, %v8538_v51  ;;  %v3171_v2 = vadd.f32 %v3170_v25, %v8671_v10  ;;  %v7578_v39 = vpop.f32.mrb[78].mxu0  ;;  %v7746_v51 = vld [vmem:[%s9560_s4 + $0x140] sm:$0xff]  }
 0x1c9   :  { %v8693_v27 = vadd.f32 %v7578_v39, %v8591_v28  ;;  %v3147_v48 = vpop.f32.mrb[79].mxu0  ;;  %7403 = vmatprep.subr.bf16.mxu1 %v7746_v51 }
 0x1ca   :  { %v3172_v47 = vadd.f32 %v3171_v2, %v8689_v15  ;;  %v8697_v29 = vadd.f32 %v3147_v48, %v8540_v53 }
 0x1cc   :  { %v3173_v16 = vadd.f32 %v3172_v47, %v8697_v29 }
 0x1ce   :  { %v3174_v3 = vadd.f32 %v3173_v16, %v8686_v35 }
 0x1d0   :  { %v3175_v49 = vadd.f32 %v3174_v3, %v8693_v27 }
 0x1d2   :  { %v3176_v30 = vrot.slane %v3175_v49, 4 }
 0x1d4   :  { %v3177_v28 = vadd.f32 %v3176_v30, %v3175_v49 }
 0x1d6   :  { %v3178_v52 = vrot.slane %v3177_v28, 2 }
 0x1d8   :  { %v3179_v31 = vadd.f32 %v3178_v52, %v3177_v28 }
 0x1da   :  { %v3180_v5 = vrot.slane %v3179_v31, 1 }
 0x1dc   :  { %v3181_v36 = vadd.f32 %v3180_v5, %v3179_v31 }
 0x1de   :  { %v8705_v58 = vmul.f32 0.0078125, %v3181_v36 }
 0x1e0   :  { %v3184_v53 = vsub.f32 %v8578_v59, %v8705_v58  ;;  %v3185_v42 = vsub.f32 %v8589_v7, %v8705_v58  ;;  %v3186_v43 = vsub.f32 %v8572_v12, %v8705_v58  ;;  %v3187_v54 = vsub.f32 %v8583_v26, %v8705_v58 }
 0x1e1   :  { %v3188_v22 = vsub.f32 %v8621_v38, %v8705_v58  ;;  %v3189_v45 = vsub.f32 %v8641_v18, %v8705_v58  ;;  %v3190_v21 = vsub.f32 %v8615_v33, %v8705_v58  ;;  %v3191_v63 = vsub.f32 %v8631_v8, %v8705_v58 }
 0x1e2   :  { %v3200_v4 = vmul.f32 %v3184_v53, %v3184_v53  ;;  %v3201_v44 = vmul.f32 %v3185_v42, %v3185_v42  ;;  %v3202_v56 = vmul.f32 %v3186_v43, %v3186_v43  ;;  %v3203_v37 = vmul.f32 %v3187_v54, %v3187_v54 }
 0x1e3   :  { %v3204_v24 = vmul.f32 %v3188_v22, %v3188_v22  ;;  %v3205_v41 = vmul.f32 %v3189_v45, %v3189_v45  ;;  %v3192_v23 = vsub.f32 %v8664_v19, %v8705_v58  ;;  %v3206_v6 = vmul.f32 %v3190_v21, %v3190_v21 }
 0x1e4   :  { %v3216_v60 = vadd.f32 %v3201_v44, %v3200_v4  ;;  %v3193_v11 = vsub.f32 %v8678_v57, %v8705_v58  ;;  %v3207_v17 = vmul.f32 %v3191_v63, %v3191_v63  ;;  %v3194_v20 = vsub.f32 %v8661_v0, %v8705_v58 }
 0x1e5   :  { %v3208_v25 = vmul.f32 %v3192_v23, %v3192_v23  ;;  %v3195_v14 = vsub.f32 %v8671_v10, %v8705_v58  ;;  %v3196_v48 = vsub.f32 %v8689_v15, %v8705_v58  ;;  %v3197_v51 = vsub.f32 %v8697_v29, %v8705_v58 }
 0x1e6   :  { %v3217_v61 = vadd.f32 %v3216_v60, %v3202_v56  ;;  %v3209_v2 = vmul.f32 %v3193_v11, %v3193_v11  ;;  %v3210_v47 = vmul.f32 %v3194_v20, %v3194_v20  ;;  %v3198_v30 = vsub.f32 %v8686_v35, %v8705_v58  ;;  %v3696_v11 = vld [vmem:[#allocation2 + $0x4] sm:$0x1] }
 0x1e7   :  { %v3211_v3 = vmul.f32 %v3195_v14, %v3195_v14  ;;  %v3212_v28 = vmul.f32 %v3196_v48, %v3196_v48  ;;  %v3199_v31 = vsub.f32 %v8693_v27, %v8705_v58  ;;  %v3213_v5 = vmul.f32 %v3197_v51, %v3197_v51  ;;  %v8762_v51 = vld [vmem:[#allocation2 + $0x50] sm:$0xe] }
 0x1e8   :  { %v3218_v62 = vadd.f32 %v3217_v61, %v3203_v37  ;;  %v3214_v53 = vmul.f32 %v3198_v30, %v3198_v30  ;;  %v3737_v14 = vshll.u32 %v3696_v11, 16 }
 0x1e9   :  { %v3215_v43 = vmul.f32 %v3199_v31, %v3199_v31 }
 0x1ea   :  { %v3219_v55 = vadd.f32 %v3218_v62, %v3204_v24  ;;  %v3695_v24 = vld [vmem:[#allocation2] sm:$0xf]  ;;  %v3244_v62 = vlaneseq }
 0x1eb   :  { %v3728_v63 = vshrl.u32 %v3695_v24, 16 }
 0x1ec   :  { %v3220_v9 = vadd.f32 %v3219_v55, %v3205_v41  ;;  %v3731_v41 = vshll.u32 %v3695_v24, 16  ;;  %v3245_v55 = vshrl.u32 %v3244_v62, 7 }
 0x1ed   :  { %v3730_v23 = vrot.slane %v3728_v63, 4 }
 0x1ee   :  { %v3221_v1 = vadd.f32 %v3220_v9, %v3206_v6  ;;  %v3733_v6 = vrot.slane %v3731_v41, 5  ;;  %v3159_v9 = vld [vmem:[%s9558_s2] sm:$0x1] }
 0x1f0   :  { %v3222_v13 = vadd.f32 %v3221_v1, %v3207_v17  ;;  %v8745_v17 = vsub.s32 0, %v3245_v55  ;;  %v3734_v32 = vor.u32 %v3733_v6, %v3730_v23 }
 0x1f2   :  { %v3223_v39 = vadd.f32 %v3222_v13, %v3208_v25  ;;  %v8747_v25 = vld [vmem:[#allocation2] sm:$0xe]  ;;  %v8749_v13 = vld [vmem:[#allocation2 + $0x4] sm:$0x1]  ;;  %v8766_v30 = vrot.slane %v3734_v32, 4 }
 0x1f4   :  { %v3224_v16 = vadd.f32 %v3223_v39, %v3209_v2  ;;  %v3160_v2 = vld [vmem:[%s9559_s3] sm:$0x1]  ;;  %v8754_v39 = vld [vmem:[#allocation2 + $0x50] sm:$0xf] }
 0x1f5   :  { %v3840_v31 = vshrl.u32 %v8754_v39, 16 }
 0x1f6   :  { %v3225_v49 = vadd.f32 %v3224_v16, %v3210_v47  ;;  %v8760_v16 = vld [vmem:[#allocation2 + $0x54] sm:$0x1] }
 0x1f8   :  { %v3226_v52 = vadd.f32 %v3225_v49, %v3211_v3  ;;  %v6795_v3 = vrot.slane %v8747_v25, 9  ;;  %v4057_v49 = vrot.slane %v8749_v13, 5 }
 0x1fa   :  { %v3227_v36 = vadd.f32 %v3226_v52, %v3212_v28  ;;  %v8768_v52 = vrot.slane %v3737_v14, 5 }
 0x1fc   :  { %v3228_v42 = vadd.f32 %v3227_v36, %v3213_v5 }
 0x1fe   :  { %v3229_v4 = vadd.f32 %v3228_v42, %v3214_v53  ;;  %v3849_v53 = vshll.u32 %v8760_v16, 16  ;;  %v6803_v42 = vrot.slane %v8762_v51, 9 }
 0x200   :  { %v3230_v44 = vadd.f32 %v3229_v4, %v3215_v43 }
 0x202   :  { %v3231_v54 = vrot.slane %v3230_v44, 4 }
 0x204   :  { %v3232_v22 = vadd.f32 %v3231_v54, %v3230_v44 }
 0x206   :  { %v3233_v56 = vrot.slane %v3232_v22, 2 }
 0x208   :  { %v3234_v60 = vadd.f32 %v3233_v56, %v3232_v22 }
 0x20a   :  { %v3235_v45 = vrot.slane %v3234_v60, 1 }
 0x20c   :  { %v3236_v37 = vadd.f32 %v3235_v45, %v3234_v60 }
 0x20e   :  { %v3237_v61 = vmul.f32 0.0078125, %v3236_v37 }
 0x210   :  { %v3238_v21 = vadd.f32 1e-05, %v3237_v61 }
 0x212   :  { %7807 = vrsqrt.f32 %v3238_v21 }
 0x21c   :  { %v7808_v1 = vpop.eup %7807 }
 0x21d   :  { %v3240_v20 = vmul.f32 %v7808_v1, %v3159_v9 }
 0x21f   :  { %v3241_v48 = vmul.f32 %v3240_v20, %v8705_v58  ;;  %v8758_v47 = vrot.slane %v3240_v20, %v8745_v17  ;;  %v3843_v58 = vshll.u32 %v8754_v39, 16 }
 0x221   :  { %v3242_v28 = vsub.f32 %v3160_v2, %v3241_v48  ;;  %v3262_v5 = vmul.f32 %v8758_v47, %v8697_v29  ;;  %v3249_v36 = vmul.f32 %v8758_v47, %v8578_v59  ;;  %v3250_v4 = vmul.f32 %v8758_v47, %v8589_v7 }
 0x222   :  { %v3251_v44 = vmul.f32 %v8758_v47, %v8572_v12  ;;  %v3252_v54 = vmul.f32 %v8758_v47, %v8583_v26  ;;  %v3253_v29 = vmul.f32 %v8758_v47, %v8621_v38  ;;  %v3254_v59 = vmul.f32 %v8758_v47, %v8641_v18 }
 0x223   :  { %v8779_v43 = vrot.slane %v3242_v28, %v8745_v17  ;;  %v3255_v22 = vmul.f32 %v8758_v47, %v8615_v33  ;;  %v3256_v56 = vmul.f32 %v8758_v47, %v8631_v8 }
 0x225   :  { %v3284_v7 = vadd.f32 %v8779_v43, %v3262_v5  ;;  %v3271_v60 = vadd.f32 %v8779_v43, %v3249_v36  ;;  %v3272_v12 = vadd.f32 %v8779_v43, %v3250_v4  ;;  %v3273_v26 = vadd.f32 %v8779_v43, %v3251_v44  ;;  %v3605_v5 = vld [vmem:[#allocation2 + $0x80] sm:$0xf]  ;;  %v3608_v36 = vld [vmem:[#allocation2 + $0x84] sm:$0x1] }
 0x226   :  { %v3274_v45 = vadd.f32 %v8779_v43, %v3252_v54  ;;  %v3275_v38 = vadd.f32 %v8779_v43, %v3253_v29  ;;  %v3276_v18 = vadd.f32 %v8779_v43, %v3254_v59  ;;  %v8803_v37 = vadd.f32 %v8779_v43, %v3255_v22 }
 0x227   :  { %v3300_v33 = vmax.f32 %v3284_v7, 0.0  ;;  %v3287_v61 = vmax.f32 %v3271_v60, 0.0  ;;  %v3288_v8 = vmax.f32 %v3272_v12, 0.0  ;;  %v3289_v21 = vmax.f32 %v3273_v26, 0.0  ;;  %v3530_v26 = vld [vmem:[#allocation2 + $0xc] sm:$0x1] }
 0x228   :  { %v3290_v24 = vmax.f32 %v3274_v45, 0.0  ;;  %v3291_v62 = vmax.f32 %v3275_v38, 0.0  ;;  %v3292_v63 = vmax.f32 %v3276_v18, 0.0  ;;  %v8806_v41 = vadd.f32 %v8779_v43, %v3256_v56  ;;  %v3527_v56 = vld [vmem:[#allocation2 + $0x8] sm:$0xf] }
 0x229   :  { %v7000_v55 = vpack.c.bf16 %v3300_v33, %v3300_v33  ;;  %v6987_v23 = vpack.c.bf16 %v3287_v61, %v3287_v61  ;;  %v6988_v6 = vpack.c.bf16 %v3288_v8, %v3288_v8  ;;  %v6989_v9 = vpack.c.bf16 %v3289_v21, %v3289_v21  ;;  %v3533_v33 = vld [vmem:[#allocation2 + $0x10] sm:$0xf]  ;;  %v3539_v61 = vld [vmem:[#allocation2 + $0x18] sm:$0xf] }
 0x22a   :  { %v6990_v11 = vpack.c.bf16 %v3290_v24, %v3290_v24  ;;  %v8808_v1 = vpack.c.bf16 %v3291_v62, %v3291_v62  ;;  %v8810_v32 = vpack.c.bf16 %v3292_v63, %v3292_v63  ;;  %v3293_v20 = vmax.f32 %v8803_v37, 0.0 }
 0x22b   :  { %v3472_v14 = vshrl.u32 %v7000_v55, 16  ;;  %v3475_v2 = vshll.u32 %v7000_v55, 16  ;;  %v3368_v48 = vshrl.u32 %v6987_v23, 16  ;;  %v3371_v28 = vshll.u32 %v6987_v23, 16 }
 0x22c   :  { %v3376_v4 = vshrl.u32 %v6988_v6, 16  ;;  %v3379_v44 = vshll.u32 %v6988_v6, 16  ;;  %v3384_v54 = vshrl.u32 %v6989_v9, 16  ;;  %v3387_v29 = vshll.u32 %v6989_v9, 16  ;;  %v3536_v9 = vld [vmem:[#allocation2 + $0x14] sm:$0x1] }
 0x22d   :  { %v3474_v59 = vrot.slane %v3472_v14, 7  ;;  %v3370_v22 = vrot.slane %v3368_v48, 7  ;;  %v3392_v7 = vshrl.u32 %v6990_v11, 16  ;;  %v3395_v60 = vshll.u32 %v6990_v11, 16  ;;  %v3545_v14 = vld [vmem:[#allocation2 + $0x20] sm:$0xf] }
 0x22e   :  { %v3378_v12 = vrot.slane %v3376_v4, 7  ;;  %v3386_v45 = vrot.slane %v3384_v54, 7  ;;  %v3400_v38 = vshrl.u32 %v8808_v1, 16  ;;  %v3403_v18 = vshll.u32 %v8808_v1, 16  ;;  %v3551_v4 = vld [vmem:[#allocation2 + $0x28] sm:$0xf] }
 0x22f   :  { %v3477_v8 = vor.u32 %v3475_v2, %v3474_v59  ;;  %v3478_v21 = vrot.slane %v3474_v59, 4  ;;  %v3373_v24 = vor.u32 %v3371_v28, %v3370_v22  ;;  %v3374_v62 = vrot.slane %v3370_v22, 4  ;;  %v3542_v28 = vld [vmem:[#allocation2 + $0x1c] sm:$0x1] }
 0x230   :  { %v3381_v63 = vor.u32 %v3379_v44, %v3378_v12  ;;  %v3389_v55 = vor.u32 %v3387_v29, %v3386_v45  ;;  %v3394_v23 = vrot.slane %v3392_v7, 7  ;;  %v3382_v6 = vrot.slane %v3378_v12, 4  ;;  %v3548_v7 = vld [vmem:[#allocation2 + $0x24] sm:$0x1] }
 0x231   :  { %v3606_v11 = vsel %vm8000_vm4, %v3477_v8, %v3605_v5  ;;  %v3609_v48 = vsel %vm8005_vm5, %v3478_v21, %v3608_v36  ;;  %v3528_v1 = vsel %vm8000_vm4, %v3373_v24, %v3527_v56  ;;  %v3531_v2 = vsel %vm8005_vm5, %v3374_v62, %v3530_v26  ;;  %v3557_v24 = vld [vmem:[#allocation2 + $0x30] sm:$0xf] }
 0x232   :  { %3610 = vst [vmem:[#allocation2 + $0x84] sm:$0x1] %v3609_v48  ;;  %3607 = vst [vmem:[#allocation2 + $0x80] sm:$0xf] %v3606_v11  ;;  %v3534_v44 = vsel %vm8000_vm4, %v3381_v63, %v3533_v33  ;;  %v3397_v54 = vor.u32 %v3395_v60, %v3394_v23  ;;  %v3540_v5 = vsel %vm8000_vm4, %v3389_v55, %v3539_v61  ;;  %v3390_v36 = vrot.slane %v3386_v45, 4 }
 0x233   :  { %3529 = vst [vmem:[#allocation2 + $0x8] sm:$0xf] %v3528_v1  ;;  %3532 = vst [vmem:[#allocation2 + $0xc] sm:$0x1] %v3531_v2  ;;  %v3537_v29 = vsel %vm8005_vm5, %v3382_v6, %v3536_v9  ;;  %v3402_v59 = vrot.slane %v3400_v38, 7  ;;  %v3408_v22 = vshrl.u32 %v8810_v32, 16  ;;  %v4058_v48 = vsel %vm8034_vm10, %v6795_v3, %v4057_v49 }
 0x234   :  { %3535 = vst [vmem:[#allocation2 + $0x10] sm:$0xf] %v3534_v44  ;;  %3541 = vst [vmem:[#allocation2 + $0x18] sm:$0xf] %v3540_v5  ;;  %v3411_v56 = vshll.u32 %v8810_v32, 16  ;;  %v3546_v12 = vsel %vm8000_vm4, %v3397_v54, %v3545_v14  ;;  %v3543_v60 = vsel %vm8005_vm5, %v3390_v36, %v3542_v28  ;;  %v3398_v26 = vrot.slane %v3394_v23, 4 }
 0x235   :  { %3538 = vst [vmem:[#allocation2 + $0x14] sm:$0x1] %v3537_v29  ;;  %v3554_v45 = vld [vmem:[#allocation2 + $0x2c] sm:$0x1]  ;;  %v3294_v33 = vmax.f32 %v8806_v41, 0.0  ;;  %v3405_v38 = vor.u32 %v3403_v18, %v3402_v59  ;;  %v3410_v8 = vrot.slane %v3408_v22, 7  ;;  %v6993_v32 = vpack.c.bf16 %v3293_v20, %v3293_v20 }
 0x236   :  { %v8836_v61 = vld [vmem:[#allocation2 + $0x54] sm:$0x1]  ;;  %3547 = vst [vmem:[#allocation2 + $0x20] sm:$0xf] %v3546_v12  ;;  %3544 = vst [vmem:[#allocation2 + $0x1c] sm:$0x1] %v3543_v60  ;;  %v3549_v62 = vsel %vm8005_vm5, %v3398_v26, %v3548_v7  ;;  %v3740_v1 = vsel %vm8042_vm11, %v8766_v30, %v8768_v52  ;;  %v3257_v5 = vmul.f32 %v8758_v47, %v8664_v19 }
 0x237   :  { %v3406_v21 = vrot.slane %v3402_v59, 4  ;;  %v8843_v63 = vpack.c.bf16 %v3294_v33, %v3294_v33  ;;  %v8847_v41 = vrot.slane %v3840_v31, 4  ;;  %v8851_v55 = vrot.slane %v3843_v58, 5  ;;  %3550 = vst [vmem:[#allocation2 + $0x24] sm:$0x1] %v3549_v62  ;;  %v7762_v3 = vld [vmem:[%s9560_s4 + $0x180] sm:$0xff]  }
 0x238   :  { %v3413_v18 = vor.u32 %v3411_v56, %v3410_v8  ;;  %v3552_v37 = vsel %vm8000_vm4, %v3405_v38, %v3551_v4  ;;  %v3560_v23 = vld [vmem:[#allocation2 + $0x34] sm:$0x1]  ;;  %v4089_v6 = vrot.slane %v8836_v61, 5  ;;  %v3416_v9 = vshrl.u32 %v6993_v32, 16  ;;  %v7763_v19 = vld [vmem:[%s9560_s4 + $0x1c8] sm:$0xff]  }
 0x239   :  { %v3555_v20 = vsel %vm8005_vm5, %v3406_v21, %v3554_v45  ;;  %3553 = vst [vmem:[#allocation2 + $0x28] sm:$0xf] %v3552_v37  ;;  %v3419_v31 = vshll.u32 %v6993_v32, 16  ;;  %v3424_v14 = vshrl.u32 %v8843_v63, 16  ;;  %v3414_v39 = vrot.slane %v3410_v8, 4 }
 0x23a   :  { %3556 = vst [vmem:[#allocation2 + $0x2c] sm:$0x1] %v3555_v20  ;;  %v3993_v58 = vld [vmem:[#allocation2 + $0x8] sm:$0xe]  ;;  %v3994_v11 = vld [vmem:[#allocation2 + $0xc] sm:$0x1]  ;;  %v3558_v2 = vsel %vm8000_vm4, %v3413_v18, %v3557_v24  ;;  %v3846_v25 = vor.u32 %v8851_v55, %v8847_v41  ;;  %v3258_v36 = vmul.f32 %v8758_v47, %v8678_v57  ;;  %v3259_v29 = vmul.f32 %v8758_v47, %v8661_v0 }
 0x23b   :  { %v7741_v28 = vld [vmem:[#allocation2 + $0x8] ss:$8 sps:$4 sm:$0xff]   ;;  %v6796_v4 = vrot.slane %v3993_v58, 9  ;;  %v4061_v44 = vrot.slane %v3994_v11, 5  ;;  %3559 = vst [vmem:[#allocation2 + $0x30] sm:$0xf] %v3558_v2  ;;  %v3561_v13 = vsel %vm8005_vm5, %v3414_v39, %v3560_v23  ;;  %v8886_v59 = vmul.f32 %v8758_v47, %v8671_v10 }
 0x23c   :  { %v3697_v49 = vld [vmem:[#allocation2 + $0x8] sm:$0xf]  ;;  %v3698_v54 = vld [vmem:[#allocation2 + $0xc] sm:$0x1]  ;;  %3562 = vst [vmem:[#allocation2 + $0x34] sm:$0x1] %v3561_v13  ;;  %6008 = vmatprep.mubr.bf16.mxu0 %v7741_v28  ;;  %v8898_v10 = vmul.f32 %v8758_v47, %v8689_v15  ;;  %v8901_v21 = vadd.f32 %v8779_v43, %v3257_v5  ;;  %v8904_v32 = vadd.f32 %v8779_v43, %v3258_v36 }
 0x23d   :  { %v4062_v22 = vsel %vm8034_vm10, %v6796_v4, %v4061_v44  ;;  %v3742_v56 = vshrl.u32 %v3697_v49, 16  ;;  %v3745_v7 = vshll.u32 %v3697_v49, 16  ;;  %v3427_v12 = vshll.u32 %v8843_v63, 16  ;;  %v7744_v60 = vld [vmem:[#allocation2 + $0x18] ss:$8 sps:$4 sm:$0xff]   ;;  %v7764_v24 = vld [vmem:[%s9560_s4 + $0x188] sm:$0xff]  }
 0x23e   :  { %v6811_v57 = vcombine.low %v4058_v48, %v4062_v22  ;;  %v3751_v26 = vshll.u32 %v3698_v54, 16  ;;  %v8894_v0 = vrot.slane %v3416_v9, 7  ;;  %v3699_v38 = vld [vmem:[#allocation2 + $0x10] sm:$0xf]  ;;  %v3700_v8 = vld [vmem:[#allocation2 + $0x14] sm:$0x1]  ;;  %v8911_v23 = vadd.f32 %v8779_v43, %v3259_v29 }
 0x23f   :  { %v3744_v45 = vrot.slane %v3742_v56, 4  ;;  %v3747_v33 = vrot.slane %v3745_v7, 5  ;;  %v3701_v18 = vld [vmem:[#allocation2 + $0x18] sm:$0xf]  ;;  %v3702_v37 = vld [vmem:[#allocation2 + $0x1c] sm:$0x1] }
 0x240   :  { %6009 = vmatmul.mubr.bf16.vlgmr.msra.gmra.mrb[80].mxu0 %v6811_v57  ;;  %v3753_v62 = vrot.slane %v3751_v26, 5  ;;  %v3756_v15 = vshrl.u32 %v3699_v38, 16  ;;  %v3421_v20 = vor.u32 %v3419_v31, %v8894_v0  ;;  %v3563_v9 = vld [vmem:[#allocation2 + $0x38] sm:$0xf]  ;;  %v3759_v58 = vshll.u32 %v3699_v38, 16  ;;  %v7768_v28 = vld [vmem:[%s9560_s4 + $0x1d0] sm:$0xff]  }
 0x241   :  { %6016 = vmatprep.mubr.bf16.mxu0 %v7744_v60  ;;  %v3748_v39 = vor.u32 %v3747_v33, %v3744_v45  ;;  %v3765_v11 = vshll.u32 %v3700_v8, 16  ;;  %v3770_v48 = vshrl.u32 %v3701_v18, 16  ;;  %v3995_v2 = vld [vmem:[#allocation2 + $0x10] sm:$0xe]  ;;  %7468 = vmatpush3.bf16.msra.mxu0 %v7762_v3  ;;  %v3773_v44 = vshll.u32 %v3701_v18, 16  ;;  %v7747_v45 = vld [vmem:[%s9560_s4 + $0x100] sm:$0xff]  }
 0x242   :  { %v3758_v4 = vrot.slane %v3756_v15, 4  ;;  %v3779_v13 = vshll.u32 %v3702_v37, 16  ;;  %v3996_v49 = vld [vmem:[#allocation2 + $0x14] sm:$0x1]  ;;  %v6797_v31 = vrot.slane %v3995_v2, 9  ;;  %7469 = vmatprep.subr.bf16.mxu0 %v7763_v19  ;;  %v3761_v5 = vrot.slane %v3759_v58, 5 }
 0x243   :  { %v3749_v54 = vrot.slane %v3748_v39, 4  ;;  %v3767_v36 = vrot.slane %v3765_v11, 5  ;;  %v3772_v29 = vrot.slane %v3770_v48, 4  ;;  %v3997_v22 = vld [vmem:[#allocation2 + $0x18] sm:$0xe]  ;;  %v7770_v56 = vld [vmem:[%s9560_s4 + $0x190] sm:$0xff]   ;;  %v3564_v58 = vsel %vm8000_vm4, %v3421_v20, %v3563_v9 }
 0x244   :  { %v3775_v3 = vrot.slane %v3773_v44, 5  ;;  %v3781_v7 = vrot.slane %v3779_v13, 5  ;;  %v3998_v57 = vld [vmem:[#allocation2 + $0x1c] sm:$0x1]  ;;  %v4065_v60 = vrot.slane %v3996_v49, 5  ;;  %v6798_v26 = vrot.slane %v3997_v22, 9 }
 0x245   :  { %v3754_v19 = vsel %vm8042_vm11, %v3749_v54, %v3753_v62  ;;  %v3762_v33 = vor.u32 %v3761_v5, %v3758_v4  ;;  %v4069_v38 = vrot.slane %v3998_v57, 5  ;;  %v7750_v8 = vld [vmem:[%s9560_s4 + $0x148] sm:$0xff]   ;;  %v8929_v18 = vrot.slane %v3424_v14, 7  ;;  %7470 = vmatpush3.bf16.msra.mxu0 %v7764_v24  ;;  %v7771_v14 = vld [vmem:[%s9560_s4 + $0x1d8] sm:$0xff]   ;;  %v3703_v30 = vld [vmem:[#allocation2 + $0x20] sm:$0xf] }
 0x246   :  { %v6787_v37 = vcombine.low %v3740_v1, %v3754_v19  ;;  %v7745_v15 = vld [vmem:[#allocation2] ss:$8 sps:$4 sm:$0xff]   ;;  %v3776_v39 = vor.u32 %v3775_v3, %v3772_v29  ;;  %v4066_v62 = vsel %vm8034_vm10, %v6797_v31, %v4065_v60  ;;  %7471 = vmatprep.subr.bf16.mxu0 %v7768_v28  ;;  %3565 = vst [vmem:[#allocation2 + $0x38] sm:$0xf] %v3564_v58  ;;  %v3422_v1 = vrot.slane %v8894_v0, 4  ;;  %v7772_v22 = vld [vmem:[%s9560_s4 + $0x198] sm:$0xff]  }
 0x247   :  { %v3763_v24 = vrot.slane %v3762_v33, 4  ;;  %v4070_v11 = vsel %vm8034_vm10, %v6798_v26, %v4069_v38  ;;  %v7748_v48 = vld [vmem:[#allocation2 + $0x28] ss:$8 sps:$4 sm:$0xff]   ;;  %v3569_v52 = vld [vmem:[#allocation2 + $0x40] sm:$0xf]  ;;  %v8948_v4 = vadd.f32 %v8779_v43, %v8886_v59  ;;  %v3784_v13 = vshrl.u32 %v3703_v30, 16 }
 0x248   :  { %v3566_v2 = vld [vmem:[#allocation2 + $0x3c] sm:$0x1]  ;;  %5911 = vmatprep.mubr.bf16.mxu1 %v6787_v37  ;;  %v3777_v20 = vrot.slane %v3776_v39, 4  ;;  %v6812_v9 = vcombine.low %v4066_v62, %v4070_v11  ;;  %v3704_v28 = vld [vmem:[#allocation2 + $0x24] sm:$0x1]  ;;  %v7751_v49 = vld [vmem:[%s9560_s4 + $0x108] sm:$0xff]   ;;  %v3429_v31 = vor.u32 %v3427_v12, %v8929_v18  ;;  %v8971_v60 = vmul.f32 %v8758_v47, %v8686_v35 }
 0x249   :  { %v3705_v44 = vld [vmem:[#allocation2 + $0x28] sm:$0xf]  ;;  %5912 = vmatmul.mubr.bf16.vlgmr.msra.gmra.mrb[64].mxu1 %v7745_v15  ;;  %v3768_v0 = vsel %vm8042_vm11, %v3763_v24, %v3767_v36  ;;  %v3706_v59 = vld [vmem:[#allocation2 + $0x2c] sm:$0x1]  ;;  %v3787_v54 = vshll.u32 %v3703_v30, 16  ;;  %v3793_v5 = vshll.u32 %v3704_v28, 16  ;;  %7472 = vmatpush3.bf16.msra.mxu0 %v7770_v56  ;;  %v3567_v35 = vsel %vm8005_vm5, %v3422_v1, %v3566_v2 }
 0x24a   :  { %v3798_v29 = vshrl.u32 %v3705_v44, 16  ;;  %v3782_v3 = vsel %vm8042_vm11, %v3777_v20, %v3781_v7  ;;  %6017 = vmatmul.mubr.bf16.gmra.mrb[84].mxu0 %v6812_v9  ;;  %7404 = vmatpush3.bf16.msra.mxu1 %v7747_v45  ;;  %v3786_v63 = vrot.slane %v3784_v13, 4  ;;  %v3801_v12 = vshll.u32 %v3705_v44, 16  ;;  %v3999_v57 = vld [vmem:[#allocation2 + $0x20] sm:$0xe]  ;;  %v7754_v36 = vld [vmem:[%s9560_s4 + $0x150] sm:$0xff]  }
 0x24b   :  { %v7776_v56 = vld [vmem:[%s9560_s4 + $0x1e0] sm:$0xff]   ;;  %v6788_v26 = vcombine.low %v3768_v0, %v3782_v3  ;;  %6024 = vmatprep.mubr.bf16.mxu0 %v7748_v48  ;;  %7405 = vmatprep.subr.bf16.mxu1 %v7750_v8  ;;  %v3789_v7 = vrot.slane %v3787_v54, 5  ;;  %v3807_v19 = vshll.u32 %v3706_v59, 16  ;;  %v3795_v37 = vrot.slane %v3793_v5, 5  ;;  %v4001_v39 = vld [vmem:[#allocation2 + $0x28] sm:$0xe] }
 0x24c   :  { %v3800_v45 = vrot.slane %v3798_v29, 4  ;;  %v4000_v33 = vld [vmem:[#allocation2 + $0x24] sm:$0x1]  ;;  %v3803_v15 = vrot.slane %v3801_v12, 5  ;;  %v4002_v62 = vld [vmem:[#allocation2 + $0x2c] sm:$0x1]  ;;  %v3570_v58 = vsel %vm8000_vm4, %v3429_v31, %v3569_v52  ;;  %7473 = vmatprep.subr.bf16.mxu0 %v7771_v14  ;;  %v3264_v28 = vmul.f32 %v8758_v47, %v8693_v27 }
 0x24d   :  { %v7778_v38 = vld [vmem:[%s9560_s4 + $0x1a0] sm:$0xff]   ;;  %v7755_v8 = vld [vmem:[%s9560_s4 + $0x110] sm:$0xff]   ;;  %5919 = vmatprep.mubr.bf16.mxu1 %v6788_v26  ;;  %v3790_v11 = vor.u32 %v3789_v7, %v3786_v63  ;;  %v6799_v48 = vrot.slane %v3999_v57, 9  ;;  %v4073_v30 = vrot.slane %v4000_v33, 5  ;;  %v6800_v20 = vrot.slane %v4001_v39, 9  ;;  %v7758_v52 = vld [vmem:[%s9560_s4 + $0x158] sm:$0xff]   ;;  %7474 = vmatpush3.bf16.msra.mxu0 %v7772_v22 }
 0x24e   :  { %v7749_v24 = vld [vmem:[#allocation2 + $0x10] ss:$8 sps:$4 sm:$0xff]   ;;  %3571 = vst [vmem:[#allocation2 + $0x40] sm:$0xf] %v3570_v58  ;;  %3568 = vst [vmem:[#allocation2 + $0x3c] sm:$0x1] %v3567_v35  ;;  %v3804_v2 = vor.u32 %v3803_v15, %v3800_v45  ;;  %7406 = vmatpush3.bf16.msra.mxu1 %v7751_v49  ;;  %7475 = vmatprep.subr.bf16.mxu0 %v7776_v56 }
 0x24f   :  { %v7779_v1 = vld [vmem:[%s9560_s4 + $0x1e8] sm:$0xff]   ;;  %v4077_v9 = vrot.slane %v4002_v62, 5  ;;  %v3295_v14 = vmax.f32 %v8901_v21, 0.0  ;;  %v3791_v44 = vrot.slane %v3790_v11, 4  ;;  %v3809_v13 = vrot.slane %v3807_v19, 5  ;;  %7407 = vmatprep.subr.bf16.mxu1 %v7754_v36  ;;  %v7759_v22 = vld [vmem:[%s9560_s4 + $0x118] sm:$0xff]  }
 0x250   :  { %v4074_v31 = vsel %vm8034_vm10, %v6799_v48, %v4073_v30  ;;  %v3707_v0 = vld [vmem:[#allocation2 + $0x30] sm:$0xf]  ;;  %v3296_v59 = vmax.f32 %v8904_v32, 0.0  ;;  %v7780_v54 = vld [vmem:[%s9560_s4 + $0x1a8] sm:$0xff]   ;;  %v3805_v49 = vrot.slane %v3804_v2, 4  ;;  %v7766_v56 = vld [vmem:[%s9560_s4 + $0x160] sm:$0xff]   ;;  %v9023_v48 = vadd.f32 %v8779_v43, %v8898_v10 }
 0x251   :  { %v4078_v21 = vsel %vm8034_vm10, %v6800_v20, %v4077_v9  ;;  %v3708_v5 = vld [vmem:[#allocation2 + $0x34] sm:$0x1]  ;;  %v3709_v29 = vld [vmem:[#allocation2 + $0x38] sm:$0xf]  ;;  %v3812_v27 = vshrl.u32 %v3707_v0, 16  ;;  %v9000_v47 = vpack.c.bf16 %v3295_v14, %v3295_v14  ;;  %5920 = vmatmul.mubr.bf16.gmra.mrb[68].mxu1 %v7749_v24  ;;  %v3796_v32 = vsel %vm8042_vm11, %v3791_v44, %v3795_v37  ;;  %7476 = vmatpush3.bf16.msra.mxu0 %v7778_v38 }
 0x252   :  { %v6813_v3 = vcombine.low %v4074_v31, %v4078_v21  ;;  %v3815_v63 = vshll.u32 %v3707_v0, 16  ;;  %v3821_v12 = vshll.u32 %v3708_v5, 16  ;;  %v4003_v57 = vld [vmem:[#allocation2 + $0x30] sm:$0xe]  ;;  %v4004_v36 = vld [vmem:[#allocation2 + $0x34] sm:$0x1]  ;;  %v3810_v26 = vsel %vm8042_vm11, %v3805_v49, %v3809_v13  ;;  %7408 = vmatpush3.bf16.msra.mxu1 %v7755_v8  ;;  %7477 = vmatprep.subr.bf16.mxu0 %v7779_v1 }
 0x253   :  { %v3814_v7 = vrot.slane %v3812_v27, 4  ;;  %v3826_v45 = vshrl.u32 %v3709_v29, 16  ;;  %v3829_v19 = vshll.u32 %v3709_v29, 16  ;;  %v4005_v33 = vld [vmem:[#allocation2 + $0x38] sm:$0xe]  ;;  %v7784_v37 = vld [vmem:[%s9560_s4 + $0x1f0] sm:$0xff]   ;;  %v6789_v15 = vcombine.low %v3796_v32, %v3810_v26  ;;  %7409 = vmatprep.subr.bf16.mxu1 %v7758_v52 }
 0x254   :  { %6025 = vmatmul.mubr.bf16.gmra.mrb[88].mxu0 %v6813_v3  ;;  %v3817_v39 = vrot.slane %v3815_v63, 5  ;;  %v3823_v62 = vrot.slane %v3821_v12, 5  ;;  %v6801_v58 = vrot.slane %v4003_v57, 9  ;;  %v7785_v38 = vld [vmem:[%s9560_s4 + $0x1b0] sm:$0xff]   ;;  %v6996_v11 = vpack.c.bf16 %v3296_v59, %v3296_v59  ;;  %v7767_v8 = vld [vmem:[%s9560_s4 + $0x120] sm:$0xff]   ;;  %v7786_v44 = vld [vmem:[%s9560_s4 + $0x1f8] sm:$0xff]  }
 0x255   :  { %v7752_v35 = vld [vmem:[#allocation2 + $0x38] ss:$8 sps:$4 sm:$0xff]   ;;  %v3710_v24 = vld [vmem:[#allocation2 + $0x3c] sm:$0x1]  ;;  %v9027_v30 = vadd.f32 %v8779_v43, %v8971_v60  ;;  %v9030_v20 = vadd.f32 %v8779_v43, %v3264_v28  ;;  %5927 = vmatprep.mubr.bf16.mxu1 %v6789_v15  ;;  %v3828_v1 = vrot.slane %v3826_v45, 4  ;;  %v3831_v2 = vrot.slane %v3829_v19, 5  ;;  %7478 = vmatpush3.bf16.msra.mxu0 %v7780_v54 }
 0x256   :  { %v3818_v52 = vor.u32 %v3817_v39, %v3814_v7  ;;  %v3835_v9 = vshll.u32 %v3710_v24, 16  ;;  %v4006_v14 = vld [vmem:[#allocation2 + $0x3c] sm:$0x1]  ;;  %6032 = vmatprep.mubr.bf16.mxu0 %v7752_v35  ;;  %v4081_v10 = vrot.slane %v4004_v36, 5  ;;  %v6802_v13 = vrot.slane %v4005_v33, 9  ;;  %7410 = vmatpush3.bf16.msra.mxu1 %v7759_v22  ;;  %v7774_v54 = vld [vmem:[%s9560_s4 + $0x168] sm:$0xff]  }
 0x257   :  { %v4085_v31 = vrot.slane %v4006_v14, 5  ;;  %v3432_v60 = vshrl.u32 %v9000_v47, 16  ;;  %v7753_v43 = vld [vmem:[#allocation2 + $0x20] ss:$8 sps:$4 sm:$0xff]   ;;  %v3832_v0 = vor.u32 %v3831_v2, %v3828_v1  ;;  %v3435_v49 = vshll.u32 %v9000_v47, 16  ;;  %7411 = vmatprep.subr.bf16.mxu1 %v7766_v56  ;;  %7479 = vmatprep.subr.bf16.mxu0 %v7784_v37  ;;  %v7787_v57 = vld [vmem:[%s9560_s4 + $0x1b8] sm:$0xff]  }
 0x258   :  { %v3819_v28 = vrot.slane %v3818_v52, 4  ;;  %v3837_v59 = vrot.slane %v3835_v9, 5  ;;  %v4082_v21 = vsel %vm8034_vm10, %v6801_v58, %v4081_v10  ;;  %v3440_v27 = vshrl.u32 %v6996_v11, 16  ;;  %v3575_v22 = vld [vmem:[#allocation2 + $0x58] sm:$0xf]  ;;  %v7775_v45 = vld [vmem:[%s9560_s4 + $0x128] sm:$0xff]  }
 0x259   :  { %v4086_v5 = vsel %vm8034_vm10, %v6802_v13, %v4085_v31  ;;  %v3434_v29 = vrot.slane %v3432_v60, 7  ;;  %5928 = vmatmul.mubr.bf16.gmra.mrb[72].mxu1 %v7753_v43  ;;  %v3833_v47 = vrot.slane %v3832_v0, 4  ;;  %v3443_v63 = vshll.u32 %v6996_v11, 16  ;;  %v3578_v12 = vld [vmem:[#allocation2 + $0x5c] sm:$0x1]  ;;  %7480 = vmatpush3.bf16.msra.mxu0 %v7785_v38  ;;  %v7783_v9 = vld [vmem:[%s9560_s4 + $0x130] sm:$0xff]  }
 0x25a   :  { %v3824_v32 = vsel %vm8042_vm11, %v3819_v28, %v3823_v62  ;;  %v6814_v3 = vcombine.low %v4082_v21, %v4086_v5  ;;  %v3442_v56 = vrot.slane %v3440_v27, 7  ;;  %v3297_v7 = vmax.f32 %v8911_v23, 0.0  ;;  %7412 = vmatpush3.bf16.msra.mxu1 %v7767_v8  ;;  %7481 = vmatprep.subr.bf16.mxu0 %v7786_v44  ;;  %v3581_v19 = vld [vmem:[#allocation2 + $0x60] sm:$0xf]  ;;  %v7782_v23 = vld [vmem:[%s9560_s4 + $0x170] sm:$0xff]  }
 0x25b   :  { %v3437_v36 = vor.u32 %v3435_v49, %v3434_v29  ;;  %v3438_v26 = vrot.slane %v3434_v29, 4  ;;  %v3838_v33 = vsel %vm8042_vm11, %v3833_v47, %v3837_v59  ;;  %v3298_v37 = vmax.f32 %v8948_v4, 0.0  ;;  %7413 = vmatprep.subr.bf16.mxu1 %v7774_v54  ;;  %v3584_v8 = vld [vmem:[#allocation2 + $0x64] sm:$0x1]  ;;  %v7757_v14 = vld [vmem:[#allocation2 + $0x30] ss:$8 sps:$4 sm:$0xff]  }
 0x25c   :  { %6033 = vmatmul.mubr.bf16.gmra.mrb[92].mxu0 %v6814_v3  ;;  %v3299_v15 = vmax.f32 %v9023_v48, 0.0  ;;  %v3301_v39 = vmax.f32 %v9027_v30, 0.0  ;;  %v6790_v62 = vcombine.low %v3824_v32, %v3838_v33  ;;  %v3445_v58 = vor.u32 %v3443_v63, %v3442_v56  ;;  %v3593_v43 = vld [vmem:[#allocation2 + $0x70] sm:$0xf]  ;;  %v3599_v28 = vld [vmem:[#allocation2 + $0x78] sm:$0xf] }
 0x25d   :  { %v3576_v38 = vsel %vm8000_vm4, %v3437_v36, %v3575_v22  ;;  %v3579_v35 = vsel %vm8005_vm5, %v3438_v26, %v3578_v12  ;;  %v6997_v4 = vpack.c.bf16 %v3297_v7, %v3297_v7  ;;  %v6998_v24 = vpack.c.bf16 %v3298_v37, %v3298_v37  ;;  %7482 = vmatpush3.bf16.msra.mxu0 %v7787_v57  ;;  %v3590_v59 = vld [vmem:[#allocation2 + $0x6c] sm:$0x1]  ;;  %v7790_v29 = vld [vmem:[%s9560_s4 + $0x138] sm:$0xff]   ;;  %v3596_v3 = vld [vmem:[#allocation2 + $0x74] sm:$0x1] }
 0x25e   :  { %3577 = vst [vmem:[#allocation2 + $0x58] sm:$0xf] %v3576_v38  ;;  %3580 = vst [vmem:[#allocation2 + $0x5c] sm:$0x1] %v3579_v35  ;;  %v3446_v11 = vrot.slane %v3442_v56, 4  ;;  %v6999_v48 = vpack.c.bf16 %v3299_v15, %v3299_v15  ;;  %5935 = vmatprep.mubr.bf16.mxu1 %v6790_v62  ;;  %v3582_v30 = vsel %vm8000_vm4, %v3445_v58, %v3581_v19  ;;  %v9069_v52 = vrot.slane %v3849_v53, 5 }
 0x25f   :  { %7414 = vmatpush3.bf16.msra.mxu1 %v7775_v45  ;;  %v3302_v1 = vmax.f32 %v9030_v20, 0.0  ;;  %v9072_v2 = vpack.c.bf16 %v3301_v39, %v3301_v39  ;;  %3583 = vst [vmem:[#allocation2 + $0x60] sm:$0xf] %v3582_v30  ;;  %v9080_v44 = vrot.slane %v3846_v25, 4  ;;  %v3448_v10 = vshrl.u32 %v6997_v4, 16  ;;  %v7789_v53 = vld [vmem:[%s9560_s4 + $0x178] sm:$0xff]  }
 0x260   :  { %v3456_v16 = vshrl.u32 %v6998_v24, 16  ;;  %7415 = vmatprep.subr.bf16.mxu1 %v7782_v23  ;;  %v3587_v20 = vld [vmem:[#allocation2 + $0x68] sm:$0xf]  ;;  %v3451_v13 = vshll.u32 %v6997_v4, 16  ;;  %v3585_v31 = vsel %vm8005_vm5, %v3446_v11, %v3584_v8  ;;  %v3464_v60 = vshrl.u32 %v6999_v48, 16  ;;  %v9097_v63 = vld [vmem:[%s9560_s4 + $0x200] sm:$0xff]  }
 0x261   :  { %5936 = vmatmul.mubr.bf16.gmra.mrb[76].mxu1 %v7757_v14  ;;  %v3450_v0 = vrot.slane %v3448_v10, 7  ;;  %v3459_v55 = vshll.u32 %v6998_v24, 16  ;;  %3586 = vst [vmem:[#allocation2 + $0x64] sm:$0x1] %v3585_v31  ;;  %v3467_v25 = vshll.u32 %v6999_v48, 16  ;;  %v9087_v54 = vpack.c.bf16 %v3302_v1, %v3302_v1 }
 0x262   :  { %v3458_v41 = vrot.slane %v3456_v16, 7  ;;  %v3466_v49 = vrot.slane %v3464_v60, 7  ;;  %v3480_v21 = vshrl.u32 %v9072_v2, 16  ;;  %v3483_v5 = vshll.u32 %v9072_v2, 16  ;;  %v3602_v37 = vld [vmem:[#allocation2 + $0x7c] sm:$0x1] }
 0x263   :  { %7416 = vmatpush3.bf16.msra.mxu1 %v7783_v9  ;;  %v3453_v27 = vor.u32 %v3451_v13, %v3450_v0  ;;  %v3454_v32 = vrot.slane %v3450_v0, 4  ;;  %v4090_v36 = vsel %vm8034_vm10, %v6803_v42, %v4089_v6  ;;  %v3488_v38 = vshrl.u32 %v9087_v54, 16  ;;  %v3611_v60 = vld [vmem:[#allocation2 + $0x88] sm:$0xf] }
 0x264   :  { %v3461_v22 = vor.u32 %v3459_v55, %v3458_v41  ;;  %v3462_v47 = vrot.slane %v3458_v41, 4  ;;  %7417 = vmatprep.subr.bf16.mxu1 %v7789_v53  ;;  %v3469_v56 = vor.u32 %v3467_v25, %v3466_v49  ;;  %v3470_v11 = vrot.slane %v3466_v49, 4 }
 0x265   :  { %v3713_v12 = vld [vmem:[#allocation2 + $0x58] sm:$0xf]  ;;  %v3714_v57 = vld [vmem:[#allocation2 + $0x5c] sm:$0x1]  ;;  %v3588_v33 = vsel %vm8000_vm4, %v3453_v27, %v3587_v20  ;;  %v3591_v51 = vsel %vm8005_vm5, %v3454_v32, %v3590_v59  ;;  %v3491_v8 = vshll.u32 %v9087_v54, 16  ;;  %v3852_v48 = vsel %vm8042_vm11, %v9080_v44, %v9069_v52 }
 0x266   :  { %v3854_v26 = vshrl.u32 %v3713_v12, 16  ;;  %v3857_v7 = vshll.u32 %v3713_v12, 16  ;;  %v3863_v45 = vshll.u32 %v3714_v57, 16  ;;  %v4009_v19 = vld [vmem:[#allocation2 + $0x58] sm:$0xe]  ;;  %v3594_v61 = vsel %vm8000_vm4, %v3461_v22, %v3593_v43 }
 0x267   :  { %v7756_v15 = vld [vmem:[#allocation2 + $0x58] ss:$8 sps:$4 sm:$0xff]   ;;  %v4010_v39 = vld [vmem:[#allocation2 + $0x5c] sm:$0x1]  ;;  %3589 = vst [vmem:[#allocation2 + $0x68] sm:$0xf] %v3588_v33  ;;  %v3600_v42 = vsel %vm8000_vm4, %v3469_v56, %v3599_v28  ;;  %v3597_v6 = vsel %vm8005_vm5, %v3462_v47, %v3596_v3  ;;  %7418 = vmatpush3.bf16.msra.mxu1 %v7790_v29  ;;  %v3603_v31 = vsel %vm8005_vm5, %v3470_v11, %v3602_v37 }
 0x268   :  { %v3856_v23 = vrot.slane %v3854_v26, 4  ;;  %v3859_v62 = vrot.slane %v3857_v7, 5  ;;  %v6804_v58 = vrot.slane %v4009_v19, 9  ;;  %3595 = vst [vmem:[#allocation2 + $0x70] sm:$0xf] %v3594_v61  ;;  %7579 = vmatprep.subr.bf16.mxu1 %v9097_v63  ;;  %6040 = vmatprep.mubr.bf16.mxu0 %v7756_v15  ;;  %v3865_v35 = vrot.slane %v3863_v45, 5 }
 0x269   :  { %3592 = vst [vmem:[#allocation2 + $0x6c] sm:$0x1] %v3591_v51  ;;  %3601 = vst [vmem:[#allocation2 + $0x78] sm:$0xf] %v3600_v42  ;;  %v4093_v4 = vrot.slane %v4010_v39, 5  ;;  %v9128_v55 = vrot.slane %v3480_v21, 7 }
 0x26a   :  { %3598 = vst [vmem:[#allocation2 + $0x74] sm:$0x1] %v3597_v6  ;;  %v3715_v24 = vld [vmem:[#allocation2 + $0x60] sm:$0xf]  ;;  %v3860_v30 = vor.u32 %v3859_v62, %v3856_v23  ;;  %v3716_v1 = vld [vmem:[#allocation2 + $0x64] sm:$0x1] }
 0x26b   :  { %v3868_v9 = vshrl.u32 %v3715_v24, 16  ;;  %v3871_v14 = vshll.u32 %v3715_v24, 16  ;;  %v4011_v10 = vld [vmem:[#allocation2 + $0x60] sm:$0xe]  ;;  %v4094_v16 = vsel %vm8034_vm10, %v6804_v58, %v4093_v4  ;;  %v3877_v53 = vshll.u32 %v3716_v1, 16 }
 0x26c   :  { %v4012_v20 = vld [vmem:[#allocation2 + $0x64] sm:$0x1]  ;;  %v6805_v13 = vrot.slane %v4011_v10, 9  ;;  %v3861_v43 = vrot.slane %v3860_v30, 4  ;;  %v6815_v28 = vcombine.low %v4090_v36, %v4094_v16  ;;  %3604 = vst [vmem:[#allocation2 + $0x7c] sm:$0x1] %v3603_v31  ;;  %v3485_v57 = vor.u32 %v3483_v5, %v9128_v55 }
 0x26d   :  { %v3870_v0 = vrot.slane %v3868_v9, 4  ;;  %v3873_v41 = vrot.slane %v3871_v14, 5  ;;  %v9126_v52 = vrot.slane %v3877_v53, 5  ;;  %v4097_v44 = vrot.slane %v4012_v20, 5  ;;  %v3617_v59 = vld [vmem:[#allocation2 + $0x90] sm:$0xf] }
 0x26e   :  { %v9130_v25 = vrot.slane %v3488_v38, 7  ;;  %v3866_v49 = vsel %vm8042_vm11, %v3861_v43, %v3865_v35  ;;  %6041 = vmatmul.mubr.bf16.gmra.mrb[96].mxu0 %v6815_v28  ;;  %v7765_v54 = vld [vmem:[#allocation2 + $0x50] ss:$8 sps:$4 sm:$0xff]   ;;  %v3717_v29 = vld [vmem:[#allocation2 + $0x68] sm:$0xf]  ;;  %v3612_v15 = vsel %vm8000_vm4, %v3485_v57, %v3611_v60 }
 0x26f   :  { %v3874_v27 = vor.u32 %v3873_v41, %v3870_v0  ;;  %v4013_v22 = vld [vmem:[#allocation2 + $0x68] sm:$0xe]  ;;  %v9134_v32 = vld [vmem:[#allocation2 + $0x80] sm:$0xf]  ;;  %v6791_v47 = vcombine.low %v3852_v48, %v3866_v49  ;;  %v4098_v21 = vsel %vm8034_vm10, %v6805_v13, %v4097_v44  ;;  %v3882_v26 = vshrl.u32 %v3717_v29, 16 }
 0x270   :  { %v7761_v3 = vld [vmem:[#allocation2 + $0x68] ss:$8 sps:$4 sm:$0xff]   ;;  %v3718_v12 = vld [vmem:[#allocation2 + $0x6c] sm:$0x1]  ;;  %v3493_v36 = vor.u32 %v3491_v8, %v9130_v25  ;;  %v3885_v7 = vshll.u32 %v3717_v29, 16  ;;  %v6806_v33 = vrot.slane %v4013_v22, 9 }
 0x271   :  { %v3875_v56 = vrot.slane %v3874_v27, 4  ;;  %v3891_v45 = vshll.u32 %v3718_v12, 16  ;;  %v4014_v19 = vld [vmem:[#allocation2 + $0x6c] sm:$0x1]  ;;  %5943 = vmatprep.mubr.bf16.mxu1 %v6791_v47  ;;  %6048 = vmatprep.mubr.bf16.mxu0 %v7761_v3  ;;  %v3884_v2 = vrot.slane %v3882_v26, 4  ;;  %v3924_v58 = vshrl.u32 %v9134_v32, 16 }
 0x272   :  { %v4101_v37 = vrot.slane %v4014_v19, 5  ;;  %v3618_v39 = vsel %vm8000_vm4, %v3493_v36, %v3617_v59  ;;  %5944 = vmatmul.mubr.bf16.gmra.mrb[80].mxu1 %v7765_v54  ;;  %v3887_v5 = vrot.slane %v3885_v7, 5  ;;  %3613 = vst [vmem:[#allocation2 + $0x88] sm:$0xf] %v3612_v15  ;;  %v7769_v6 = vld [vmem:[#allocation2 + $0x78] ss:$8 sps:$4 sm:$0xff]  }
 0x273   :  { %3619 = vst [vmem:[#allocation2 + $0x90] sm:$0xf] %v3618_v39  ;;  %v3880_v61 = vsel %vm8042_vm11, %v3875_v56, %v9126_v52  ;;  %v3893_v51 = vrot.slane %v3891_v45, 5  ;;  %v3719_v23 = vld [vmem:[#allocation2 + $0x70] sm:$0xf]  ;;  %v3926_v41 = vrot.slane %v3924_v58, 4 }
 0x274   :  { %v4102_v42 = vsel %vm8034_vm10, %v6806_v33, %v4101_v37  ;;  %v3720_v62 = vld [vmem:[#allocation2 + $0x74] sm:$0x1]  ;;  %v3888_v46 = vor.u32 %v3887_v5, %v3884_v2  ;;  %v3721_v35 = vld [vmem:[#allocation2 + $0x78] sm:$0xf]  ;;  %v3722_v4 = vld [vmem:[#allocation2 + $0x7c] sm:$0x1] }
 0x275   :  { %v6816_v38 = vcombine.low %v4098_v21, %v4102_v42  ;;  %v3896_v24 = vshrl.u32 %v3719_v23, 16  ;;  %v3899_v11 = vshll.u32 %v3719_v23, 16  ;;  %v3905_v8 = vshll.u32 %v3720_v62, 16  ;;  %v4015_v9 = vld [vmem:[#allocation2 + $0x70] sm:$0xe] }
 0x276   :  { %v3910_v48 = vshrl.u32 %v3721_v35, 16  ;;  %v3913_v30 = vshll.u32 %v3721_v35, 16  ;;  %v3919_v1 = vshll.u32 %v3722_v4, 16  ;;  %v3889_v14 = vrot.slane %v3888_v46, 4  ;;  %v4016_v53 = vld [vmem:[#allocation2 + $0x74] sm:$0x1] }
 0x277   :  { %6049 = vmatmul.mubr.bf16.gmra.mrb[100].mxu0 %v6816_v38  ;;  %v3898_v10 = vrot.slane %v3896_v24, 4  ;;  %v3901_v16 = vrot.slane %v3899_v11, 5  ;;  %v6807_v20 = vrot.slane %v4015_v9, 9  ;;  %v3614_v13 = vld [vmem:[#allocation2 + $0x8c] sm:$0x1]  ;;  %v3907_v60 = vrot.slane %v3905_v8, 5 }
 0x278   :  { %v3724_v31 = vld [vmem:[#allocation2 + $0x84] sm:$0x1]  ;;  %6056 = vmatprep.mubr.bf16.mxu0 %v7769_v6  ;;  %v3912_v43 = vrot.slane %v3910_v48, 4  ;;  %v3915_v28 = vrot.slane %v3913_v30, 5  ;;  %v4017_v0 = vld [vmem:[#allocation2 + $0x78] sm:$0xe]  ;;  %v3894_v52 = vsel %vm8042_vm11, %v3889_v14, %v3893_v51 }
 0x279   :  { %v7773_v44 = vld [vmem:[#allocation2 + $0x60] ss:$8 sps:$4 sm:$0xff]   ;;  %v3902_v59 = vor.u32 %v3901_v16, %v3898_v10  ;;  %v4018_v49 = vld [vmem:[#allocation2 + $0x7c] sm:$0x1]  ;;  %v4105_v54 = vrot.slane %v4016_v53, 5  ;;  %v6808_v29 = vrot.slane %v4017_v0, 9  ;;  %v6792_v22 = vcombine.low %v3880_v61, %v3894_v52 }
 0x27a   :  { %v4019_v27 = vld [vmem:[#allocation2 + $0x80] sm:$0xe]  ;;  %v3916_v47 = vor.u32 %v3915_v28, %v3912_v43  ;;  %v4109_v3 = vrot.slane %v4018_v49, 5  ;;  %v3486_v12 = vrot.slane %v9128_v55, 4  ;;  %v4020_v21 = vld [vmem:[#allocation2 + $0x84] sm:$0x1] }
 0x27b   :  { %v3903_v57 = vrot.slane %v3902_v59, 4  ;;  %v3921_v36 = vrot.slane %v3919_v1, 5  ;;  %v4106_v56 = vsel %vm8034_vm10, %v6807_v20, %v4105_v54  ;;  %v3927_v26 = vshll.u32 %v9134_v32, 16  ;;  %v4767_v7 = vld [vmem:[#allocation2 + $0x10] sm:$0xf]  ;;  %5951 = vmatprep.mubr.bf16.mxu1 %v6792_v22 }
 0x27c   :  { %v3917_v45 = vrot.slane %v3916_v47, 4  ;;  %v4110_v19 = vsel %vm8034_vm10, %v6808_v29, %v4109_v3  ;;  %v3615_v33 = vsel %vm8005_vm5, %v3486_v12, %v3614_v13  ;;  %v3725_v37 = vld [vmem:[#allocation2 + $0x88] sm:$0xf]  ;;  %v3933_v15 = vshll.u32 %v3724_v31, 16  ;;  %v4768_v55 = vld [vmem:[#allocation2 + $0x14] sm:$0x1]  ;;  %5952 = vmatmul.mubr.bf16.gmra.mrb[84].mxu1 %v7773_v44 }
 0x27d   :  { %v3908_v39 = vsel %vm8042_vm11, %v3903_v57, %v3907_v60  ;;  %v6817_v2 = vcombine.low %v4106_v56, %v4110_v19  ;;  %3616 = vst [vmem:[#allocation2 + $0x8c] sm:$0x1] %v3615_v33  ;;  %v3929_v5 = vrot.slane %v3927_v26, 5  ;;  %v3938_v32 = vshrl.u32 %v3725_v37, 16  ;;  %v4769_v61 = vld [vmem:[#allocation2 + $0x18] sm:$0xf] }
 0x27e   :  { %v3922_v51 = vsel %vm8042_vm11, %v3917_v45, %v3921_v36  ;;  %v7777_v42 = vld [vmem:[#allocation2 + $0x88] ss:$8 sps:$4 sm:$0xff]   ;;  %v3941_v6 = vshll.u32 %v3725_v37, 16  ;;  %v6809_v62 = vrot.slane %v4019_v27, 9  ;;  %v4113_v35 = vrot.slane %v4020_v21, 5 }
 0x27f   :  { %v4021_v23 = vld [vmem:[#allocation2 + $0x88] sm:$0xe]  ;;  %v6793_v58 = vcombine.low %v3908_v39, %v3922_v51  ;;  %6057 = vmatmul.mubr.bf16.gmra.mrb[104].mxu0 %v6817_v2  ;;  %v3930_v46 = vor.u32 %v3929_v5, %v3926_v41  ;;  %v3940_v38 = vrot.slane %v3938_v32, 4  ;;  %v4770_v4 = vld [vmem:[#allocation2 + $0x1c] sm:$0x1]  ;;  %v3935_v24 = vrot.slane %v3933_v15, 5 }
 0x280   :  { %6064 = vmatprep.mubr.bf16.mxu0 %v7777_v42  ;;  %v3943_v11 = vrot.slane %v3941_v6, 5  ;;  %v4800_v8 = vshrl.u32 %v4767_v7, 16  ;;  %v4803_v48 = vshll.u32 %v4767_v7, 16  ;;  %v4527_v30 = vld [vmem:[#allocation2 + $0x8] sm:$0xe]  ;;  %v6810_v9 = vrot.slane %v4021_v23, 9 }
 0x281   :  { %5959 = vmatprep.mubr.bf16.mxu1 %v6793_v58  ;;  %v3931_v1 = vrot.slane %v3930_v46, 4  ;;  %v4809_v14 = vshll.u32 %v4768_v55, 16  ;;  %v4814_v10 = vshrl.u32 %v4769_v61, 16  ;;  %v4528_v16 = vld [vmem:[#allocation2 + $0xc] sm:$0x1]  ;;  %v4817_v60 = vshll.u32 %v4769_v61, 16 }
 0x282   :  { %v4529_v53 = vld [vmem:[#allocation2 + $0x10] sm:$0xe]  ;;  %v3944_v20 = vor.u32 %v3943_v11, %v3940_v38  ;;  %v4802_v13 = vrot.slane %v4800_v8, 4  ;;  %v4805_v31 = vrot.slane %v4803_v48, 5  ;;  %v4530_v43 = vld [vmem:[#allocation2 + $0x14] sm:$0x1]  ;;  %v4114_v41 = vsel %vm8034_vm10, %v6809_v62, %v4113_v35 }
 0x283   :  { %v4771_v28 = vld [vmem:[#allocation2 + $0x20] sm:$0xf]  ;;  %v7781_v0 = vld [vmem:[#allocation2 + $0x70] ss:$8 sps:$4 sm:$0xff]   ;;  %v4811_v52 = vrot.slane %v4809_v14, 5  ;;  %v4816_v44 = vrot.slane %v4814_v10, 4  ;;  %v3936_v54 = vsel %vm8042_vm11, %v3931_v1, %v3935_v24 }
 0x284   :  { %v4823_v59 = vshll.u32 %v4770_v4, 16  ;;  %v3726_v49 = vld [vmem:[#allocation2 + $0x8c] sm:$0x1]  ;;  %v3945_v29 = vrot.slane %v3944_v20, 4  ;;  %v4806_v22 = vor.u32 %v4805_v31, %v4802_v13  ;;  %v4819_v47 = vrot.slane %v4817_v60, 5  ;;  %5960 = vmatmul.mubr.bf16.gmra.mrb[88].mxu1 %v7781_v0 }
 0x285   :  { %v4022_v27 = vld [vmem:[#allocation2 + $0x8c] sm:$0x1]  ;;  %v3947_v3 = vshll.u32 %v3726_v49, 16  ;;  %v6835_v57 = vrot.slane %v4527_v30, 9  ;;  %v4772_v36 = vld [vmem:[#allocation2 + $0x24] sm:$0x1] }
 0x286   :  { %v4117_v12 = vrot.slane %v4022_v27, 5  ;;  %v4825_v21 = vrot.slane %v4823_v59, 5  ;;  %v4807_v56 = vrot.slane %v4806_v22, 4  ;;  %v4820_v26 = vor.u32 %v4819_v47, %v4816_v44  ;;  %v4773_v32 = vld [vmem:[#allocation2 + $0x28] sm:$0xf] }
 0x287   :  { %v4593_v7 = vrot.slane %v4528_v16, 5  ;;  %v6836_v45 = vrot.slane %v4529_v53, 9  ;;  %v3949_v19 = vrot.slane %v3947_v3, 5  ;;  %v4597_v37 = vrot.slane %v4530_v43, 5  ;;  %v4774_v61 = vld [vmem:[#allocation2 + $0x2c] sm:$0x1] }
 0x288   :  { %v4118_v33 = vsel %vm8034_vm10, %v6810_v9, %v4117_v12  ;;  %v4828_v15 = vshrl.u32 %v4771_v28, 16  ;;  %v4812_v39 = vsel %vm8042_vm11, %v4807_v56, %v4811_v52  ;;  %v4821_v2 = vrot.slane %v4820_v26, 4  ;;  %v7788_v42 = vld [vmem:[#allocation2 + $0x80] ss:$8 sps:$4 sm:$0xff]   ;;  %v4232_v24 = vld [vmem:[#allocation2 + $0xc] sm:$0x1] }
 0x289   :  { %v6818_v55 = vcombine.low %v4114_v41, %v4118_v33  ;;  %v4594_v5 = vsel %vm8034_vm10, %v6835_v57, %v4593_v7  ;;  %v3950_v51 = vsel %vm8042_vm11, %v3945_v29, %v3949_v19  ;;  %v4598_v6 = vsel %vm8034_vm10, %v6836_v45, %v4597_v37  ;;  %v4231_v58 = vld [vmem:[#allocation2 + $0x8] sm:$0xf]  ;;  %v4233_v11 = vld [vmem:[#allocation2 + $0x10] sm:$0xf]  ;;  %v4234_v9 = vld [vmem:[#allocation2 + $0x14] sm:$0x1] }
 0x28a   :  { %v4830_v23 = vrot.slane %v4828_v15, 4  ;;  %v4831_v62 = vshll.u32 %v4771_v28, 16  ;;  %v6794_v46 = vcombine.low %v3936_v54, %v3950_v51  ;;  %v4826_v38 = vsel %vm8042_vm11, %v4821_v2, %v4825_v21  ;;  %v4531_v14 = vld [vmem:[#allocation2 + $0x18] sm:$0xe]  ;;  %v4532_v13 = vld [vmem:[#allocation2 + $0x1c] sm:$0x1] }
 0x28b   :  { %6065 = vmatmul.mubr.bf16.gmra.mrb[108].mxu0 %v6818_v55  ;;  %v6851_v35 = vcombine.low %v4594_v5, %v4598_v6  ;;  %v4837_v4 = vshll.u32 %v4772_v36, 16  ;;  %v6867_v8 = vcombine.low %v4812_v39, %v4826_v38  ;;  %v4842_v30 = vshrl.u32 %v4773_v32, 16  ;;  %v4533_v0 = vld [vmem:[#allocation2 + $0x20] sm:$0xe]  ;;  %v7791_v41 = vld [vmem:[#allocation2 + $0x10] ss:$8 sps:$4 sm:$0xff]  }
 0x28c   :  { %v4833_v48 = vrot.slane %v4831_v62, 5  ;;  %v4845_v1 = vshll.u32 %v4773_v32, 16  ;;  %5967 = vmatprep.mubr.bf16.mxu1 %v6794_v46  ;;  %v4851_v16 = vshll.u32 %v4774_v61, 16  ;;  %v4264_v53 = vshrl.u32 %v4231_v58, 16  ;;  %v4534_v54 = vld [vmem:[#allocation2 + $0x24] sm:$0x1] }
 0x28d   :  { %v4839_v10 = vrot.slane %v4837_v4, 5  ;;  %v4267_v20 = vshll.u32 %v4231_v58, 16  ;;  %6202 = vmatprep.mubr.bf16.mxu0 %v6867_v8  ;;  %5968 = vmatmul.mubr.bf16.gmra.mrb[92].mxu1 %v7788_v42  ;;  %v4844_v60 = vrot.slane %v4842_v30, 4  ;;  %v4273_v28 = vshll.u32 %v4232_v24, 16  ;;  %v4775_v3 = vld [vmem:[#allocation2 + $0x30] sm:$0xf] }
 0x28e   :  { %v4834_v31 = vor.u32 %v4833_v48, %v4830_v23  ;;  %v4847_v43 = vrot.slane %v4845_v1, 5  ;;  %6105 = vmatprep.mubr.bf16.mxu1 %v6851_v35  ;;  %v4853_v52 = vrot.slane %v4851_v16, 5  ;;  %v4266_v44 = vrot.slane %v4264_v53, 4  ;;  %v4776_v56 = vld [vmem:[#allocation2 + $0x34] sm:$0x1] }
 0x28f   :  { %v4269_v59 = vrot.slane %v4267_v20, 5  ;;  %v4278_v49 = vshrl.u32 %v4233_v11, 16  ;;  %v4275_v22 = vrot.slane %v4273_v28, 5  ;;  %v4281_v47 = vshll.u32 %v4233_v11, 16  ;;  %v4777_v33 = vld [vmem:[#allocation2 + $0x38] sm:$0xf] }
 0x290   :  { %v4835_v29 = vrot.slane %v4834_v31, 4  ;;  %v4848_v27 = vor.u32 %v4847_v43, %v4844_v60  ;;  %v4287_v57 = vshll.u32 %v4234_v9, 16  ;;  %v6837_v36 = vrot.slane %v4531_v14, 9  ;;  %v4778_v61 = vld [vmem:[#allocation2 + $0x3c] sm:$0x1] }
 0x291   :  { %v4270_v12 = vor.u32 %v4269_v59, %v4266_v44  ;;  %v4280_v21 = vrot.slane %v4278_v49, 4  ;;  %v4283_v45 = vrot.slane %v4281_v47, 5  ;;  %v4601_v19 = vrot.slane %v4532_v13, 5  ;;  %v4235_v58 = vld [vmem:[#allocation2 + $0x18] sm:$0xf]  ;;  %v7794_v13 = vld [vmem:[%s9560_s4 + $0x208] sm:$0xff]  }
 0x292   :  { %v4840_v26 = vsel %vm8042_vm11, %v4835_v29, %v4839_v10  ;;  %v4849_v7 = vrot.slane %v4848_v27, 4  ;;  %v4289_v15 = vrot.slane %v4287_v57, 5  ;;  %v6838_v55 = vrot.slane %v4533_v0, 9  ;;  %v4236_v24 = vld [vmem:[#allocation2 + $0x1c] sm:$0x1] }
 0x293   :  { %6203 = vmatmul.mubr.bf16.vlgmr.msra.gmra.mrb[112].mxu0 %v7791_v41  ;;  %v4271_v37 = vrot.slane %v4270_v12, 4  ;;  %v4605_v39 = vrot.slane %v4534_v54, 5  ;;  %v4284_v5 = vor.u32 %v4283_v45, %v4280_v21  ;;  %v4602_v32 = vsel %vm8034_vm10, %v6837_v36, %v4601_v19  ;;  %v7793_v11 = vld [vmem:[#allocation2 + $0x20] ss:$8 sps:$4 sm:$0xff]   ;;  %v4238_v16 = vld [vmem:[#allocation2 + $0x24] sm:$0x1] }
 0x294   :  { %v4854_v2 = vsel %vm8042_vm11, %v4849_v7, %v4853_v52  ;;  %v4856_v51 = vshrl.u32 %v4775_v3, 16  ;;  %v4859_v62 = vshll.u32 %v4775_v3, 16  ;;  %v4865_v4 = vshll.u32 %v4776_v56, 16  ;;  %v4237_v9 = vld [vmem:[#allocation2 + $0x20] sm:$0xf] }
 0x295   :  { %v6868_v42 = vcombine.low %v4840_v26, %v4854_v2  ;;  %v4276_v6 = vsel %vm8042_vm11, %v4271_v37, %v4275_v22  ;;  %v4606_v23 = vsel %vm8034_vm10, %v6838_v55, %v4605_v39  ;;  %v4285_v46 = vrot.slane %v4284_v5, 4  ;;  %v4535_v0 = vld [vmem:[#allocation2 + $0x28] sm:$0xe]  ;;  %v4536_v41 = vld [vmem:[#allocation2 + $0x2c] sm:$0x1] }
 0x296   :  { %v6852_v38 = vcombine.low %v4602_v32, %v4606_v23  ;;  %v4858_v35 = vrot.slane %v4856_v51, 4  ;;  %v4861_v8 = vrot.slane %v4859_v62, 5  ;;  %v4870_v48 = vshrl.u32 %v4777_v33, 16  ;;  %v4537_v54 = vld [vmem:[#allocation2 + $0x30] sm:$0xe] }
 0x297   :  { %6210 = vmatprep.mubr.bf16.mxu0 %v6868_v42  ;;  %v4873_v30 = vshll.u32 %v4777_v33, 16  ;;  %v4879_v1 = vshll.u32 %v4778_v61, 16  ;;  %v4290_v14 = vsel %vm8042_vm11, %v4285_v46, %v4289_v15  ;;  %v4867_v10 = vrot.slane %v4865_v4, 5  ;;  %v4538_v57 = vld [vmem:[#allocation2 + $0x34] sm:$0x1] }
 0x298   :  { %v4292_v53 = vshrl.u32 %v4235_v58, 16  ;;  %v4295_v20 = vshll.u32 %v4235_v58, 16  ;;  %v6827_v31 = vcombine.low %v4276_v6, %v4290_v14  ;;  %v4862_v60 = vor.u32 %v4861_v8, %v4858_v35  ;;  %v4779_v19 = vld [vmem:[#allocation2 + $0x40] sm:$0xf]  ;;  %v7796_v33 = vld [vmem:[%s9560_s4 + $0x210] sm:$0xff]   ;;  %v7798_v35 = vld [vmem:[%s9560_s4 + $0x218] sm:$0xff]  }
 0x299   :  { %v4872_v43 = vrot.slane %v4870_v48, 4  ;;  %v4875_v28 = vrot.slane %v4873_v30, 5  ;;  %v4881_v52 = vrot.slane %v4879_v1, 5  ;;  %v4301_v49 = vshll.u32 %v4236_v24, 16  ;;  %v3572_v39 = vld [vmem:[#allocation2 + $0x44] sm:$0x1] }
 0x29a   :  { %v4294_v44 = vrot.slane %v4292_v53, 4  ;;  %v4297_v59 = vrot.slane %v4295_v20, 5  ;;  %6106 = vmatmul.mubr.bf16.vlgmr.msra.gmra.mrb[96].mxu1 %v6827_v31  ;;  %v4863_v29 = vrot.slane %v4862_v60, 4  ;;  %v4306_v22 = vshrl.u32 %v4237_v9, 16  ;;  %v4781_v51 = vld [vmem:[#allocation2 + $0x48] sm:$0xf] }
 0x29b   :  { %6211 = vmatmul.mubr.bf16.gmra.mrb[116].mxu0 %v7793_v11  ;;  %v4876_v27 = vor.u32 %v4875_v28, %v4872_v43  ;;  %v4309_v47 = vshll.u32 %v4237_v9, 16  ;;  %6113 = vmatprep.mubr.bf16.mxu1 %v6852_v38  ;;  %v4303_v12 = vrot.slane %v4301_v49, 5  ;;  %v4315_v21 = vshll.u32 %v4238_v16, 16  ;;  %v4782_v42 = vld [vmem:[#allocation2 + $0x4c] sm:$0x1] }
 0x29c   :  { %7580 = vmatpush3.bf16.msra.mxu1 %v9097_v63  ;;  %v4298_v3 = vor.u32 %v4297_v59, %v4294_v44  ;;  %v6839_v36 = vrot.slane %v4535_v0, 9  ;;  %v4868_v56 = vsel %vm8042_vm11, %v4863_v29, %v4867_v10  ;;  %v4308_v7 = vrot.slane %v4306_v22, 4  ;;  %v7795_v58 = vld [vmem:[#allocation2 + $0x30] ss:$8 sps:$4 sm:$0xff]   ;;  %v4239_v38 = vld [vmem:[#allocation2 + $0x28] sm:$0xf] }
 0x29d   :  { %v4877_v26 = vrot.slane %v4876_v27, 4  ;;  %v4311_v45 = vrot.slane %v4309_v47, 5  ;;  %7581 = vmatprep.subr.bf16.mxu1 %v7794_v13  ;;  %v4317_v15 = vrot.slane %v4315_v21, 5  ;;  %v4609_v63 = vrot.slane %v4536_v41, 5  ;;  %v4240_v8 = vld [vmem:[#allocation2 + $0x2c] sm:$0x1] }
 0x29e   :  { %v4299_v37 = vrot.slane %v4298_v3, 4  ;;  %v6840_v55 = vrot.slane %v4537_v54, 9  ;;  %v4613_v32 = vrot.slane %v4538_v57, 5  ;;  %v3430_v61 = vrot.slane %v8929_v18, 4  ;;  %v4241_v48 = vld [vmem:[#allocation2 + $0x30] sm:$0xf] }
 0x29f   :  { %v4882_v2 = vsel %vm8042_vm11, %v4877_v26, %v4881_v52  ;;  %v4312_v5 = vor.u32 %v4311_v45, %v4308_v7  ;;  %v4610_v62 = vsel %vm8034_vm10, %v6839_v36, %v4609_v63  ;;  %v4884_v46 = vshrl.u32 %v4779_v19, 16  ;;  %v4242_v10 = vld [vmem:[#allocation2 + $0x34] sm:$0x1]  ;;  %v4539_v31 = vld [vmem:[#allocation2 + $0x38] sm:$0xe]  ;;  %v7800_v54 = vld [vmem:[%s9560_s4 + $0x220] sm:$0xff]  }
 0x2a0   :  { %v6869_v6 = vcombine.low %v4868_v56, %v4882_v2  ;;  %v4304_v23 = vsel %vm8042_vm11, %v4299_v37, %v4303_v12  ;;  %7582 = vmatpush3.bf16.msra.mxu1 %v7794_v13  ;;  %v4614_v18 = vsel %vm8034_vm10, %v6840_v55, %v4613_v32  ;;  %v3573_v24 = vsel %vm8005_vm5, %v3430_v61, %v3572_v39  ;;  %v4540_v41 = vld [vmem:[#allocation2 + $0x3c] sm:$0x1]  ;;  %v4541_v57 = vld [vmem:[#allocation2 + $0x40] sm:$0xe]  ;;  %v4784_v61 = vld [vmem:[#allocation2 + $0x64] sm:$0x1] }
 0x2a1   :  { %v4313_v4 = vrot.slane %v4312_v5, 4  ;;  %v4887_v11 = vshll.u32 %v4779_v19, 16  ;;  %7583 = vmatprep.subr.bf16.mxu1 %v7796_v33  ;;  %v6853_v30 = vcombine.low %v4610_v62, %v4614_v18  ;;  %3574 = vst [vmem:[#allocation2 + $0x44] sm:$0x1] %v3573_v24  ;;  %v4886_v1 = vrot.slane %v4884_v46, 4 }
 0x2a2   :  { %6218 = vmatprep.mubr.bf16.mxu0 %v6869_v6  ;;  %v4898_v9 = vshrl.u32 %v4781_v51, 16  ;;  %v4901_v14 = vshll.u32 %v4781_v51, 16  ;;  %v4907_v20 = vshll.u32 %v4782_v42, 16  ;;  %v4320_v13 = vshrl.u32 %v4239_v38, 16  ;;  %v4783_v19 = vld [vmem:[#allocation2 + $0x60] sm:$0xf] }
 0x2a3   :  { %v4318_v16 = vsel %vm8042_vm11, %v4313_v4, %v4317_v15  ;;  %6219 = vmatmul.mubr.bf16.gmra.mrb[120].mxu0 %v7795_v58  ;;  %v4889_v53 = vrot.slane %v4887_v11, 5  ;;  %v4323_v0 = vshll.u32 %v4239_v38, 16  ;;  %v4329_v49 = vshll.u32 %v4240_v8, 16  ;;  %v4785_v51 = vld [vmem:[#allocation2 + $0x68] sm:$0xf] }
 0x2a4   :  { %v6828_v60 = vcombine.low %v4304_v23, %v4318_v16  ;;  %v4900_v43 = vrot.slane %v4898_v9, 4  ;;  %v4903_v28 = vrot.slane %v4901_v14, 5  ;;  %7584 = vmatpush3.bf16.msra.mxu1 %v7796_v33  ;;  %v4909_v44 = vrot.slane %v4907_v20, 5  ;;  %v7802_v33 = vld [vmem:[%s9560_s4 + $0x228] sm:$0xff]   ;;  %v4245_v16 = vld [vmem:[#allocation2 + $0x40] sm:$0xf] }
 0x2a5   :  { %v4890_v52 = vor.u32 %v4889_v53, %v4886_v1  ;;  %v4322_v59 = vrot.slane %v4320_v13, 4  ;;  %7585 = vmatprep.subr.bf16.mxu1 %v7798_v35  ;;  %v4325_v27 = vrot.slane %v4323_v0, 5  ;;  %v4334_v22 = vshrl.u32 %v4241_v48, 16  ;;  %v7804_v53 = vld [vmem:[%s9560_s4 + $0x230] sm:$0xff]  }
 0x2a6   :  { %6114 = vmatmul.mubr.bf16.gmra.mrb[100].mxu1 %v6828_v60  ;;  %v4904_v29 = vor.u32 %v4903_v28, %v4900_v43  ;;  %v4337_v47 = vshll.u32 %v4241_v48, 16  ;;  %v4331_v12 = vrot.slane %v4329_v49, 5  ;;  %v4343_v21 = vshll.u32 %v4242_v10, 16  ;;  %v4243_v48 = vld [vmem:[#allocation2 + $0x38] sm:$0xf] }
 0x2a7   :  { %6121 = vmatprep.mubr.bf16.mxu1 %v6853_v30  ;;  %v4891_v3 = vrot.slane %v4890_v52, 4  ;;  %v6841_v36 = vrot.slane %v4539_v31, 9  ;;  %v4326_v26 = vor.u32 %v4325_v27, %v4322_v59  ;;  %v4336_v7 = vrot.slane %v4334_v22, 4  ;;  %v4244_v10 = vld [vmem:[#allocation2 + $0x3c] sm:$0x1] }
 0x2a8   :  { %v4905_v56 = vrot.slane %v4904_v29, 4  ;;  %v4339_v45 = vrot.slane %v4337_v47, 5  ;;  %7586 = vmatpush3.bf16.msra.mxu1 %v7798_v35  ;;  %v4780_v37 = vld [vmem:[#allocation2 + $0x44] sm:$0x1]  ;;  %v4345_v15 = vrot.slane %v4343_v21, 5  ;;  %v4617_v55 = vrot.slane %v4540_v41, 5 }
 0x2a9   :  { %v4542_v63 = vld [vmem:[#allocation2 + $0x44] sm:$0x1]  ;;  %7587 = vmatprep.subr.bf16.mxu1 %v7800_v54  ;;  %v4893_v39 = vshll.u32 %v4780_v37, 16  ;;  %v4327_v5 = vrot.slane %v4326_v26, 4  ;;  %v6842_v6 = vrot.slane %v4541_v57, 9  ;;  %v4912_v62 = vshrl.u32 %v4783_v19, 16 }
 0x2aa   :  { %v4910_v2 = vsel %vm8042_vm11, %v4905_v56, %v4909_v44  ;;  %v4340_v32 = vor.u32 %v4339_v45, %v4336_v7  ;;  %v4618_v42 = vsel %vm8034_vm10, %v6841_v36, %v4617_v55  ;;  %v4621_v23 = vrot.slane %v4542_v63, 5  ;;  %v4786_v35 = vld [vmem:[#allocation2 + $0x6c] sm:$0x1]  ;;  %v7797_v31 = vld [vmem:[#allocation2 + $0x40] ss:$8 sps:$4 sm:$0xff]  }
 0x2ab   :  { %v4895_v58 = vrot.slane %v4893_v39, 5  ;;  %v4332_v46 = vsel %vm8042_vm11, %v4327_v5, %v4331_v12  ;;  %v4915_v4 = vshll.u32 %v4783_v19, 16  ;;  %v4914_v24 = vrot.slane %v4912_v62, 4  ;;  %v4543_v28 = vld [vmem:[#allocation2 + $0x58] sm:$0xe] }
 0x2ac   :  { %v4341_v38 = vrot.slane %v4340_v32, 4  ;;  %7588 = vmatpush3.bf16.msra.mxu1 %v7800_v54  ;;  %v4622_v18 = vsel %vm8034_vm10, %v6842_v6, %v4621_v23  ;;  %v4921_v11 = vshll.u32 %v4784_v61, 16  ;;  %v4926_v8 = vshrl.u32 %v4785_v51, 16  ;;  %v4544_v59 = vld [vmem:[#allocation2 + $0x5c] sm:$0x1] }
 0x2ad   :  { %7589 = vmatprep.subr.bf16.mxu1 %v7802_v33  ;;  %v4896_v30 = vsel %vm8042_vm11, %v4891_v3, %v4895_v58  ;;  %v6854_v9 = vcombine.low %v4618_v42, %v4622_v18  ;;  %v4917_v14 = vrot.slane %v4915_v4, 5  ;;  %v4929_v41 = vshll.u32 %v4785_v51, 16  ;;  %v4545_v49 = vld [vmem:[#allocation2 + $0x60] sm:$0xe]  ;;  %v7806_v54 = vld [vmem:[%s9560_s4 + $0x238] sm:$0xff]  }
 0x2ae   :  { %v4346_v1 = vsel %vm8042_vm11, %v4341_v38, %v4345_v15  ;;  %v6870_v20 = vcombine.low %v4896_v30, %v4910_v2  ;;  %v4923_v60 = vrot.slane %v4921_v11, 5  ;;  %v4928_v43 = vrot.slane %v4926_v8, 4  ;;  %v4246_v29 = vld [vmem:[#allocation2 + $0x44] sm:$0x1]  ;;  %v4787_v26 = vld [vmem:[#allocation2 + $0x70] sm:$0xf] }
 0x2af   :  { %v6829_v13 = vcombine.low %v4332_v46, %v4346_v1  ;;  %v4918_v0 = vor.u32 %v4917_v14, %v4914_v24  ;;  %v4935_v52 = vshll.u32 %v4786_v35, 16  ;;  %v4348_v44 = vshrl.u32 %v4243_v48, 16  ;;  %v4546_v12 = vld [vmem:[#allocation2 + $0x64] sm:$0x1]  ;;  %v4788_v6 = vld [vmem:[#allocation2 + $0x74] sm:$0x1] }
 0x2b0   :  { %7590 = vmatpush3.bf16.msra.mxu1 %v7802_v33  ;;  %6226 = vmatprep.mubr.bf16.mxu0 %v6870_v20  ;;  %v4351_v27 = vshll.u32 %v4243_v48, 16  ;;  %v4357_v22 = vshll.u32 %v4244_v10, 16  ;;  %v4362_v47 = vshrl.u32 %v4245_v16, 16  ;;  %v4365_v3 = vshll.u32 %v4245_v16, 16  ;;  %v4789_v38 = vld [vmem:[#allocation2 + $0x78] sm:$0xf] }
 0x2b1   :  { %6122 = vmatmul.mubr.bf16.gmra.mrb[104].mxu1 %v6829_v13  ;;  %6227 = vmatmul.mubr.bf16.gmra.mrb[124].mxu0 %v7797_v31  ;;  %v4919_v21 = vrot.slane %v4918_v0, 4  ;;  %v4931_v57 = vrot.slane %v4929_v41, 5  ;;  %v4937_v36 = vrot.slane %v4935_v52, 5  ;;  %v4350_v56 = vrot.slane %v4348_v44, 4  ;;  %v7799_v24 = vld [vmem:[#allocation2 + $0x60] ss:$8 sps:$4 sm:$0xff]  }
 0x2b2   :  { %6129 = vmatprep.mubr.bf16.mxu1 %v6854_v9  ;;  %v4353_v7 = vrot.slane %v4351_v27, 5  ;;  %v4359_v45 = vrot.slane %v4357_v22, 5  ;;  %v4364_v19 = vrot.slane %v4362_v47, 4  ;;  %v4367_v33 = vrot.slane %v4365_v3, 5  ;;  %7591 = vmatprep.subr.bf16.mxu1 %v7804_v53  ;;  %v4790_v11 = vld [vmem:[#allocation2 + $0x7c] sm:$0x1] }
 0x2b3   :  { %v4924_v37 = vsel %vm8042_vm11, %v4919_v21, %v4923_v60  ;;  %v4932_v15 = vor.u32 %v4931_v57, %v4928_v43  ;;  %v4371_v63 = vshll.u32 %v4246_v29, 16  ;;  %v6843_v55 = vrot.slane %v4543_v28, 9  ;;  %v4247_v48 = vld [vmem:[#allocation2 + $0x58] sm:$0xf]  ;;  %v4248_v10 = vld [vmem:[#allocation2 + $0x5c] sm:$0x1] }
 0x2b4   :  { %7592 = vmatpush3.bf16.msra.mxu1 %v7804_v53  ;;  %v4354_v39 = vor.u32 %v4353_v7, %v4350_v56  ;;  %v4368_v2 = vor.u32 %v4367_v33, %v4364_v19  ;;  %v4625_v5 = vrot.slane %v4544_v59, 5  ;;  %v6844_v32 = vrot.slane %v4545_v49, 9  ;;  %v4249_v16 = vld [vmem:[#allocation2 + $0x60] sm:$0xf]  ;;  %v4250_v60 = vld [vmem:[#allocation2 + $0x64] sm:$0x1] }
 0x2b5   :  { %7593 = vmatprep.subr.bf16.mxu1 %v7806_v54  ;;  %v4933_v61 = vrot.slane %v4932_v15, 4  ;;  %v4373_v51 = vrot.slane %v4371_v63, 5  ;;  %v4629_v42 = vrot.slane %v4546_v12, 5  ;;  %v4940_v23 = vshrl.u32 %v4787_v26, 16  ;;  %v4547_v43 = vld [vmem:[#allocation2 + $0x68] sm:$0xe] }
 0x2b6   :  { %v4355_v62 = vrot.slane %v4354_v39, 4  ;;  %v4369_v58 = vrot.slane %v4368_v2, 4  ;;  %v4626_v46 = vsel %vm8034_vm10, %v6843_v55, %v4625_v5  ;;  %v4943_v35 = vshll.u32 %v4787_v26, 16  ;;  %v4548_v44 = vld [vmem:[#allocation2 + $0x6c] sm:$0x1] }
 0x2b7   :  { %v4938_v4 = vsel %vm8042_vm11, %v4933_v61, %v4937_v36  ;;  %v4630_v18 = vsel %vm8034_vm10, %v6844_v32, %v4629_v42  ;;  %v4942_v8 = vrot.slane %v4940_v23, 4  ;;  %v4949_v14 = vshll.u32 %v4788_v6, 16  ;;  %v4549_v59 = vld [vmem:[#allocation2 + $0x70] sm:$0xe]  ;;  %v4550_v22 = vld [vmem:[#allocation2 + $0x74] sm:$0x1] }
 0x2b8   :  { %7594 = vmatpush3.bf16.msra.mxu1 %v7806_v54  ;;  %v6871_v30 = vcombine.low %v4924_v37, %v4938_v4  ;;  %v4360_v1 = vsel %vm8042_vm11, %v4355_v62, %v4359_v45  ;;  %v4374_v9 = vsel %vm8042_vm11, %v4369_v58, %v4373_v51  ;;  %v6855_v20 = vcombine.low %v4626_v46, %v4630_v18  ;;  %v4791_v37 = vld [vmem:[#allocation2 + $0x80] sm:$0xf]  ;;  %v4792_v51 = vld [vmem:[#allocation2 + $0x84] sm:$0x1]  ;;  %v4793_v23 = vld [vmem:[#allocation2 + $0x88] sm:$0xf] }
 0x2b9   :  { %v6830_v53 = vcombine.low %v4360_v1, %v4374_v9  ;;  %v4945_v13 = vrot.slane %v4943_v35, 5  ;;  %v4954_v31 = vshrl.u32 %v4789_v38, 16  ;;  %v4957_v28 = vshll.u32 %v4789_v38, 16  ;;  %v7801_v18 = vld [vmem:[#allocation2 + $0x70] ss:$8 sps:$4 sm:$0xff]  }
 0x2ba   :  { %6234 = vmatprep.mubr.bf16.mxu0 %v6871_v30  ;;  %v4963_v0 = vshll.u32 %v4790_v11, 16  ;;  %v4376_v41 = vshrl.u32 %v4247_v48, 16  ;;  %v4379_v52 = vshll.u32 %v4247_v48, 16  ;;  %v4385_v29 = vshll.u32 %v4248_v10, 16  ;;  %v4251_v11 = vld [vmem:[#allocation2 + $0x68] sm:$0xf] }
 0x2bb   :  { %6130 = vmatmul.mubr.bf16.gmra.mrb[108].mxu1 %v6830_v53  ;;  %6235 = vmatmul.mubr.bf16.gmra.mrb[128].mxu0 %v7799_v24  ;;  %v4946_v49 = vor.u32 %v4945_v13, %v4942_v8  ;;  %v4956_v54 = vrot.slane %v4954_v31, 4  ;;  %v4390_v27 = vshrl.u32 %v4249_v16, 16  ;;  %v4951_v47 = vrot.slane %v4949_v14, 5  ;;  %v4794_v24 = vld [vmem:[#allocation2 + $0x8c] sm:$0x1] }
 0x2bc   :  { %6137 = vmatprep.mubr.bf16.mxu1 %v6855_v20  ;;  %v4959_v3 = vrot.slane %v4957_v28, 5  ;;  %v4378_v12 = vrot.slane %v4376_v41, 4  ;;  %v4381_v21 = vrot.slane %v4379_v52, 5  ;;  %v4965_v36 = vrot.slane %v4963_v0, 5  ;;  %v4252_v9 = vld [vmem:[#allocation2 + $0x6c] sm:$0x1] }
 0x2bd   :  { %v4947_v57 = vrot.slane %v4946_v49, 4  ;;  %v4392_v56 = vrot.slane %v4390_v27, 4  ;;  %v4393_v26 = vshll.u32 %v4249_v16, 16  ;;  %v4399_v19 = vshll.u32 %v4250_v60, 16  ;;  %v4253_v20 = vld [vmem:[#allocation2 + $0x70] sm:$0xf] }
 0x2be   :  { %v4960_v7 = vor.u32 %v4959_v3, %v4956_v54  ;;  %v4382_v45 = vor.u32 %v4381_v21, %v4378_v12  ;;  %v6845_v33 = vrot.slane %v4547_v43, 9  ;;  %v4387_v15 = vrot.slane %v4385_v29, 5  ;;  %v4254_v60 = vld [vmem:[#allocation2 + $0x74] sm:$0x1] }
 0x2bf   :  { %v4395_v63 = vrot.slane %v4393_v26, 5  ;;  %v4633_v55 = vrot.slane %v4548_v44, 5  ;;  %v6846_v39 = vrot.slane %v4549_v59, 9  ;;  %v4952_v2 = vsel %vm8042_vm11, %v4947_v57, %v4951_v47  ;;  %v4551_v59 = vld [vmem:[#allocation2 + $0x78] sm:$0xe] }
 0x2c0   :  { %v4961_v5 = vrot.slane %v4960_v7, 4  ;;  %v4383_v32 = vrot.slane %v4382_v45, 4  ;;  %v4637_v61 = vrot.slane %v4550_v22, 5  ;;  %v4968_v62 = vshrl.u32 %v4791_v37, 16  ;;  %v4552_v22 = vld [vmem:[#allocation2 + $0x7c] sm:$0x1] }
 0x2c1   :  { %v4396_v42 = vor.u32 %v4395_v63, %v4392_v56  ;;  %v4634_v6 = vsel %vm8034_vm10, %v6845_v33, %v4633_v55  ;;  %v4971_v58 = vshll.u32 %v4791_v37, 16  ;;  %v4401_v35 = vrot.slane %v4399_v19, 5  ;;  %v4553_v57 = vld [vmem:[#allocation2 + $0x80] sm:$0xe]  ;;  %v4554_v7 = vld [vmem:[#allocation2 + $0x84] sm:$0x1] }
 0x2c2   :  { %v4966_v46 = vsel %vm8042_vm11, %v4961_v5, %v4965_v36  ;;  %v4388_v38 = vsel %vm8042_vm11, %v4383_v32, %v4387_v15  ;;  %v4638_v4 = vsel %vm8034_vm10, %v6846_v39, %v4637_v61  ;;  %v4970_v30 = vrot.slane %v4968_v62, 4  ;;  %v4795_v63 = vld [vmem:[#allocation2 + $0x90] sm:$0xf]  ;;  %v3620_v32 = vld [vmem:[#allocation2 + $0x94] sm:$0x1] }
 0x2c3   :  { %v6872_v8 = vcombine.low %v4952_v2, %v4966_v46  ;;  %v4397_v48 = vrot.slane %v4396_v42, 4  ;;  %v4977_v1 = vshll.u32 %v4792_v51, 16  ;;  %v6856_v14 = vcombine.low %v4634_v6, %v4638_v4  ;;  %v4255_v4 = vld [vmem:[#allocation2 + $0x78] sm:$0xf] }
 0x2c4   :  { %v4973_v10 = vrot.slane %v4971_v58, 5  ;;  %v4982_v16 = vshrl.u32 %v4793_v23, 16  ;;  %v4985_v53 = vshll.u32 %v4793_v23, 16  ;;  %v4991_v31 = vshll.u32 %v4794_v24, 16  ;;  %v4797_v23 = vld [vmem:[#allocation2 + $0x98] sm:$0xf] }
 0x2c5   :  { %6242 = vmatprep.mubr.bf16.mxu0 %v6872_v8  ;;  %v4402_v13 = vsel %vm8042_vm11, %v4397_v48, %v4401_v35  ;;  %v4404_v43 = vshrl.u32 %v4251_v11, 16  ;;  %v4407_v28 = vshll.u32 %v4251_v11, 16  ;;  %v4979_v49 = vrot.slane %v4977_v1, 5  ;;  %v7803_v11 = vld [vmem:[#allocation2 + $0x80] ss:$8 sps:$4 sm:$0xff]  }
 0x2c6   :  { %v6831_v0 = vcombine.low %v4388_v38, %v4402_v13  ;;  %6243 = vmatmul.mubr.bf16.gmra.mrb[132].mxu0 %v7801_v18  ;;  %v4974_v41 = vor.u32 %v4973_v10, %v4970_v30  ;;  %v4984_v52 = vrot.slane %v4982_v16, 4  ;;  %v4987_v44 = vrot.slane %v4985_v53, 5  ;;  %v4798_v38 = vld [vmem:[#allocation2 + $0x9c] sm:$0x1] }
 0x2c7   :  { %v4406_v54 = vrot.slane %v4404_v43, 4  ;;  %v4409_v29 = vrot.slane %v4407_v28, 5  ;;  %v4413_v27 = vshll.u32 %v4252_v9, 16  ;;  %v4418_v12 = vshrl.u32 %v4253_v20, 16  ;;  %v4258_v43 = vld [vmem:[#allocation2 + $0x84] sm:$0x1] }
 0x2c8   :  { %6138 = vmatmul.mubr.bf16.gmra.mrb[112].mxu1 %v6831_v0  ;;  %v4975_v47 = vrot.slane %v4974_v41, 4  ;;  %v4988_v3 = vor.u32 %v4987_v44, %v4984_v52  ;;  %v4421_v21 = vshll.u32 %v4253_v20, 16  ;;  %v4993_v36 = vrot.slane %v4991_v31, 5  ;;  %v4257_v20 = vld [vmem:[#allocation2 + $0x80] sm:$0xf] }
 0x2c9   :  { %6145 = vmatprep.mubr.bf16.mxu1 %v6856_v14  ;;  %v4410_v56 = vor.u32 %v4409_v29, %v4406_v54  ;;  %v4427_v26 = vshll.u32 %v4254_v60, 16  ;;  %v6847_v45 = vrot.slane %v4551_v59, 9  ;;  %v4420_v37 = vrot.slane %v4418_v12, 4  ;;  %v4256_v14 = vld [vmem:[#allocation2 + $0x7c] sm:$0x1] }
 0x2ca   :  { %v4980_v19 = vsel %vm8042_vm11, %v4975_v47, %v4979_v49  ;;  %v4989_v33 = vrot.slane %v4988_v3, 4  ;;  %v4423_v15 = vrot.slane %v4421_v21, 5  ;;  %v4415_v39 = vrot.slane %v4413_v27, 5  ;;  %v4555_v59 = vld [vmem:[#allocation2 + $0x88] sm:$0xe] }
 0x2cb   :  { %v4411_v55 = vrot.slane %v4410_v56, 4  ;;  %v4641_v2 = vrot.slane %v4552_v22, 5  ;;  %v6848_v5 = vrot.slane %v4553_v57, 9  ;;  %v4645_v42 = vrot.slane %v4554_v7, 5  ;;  %v4556_v22 = vld [vmem:[#allocation2 + $0x8c] sm:$0x1] }
 0x2cc   :  { %v4994_v61 = vsel %vm8042_vm11, %v4989_v33, %v4993_v36  ;;  %v4424_v51 = vor.u32 %v4423_v15, %v4420_v37  ;;  %v3494_v6 = vrot.slane %v9130_v25, 4  ;;  %v4429_v46 = vrot.slane %v4427_v26, 5  ;;  %v4557_v57 = vld [vmem:[#allocation2 + $0x90] sm:$0xe] }
 0x2cd   :  { %v6873_v62 = vcombine.low %v4980_v19, %v4994_v61  ;;  %v4416_v58 = vsel %vm8042_vm11, %v4411_v55, %v4415_v39  ;;  %v4996_v35 = vshrl.u32 %v4795_v63, 16  ;;  %v4642_v24 = vsel %vm8034_vm10, %v6847_v45, %v4641_v2  ;;  %v4259_v45 = vld [vmem:[#allocation2 + $0x88] sm:$0xf] }
 0x2ce   :  { %v4425_v18 = vrot.slane %v4424_v51, 4  ;;  %v3621_v8 = vsel %vm8005_vm5, %v3494_v6, %v3620_v32  ;;  %v4999_v48 = vshll.u32 %v4795_v63, 16  ;;  %v4646_v25 = vsel %vm8034_vm10, %v6848_v5, %v4645_v42  ;;  %v4261_v5 = vld [vmem:[#allocation2 + $0x90] sm:$0xf] }
 0x2cf   :  { %6250 = vmatprep.mubr.bf16.mxu0 %v6873_v62  ;;  %3622 = vst [vmem:[#allocation2 + $0x94] sm:$0x1] %v3621_v8  ;;  %v4998_v30 = vrot.slane %v4996_v35, 4  ;;  %v5010_v1 = vshrl.u32 %v4797_v23, 16  ;;  %v5013_v9 = vshll.u32 %v4797_v23, 16  ;;  %v5019_v53 = vshll.u32 %v4798_v38, 16 }
 0x2d0   :  { %v4430_v10 = vsel %vm8042_vm11, %v4425_v18, %v4429_v46  ;;  %6251 = vmatmul.mubr.bf16.gmra.mrb[136].mxu0 %v7803_v11  ;;  %v5001_v16 = vrot.slane %v4999_v48, 5  ;;  %v4432_v13 = vshrl.u32 %v4255_v4, 16  ;;  %v4435_v28 = vshll.u32 %v4255_v4, 16  ;;  %v7805_v8 = vld [vmem:[#allocation2 + $0x90] ss:$8 sps:$4 sm:$0xff]  }
 0x2d1   :  { %v6832_v50 = vcombine.low %v4416_v58, %v4430_v10  ;;  %v5012_v31 = vrot.slane %v5010_v1, 4  ;;  %v5015_v60 = vrot.slane %v5013_v9, 5  ;;  %v6857_v0 = vcombine.low %v4642_v24, %v4646_v25  ;;  %v4260_v58 = vld [vmem:[#allocation2 + $0x8c] sm:$0x1]  ;;  %v5063_v25 = vld [vmem:[#allocation2 + $0x10] sm:$0xe] }
 0x2d2   :  { %v5002_v41 = vor.u32 %v5001_v16, %v4998_v30  ;;  %v4434_v52 = vrot.slane %v4432_v13, 4  ;;  %v4441_v44 = vshll.u32 %v4256_v14, 16  ;;  %v4437_v54 = vrot.slane %v4435_v28, 5  ;;  %v5064_v10 = vld [vmem:[#allocation2 + $0x14] sm:$0x1] }
 0x2d3   :  { %6146 = vmatmul.mubr.bf16.gmra.mrb[116].mxu1 %v6832_v50  ;;  %v5016_v49 = vor.u32 %v5015_v60, %v5012_v31  ;;  %v4446_v29 = vshrl.u32 %v4257_v20, 16  ;;  %v4449_v27 = vshll.u32 %v4257_v20, 16  ;;  %v5021_v3 = vrot.slane %v5019_v53, 5  ;;  %v5065_v50 = vld [vmem:[#allocation2 + $0x18] sm:$0xe] }
 0x2d4   :  { %6153 = vmatprep.mubr.bf16.mxu1 %v6857_v0  ;;  %v5003_v47 = vrot.slane %v5002_v41, 4  ;;  %v4443_v12 = vrot.slane %v4441_v44, 5  ;;  %v4455_v21 = vshll.u32 %v4258_v43, 16  ;;  %v4438_v56 = vor.u32 %v4437_v54, %v4434_v52  ;;  %v5066_v31 = vld [vmem:[#allocation2 + $0x1c] sm:$0x1] }
 0x2d5   :  { %v5017_v36 = vrot.slane %v5016_v49, 4  ;;  %v4448_v26 = vrot.slane %v4446_v29, 4  ;;  %v4451_v7 = vrot.slane %v4449_v27, 5  ;;  %v6849_v37 = vrot.slane %v4555_v59, 9 }
 0x2d6   :  { %v4796_v19 = vld [vmem:[#allocation2 + $0x94] sm:$0x1]  ;;  %v4649_v15 = vrot.slane %v4556_v22, 5  ;;  %v4439_v55 = vrot.slane %v4438_v56, 4  ;;  %v4457_v2 = vrot.slane %v4455_v21, 5  ;;  %v6850_v61 = vrot.slane %v4557_v57, 9 }
 0x2d7   :  { %v4558_v33 = vld [vmem:[#allocation2 + $0x94] sm:$0x1]  ;;  %v5005_v63 = vshll.u32 %v4796_v19, 16  ;;  %v4452_v39 = vor.u32 %v4451_v7, %v4448_v26  ;;  %v5022_v32 = vsel %vm8042_vm11, %v5017_v36, %v5021_v3  ;;  %v4460_v42 = vshrl.u32 %v4259_v45, 16  ;;  %v5067_v22 = vld [vmem:[#allocation2 + $0x20] sm:$0xe] }
 0x2d8   :  { %v4653_v51 = vrot.slane %v4558_v33, 5  ;;  %v4444_v23 = vsel %vm8042_vm11, %v4439_v55, %v4443_v12  ;;  %v4463_v46 = vshll.u32 %v4259_v45, 16  ;;  %v4650_v38 = vsel %vm8034_vm10, %v6849_v37, %v4649_v15  ;;  %v4262_v9 = vld [vmem:[#allocation2 + $0x94] sm:$0x1]  ;;  %v5069_v21 = vld [vmem:[#allocation2 + $0x28] sm:$0xe] }
 0x2d9   :  { %v5007_v6 = vrot.slane %v5005_v63, 5  ;;  %v4453_v62 = vrot.slane %v4452_v39, 4  ;;  %v4462_v4 = vrot.slane %v4460_v42, 4  ;;  %v4474_v18 = vshrl.u32 %v4261_v5, 16  ;;  %v5070_v57 = vld [vmem:[#allocation2 + $0x2c] sm:$0x1] }
 0x2da   :  { %v4654_v35 = vsel %vm8034_vm10, %v6850_v61, %v4653_v51  ;;  %v4465_v48 = vrot.slane %v4463_v46, 5  ;;  %v4469_v14 = vshll.u32 %v4260_v58, 16  ;;  %v4477_v13 = vshll.u32 %v4261_v5, 16  ;;  %v5071_v36 = vld [vmem:[#allocation2 + $0x30] sm:$0xe] }
 0x2db   :  { %v5008_v24 = vsel %vm8042_vm11, %v5003_v47, %v5007_v6  ;;  %v4458_v11 = vsel %vm8042_vm11, %v4453_v62, %v4457_v2  ;;  %v6858_v16 = vcombine.low %v4650_v38, %v4654_v35  ;;  %v4476_v20 = vrot.slane %v4474_v18, 4  ;;  %v5068_v47 = vld [vmem:[#allocation2 + $0x24] sm:$0x1]  ;;  %v5072_v26 = vld [vmem:[#allocation2 + $0x34] sm:$0x1] }
 0x2dc   :  { %v6874_v30 = vcombine.low %v5008_v24, %v5022_v32  ;;  %v6833_v1 = vcombine.low %v4444_v23, %v4458_v11  ;;  %v4466_v53 = vor.u32 %v4465_v48, %v4462_v4  ;;  %v4479_v43 = vrot.slane %v4477_v13, 5  ;;  %v5073_v7 = vld [vmem:[#allocation2 + $0x38] sm:$0xe]  ;;  %v5074_v45 = vld [vmem:[#allocation2 + $0x3c] sm:$0x1] }
 0x2dd   :  { %v4483_v28 = vshll.u32 %v4262_v9, 16  ;;  %v6875_v0 = vrot.slane %v5063_v25, 9  ;;  %v5129_v41 = vrot.slane %v5064_v10, 5  ;;  %v6876_v52 = vrot.slane %v5065_v50, 9  ;;  %v5075_v51 = vld [vmem:[#allocation2 + $0x40] sm:$0xe] }
 0x2de   :  { %6258 = vmatprep.mubr.bf16.mxu0 %v6874_v30  ;;  %6154 = vmatmul.mubr.bf16.gmra.mrb[120].mxu1 %v6833_v1  ;;  %v4467_v60 = vrot.slane %v4466_v53, 4  ;;  %v5133_v44 = vrot.slane %v5066_v31, 5  ;;  %v4471_v59 = vrot.slane %v4469_v14, 5  ;;  %v4480_v49 = vor.u32 %v4479_v43, %v4476_v20  ;;  %v5076_v42 = vld [vmem:[#allocation2 + $0x44] sm:$0x1] }
 0x2df   :  { %6161 = vmatprep.mubr.bf16.mxu1 %v6858_v16  ;;  %6259 = vmatmul.mubr.bf16.gmra.mrb[140].mxu0 %v7805_v8  ;;  %v4485_v27 = vrot.slane %v4483_v28, 5  ;;  %v5130_v3 = vsel %vm8034_vm10, %v6875_v0, %v5129_v41  ;;  %v6877_v33 = vrot.slane %v5067_v22, 9  ;;  %v5137_v15 = vrot.slane %v5068_v47, 5  ;;  %v5077_v62 = vld [vmem:[#allocation2 + $0x48] sm:$0xe] }
 0x2e0   :  { %v4472_v54 = vsel %vm8042_vm11, %v4467_v60, %v4471_v59  ;;  %v4481_v29 = vrot.slane %v4480_v49, 4  ;;  %v5134_v12 = vsel %vm8034_vm10, %v6876_v52, %v5133_v44  ;;  %v6878_v63 = vrot.slane %v5069_v21, 9  ;;  %v5078_v58 = vld [vmem:[#allocation2 + $0x4c] sm:$0x1]  ;;  %v5079_v46 = vld [vmem:[#allocation2 + $0x60] sm:$0xe] }
 0x2e1   :  { %v6891_v37 = vcombine.low %v5130_v3, %v5134_v12  ;;  %v5141_v55 = vrot.slane %v5070_v57, 5  ;;  %v6879_v39 = vrot.slane %v5071_v36, 9  ;;  %v5145_v2 = vrot.slane %v5072_v26, 5  ;;  %v5080_v38 = vld [vmem:[#allocation2 + $0x64] sm:$0x1] }
 0x2e2   :  { %v4486_v56 = vsel %vm8042_vm11, %v4481_v29, %v4485_v27  ;;  %v6880_v5 = vrot.slane %v5073_v7, 9  ;;  %v5149_v32 = vrot.slane %v5074_v45, 5  ;;  %v5138_v61 = vsel %vm8034_vm10, %v6877_v33, %v5137_v15  ;;  %v5081_v35 = vld [vmem:[#allocation2 + $0x68] sm:$0xe]  ;;  %v5082_v4 = vld [vmem:[#allocation2 + $0x6c] sm:$0x1] }
 0x2e3   :  { %v6834_v19 = vcombine.low %v4472_v54, %v4486_v56  ;;  %v5142_v40 = vsel %vm8034_vm10, %v6878_v63, %v5141_v55  ;;  %v5146_v6 = vsel %vm8034_vm10, %v6879_v39, %v5145_v2  ;;  %v6881_v24 = vrot.slane %v5075_v51, 9  ;;  %v5083_v53 = vld [vmem:[#allocation2 + $0x70] sm:$0xe]  ;;  %v5084_v20 = vld [vmem:[#allocation2 + $0x74] sm:$0x1] }
 0x2e4   :  { %v5150_v23 = vsel %vm8034_vm10, %v6880_v5, %v5149_v32  ;;  %v6892_v18 = vcombine.low %v5138_v61, %v5142_v40  ;;  %v5153_v8 = vrot.slane %v5076_v42, 5  ;;  %v6882_v48 = vrot.slane %v5077_v62, 9  ;;  %v5085_v31 = vld [vmem:[#allocation2 + $0x78] sm:$0xe]  ;;  %v5086_v60 = vld [vmem:[#allocation2 + $0x7c] sm:$0x1] }
 0x2e5   :  { %v6893_v11 = vcombine.low %v5146_v6, %v5150_v23  ;;  %v5157_v25 = vrot.slane %v5078_v58, 5  ;;  %v6883_v30 = vrot.slane %v5079_v46, 9  ;;  %v5161_v1 = vrot.slane %v5080_v38, 5  ;;  %v5087_v43 = vld [vmem:[#allocation2 + $0x80] sm:$0xe] }
 0x2e6   :  { %6162 = vmatmul.mubr.bf16.gmra.mrb[124].mxu1 %v6834_v19  ;;  %v6884_v9 = vrot.slane %v5081_v35, 9  ;;  %v5165_v14 = vrot.slane %v5082_v4, 5  ;;  %v5154_v10 = vsel %vm8034_vm10, %v6881_v24, %v5153_v8  ;;  %v5088_v28 = vld [vmem:[#allocation2 + $0x84] sm:$0x1]  ;;  %v5089_v0 = vld [vmem:[#allocation2 + $0x88] sm:$0xe] }
 0x2e7   :  { %7595 = vmatprep.mubr.bf16.mxu1 %v6891_v37  ;;  %v5158_v16 = vsel %vm8034_vm10, %v6882_v48, %v5157_v25  ;;  %v5162_v13 = vsel %vm8034_vm10, %v6883_v30, %v5161_v1  ;;  %v5090_v41 = vld [vmem:[#allocation2 + $0x8c] sm:$0x1]  ;;  %v6885_v44 = vrot.slane %v5083_v53, 9  ;;  %v5169_v49 = vrot.slane %v5084_v20, 5  ;;  %v5091_v57 = vld [vmem:[#allocation2 + $0x90] sm:$0xe] }
 0x2e8   :  { %v5166_v50 = vsel %vm8034_vm10, %v6884_v9, %v5165_v14  ;;  %v6894_v52 = vcombine.low %v5154_v10, %v5158_v16  ;;  %v6886_v54 = vrot.slane %v5085_v31, 9  ;;  %v5173_v29 = vrot.slane %v5086_v60, 5  ;;  %v5092_v26 = vld [vmem:[#allocation2 + $0x94] sm:$0x1]  ;;  %v5093_v7 = vld [vmem:[#allocation2 + $0x98] sm:$0xe] }
 0x2e9   :  { %v6895_v59 = vcombine.low %v5162_v13, %v5166_v50  ;;  %v6887_v27 = vrot.slane %v5087_v43, 9  ;;  %v5177_v22 = vrot.slane %v5088_v28, 5  ;;  %v6888_v47 = vrot.slane %v5089_v0, 9  ;;  %v5094_v45 = vld [vmem:[#allocation2 + $0x9c] sm:$0x1] }
 0x2ea   :  { %v5181_v3 = vrot.slane %v5090_v41, 5  ;;  %v5170_v12 = vsel %vm8034_vm10, %v6885_v44, %v5169_v49  ;;  %v5174_v21 = vsel %vm8034_vm10, %v6886_v54, %v5173_v29  ;;  %v6889_v33 = vrot.slane %v5091_v57, 9 }
 0x2eb   :  { %v5178_v36 = vsel %vm8034_vm10, %v6887_v27, %v5177_v22  ;;  %v6896_v19 = vcombine.low %v5170_v12, %v5174_v21  ;;  %v5185_v15 = vrot.slane %v5092_v26, 5  ;;  %v6890_v63 = vrot.slane %v5093_v7, 9 }
 0x2ec   :  { %v5182_v56 = vsel %vm8034_vm10, %v6888_v47, %v5181_v3  ;;  %v5189_v55 = vrot.slane %v5094_v45, 5 }
 0x2ed   :  { %v6897_v37 = vcombine.low %v5178_v36, %v5182_v56  ;;  %v5186_v39 = vsel %vm8034_vm10, %v6889_v33, %v5185_v15 }
 0x2ee   :  { %7596 = vmatmul.mubr.bf16.vlgmr.msra.gmra.mrb[128].mxu1 %v6892_v18  ;;  %v5190_v2 = vsel %vm8034_vm10, %v6890_v63, %v5189_v55 }
 0x2ef   :  { %7599 = vmatprep.mubr.bf16.mxu1 %v6893_v11  ;;  %v6898_v5 = vcombine.low %v5186_v39, %v5190_v2 }
 0x2f6   :  { %7600 = vmatmul.mubr.bf16.gmra.mrb[132].mxu1 %v6894_v52 }
 0x2f7   :  { %7603 = vmatprep.mubr.bf16.mxu1 %v6895_v59 }
 0x2fe   :  { %7604 = vmatmul.mubr.bf16.gmra.mrb[136].mxu1 %v6896_v19 }
 0x2ff   :  { %7607 = vmatprep.mubr.bf16.mxu1 %v6897_v37 }
 0x306   :  { %7608 = vmatmul.mubr.bf16.gmra.mrb[140].mxu1 %v6898_v5 }
 0x313   :  { %v7355_v32 = vpop.f32.mrb[80].mxu0 }
 0x314   :  { %v7356_v61 = vpop.f32.mrb[81].mxu0 }
 0x315   :  { %v7357_v40 = vadd.f32 %v7356_v61, %v7355_v32  ;;  %v7358_v51 = vpop.f32.mrb[82].mxu0 }
 0x316   :  { %v7359_v42 = vpop.f32.mrb[83].mxu0 }
 0x317   :  { %v7360_v6 = vadd.f32 %v7359_v42, %v7358_v51 }
 0x31c   :  { %v7291_v23 = vpop.f32.mrb[64].mxu1 }
 0x31d   :  { %v7292_v62 = vpop.f32.mrb[65].mxu1  ;;  %v7361_v58 = vpop.f32.mrb[84].mxu0 }
 0x31e   :  { %v7293_v46 = vadd.f32 %v7292_v62, %v7291_v23  ;;  %v7294_v38 = vpop.f32.mrb[66].mxu1  ;;  %v7362_v35 = vpop.f32.mrb[85].mxu0 }
 0x31f   :  { %v7363_v4 = vadd.f32 %v7362_v35, %v7361_v58  ;;  %v7295_v18 = vpop.f32.mrb[67].mxu1  ;;  %v7364_v24 = vpop.f32.mrb[86].mxu0 }
 0x320   :  { %v9330_v11 = vadd.f32 %v7357_v40, %v7293_v46  ;;  %v7296_v34 = vadd.f32 %v7295_v18, %v7294_v38  ;;  %v7365_v8 = vpop.f32.mrb[87].mxu0 }
 0x321   :  { %v7366_v48 = vadd.f32 %v7365_v8, %v7364_v24 }
 0x322   :  { %v9332_v25 = vadd.f32 %v7360_v6, %v7296_v34 }
 0x324   :  { %v7297_v30 = vpop.f32.mrb[68].mxu1 }
 0x325   :  { %v7298_v1 = vpop.f32.mrb[69].mxu1 }
 0x326   :  { %v7299_v9 = vadd.f32 %v7298_v1, %v7297_v30  ;;  %v7300_v10 = vpop.f32.mrb[70].mxu1 }
 0x327   :  { %v7367_v14 = vpop.f32.mrb[88].mxu0  ;;  %v7301_v53 = vpop.f32.mrb[71].mxu1 }
 0x328   :  { %v7368_v16 = vpop.f32.mrb[89].mxu0  ;;  %v9334_v20 = vadd.f32 %v7363_v4, %v7299_v9  ;;  %v7302_v50 = vadd.f32 %v7301_v53, %v7300_v10 }
 0x329   :  { %v7369_v13 = vadd.f32 %v7368_v16, %v7367_v14  ;;  %v7370_v31 = vpop.f32.mrb[90].mxu0 }
 0x32a   :  { %v7371_v60 = vpop.f32.mrb[91].mxu0  ;;  %v9336_v43 = vadd.f32 %v7366_v48, %v7302_v50 }
 0x32b   :  { %v7372_v28 = vadd.f32 %v7371_v60, %v7370_v31 }
 0x32c   :  { %v7303_v0 = vpop.f32.mrb[72].mxu1 }
 0x32d   :  { %v7304_v41 = vpop.f32.mrb[73].mxu1 }
 0x32e   :  { %v7305_v52 = vadd.f32 %v7304_v41, %v7303_v0  ;;  %v7306_v59 = vpop.f32.mrb[74].mxu1 }
 0x32f   :  { %v7373_v44 = vpop.f32.mrb[92].mxu0  ;;  %v7307_v54 = vpop.f32.mrb[75].mxu1 }
 0x330   :  { %v7374_v49 = vpop.f32.mrb[93].mxu0  ;;  %v9338_v29 = vadd.f32 %v7369_v13, %v7305_v52  ;;  %v7308_v22 = vadd.f32 %v7307_v54, %v7306_v59 }
 0x331   :  { %v7375_v27 = vadd.f32 %v7374_v49, %v7373_v44  ;;  %v7376_v47 = vpop.f32.mrb[94].mxu0 }
 0x332   :  { %v7377_v3 = vpop.f32.mrb[95].mxu0  ;;  %v9340_v12 = vadd.f32 %v7372_v28, %v7308_v22 }
 0x333   :  { %v7378_v21 = vadd.f32 %v7377_v3, %v7376_v47 }
 0x334   :  { %v7309_v57 = vpop.f32.mrb[76].mxu1 }
 0x335   :  { %v7310_v36 = vpop.f32.mrb[77].mxu1 }
 0x336   :  { %v7311_v56 = vadd.f32 %v7310_v36, %v7309_v57  ;;  %v7312_v26 = vpop.f32.mrb[78].mxu1 }
 0x337   :  { %v7313_v7 = vpop.f32.mrb[79].mxu1 }
 0x338   :  { %v9342_v45 = vadd.f32 %v7375_v27, %v7311_v56  ;;  %v7314_v19 = vadd.f32 %v7313_v7, %v7312_v26 }
 0x33a   :  { %v9344_v33 = vadd.f32 %v7378_v21, %v7314_v19 }
 0x341   :  { %v7379_v37 = vpop.f32.mrb[96].mxu0 }
 0x342   :  { %v7380_v15 = vpop.f32.mrb[97].mxu0 }
 0x343   :  { %v7381_v63 = vadd.f32 %v7380_v15, %v7379_v37  ;;  %v7382_v55 = vpop.f32.mrb[98].mxu0 }
 0x344   :  { %v7383_v39 = vpop.f32.mrb[99].mxu0 }
 0x345   :  { %v7384_v2 = vadd.f32 %v7383_v39, %v7382_v55  ;;  %v7315_v5 = vpop.f32.mrb[80].mxu1 }
 0x346   :  { %v7316_v32 = vpop.f32.mrb[81].mxu1 }
 0x347   :  { %v7317_v61 = vadd.f32 %v7316_v32, %v7315_v5  ;;  %v7318_v40 = vpop.f32.mrb[82].mxu1 }
 0x348   :  { %v7319_v51 = vpop.f32.mrb[83].mxu1 }
 0x349   :  { %v9346_v42 = vadd.f32 %v7381_v63, %v7317_v61  ;;  %v7320_v23 = vadd.f32 %v7319_v51, %v7318_v40 }
 0x34a   :  { %v7385_v6 = vpop.f32.mrb[100].mxu0 }
 0x34b   :  { %v7386_v62 = vpop.f32.mrb[101].mxu0  ;;  %v9348_v46 = vadd.f32 %v7384_v2, %v7320_v23 }
 0x34c   :  { %v7387_v58 = vadd.f32 %v7386_v62, %v7385_v6  ;;  %v7388_v38 = vpop.f32.mrb[102].mxu0 }
 0x34d   :  { %v7389_v35 = vpop.f32.mrb[103].mxu0 }
 0x34e   :  { %v7390_v4 = vadd.f32 %v7389_v35, %v7388_v38 }
 0x34f   :  { %v7321_v18 = vpop.f32.mrb[84].mxu1 }
 0x350   :  { %v7322_v24 = vpop.f32.mrb[85].mxu1 }
 0x351   :  { %v7323_v34 = vadd.f32 %v7322_v24, %v7321_v18  ;;  %v7324_v48 = vpop.f32.mrb[86].mxu1 }
 0x352   :  { %v7391_v8 = vpop.f32.mrb[104].mxu0  ;;  %v7325_v1 = vpop.f32.mrb[87].mxu1 }
 0x353   :  { %v7392_v30 = vpop.f32.mrb[105].mxu0  ;;  %v9350_v9 = vadd.f32 %v7387_v58, %v7323_v34  ;;  %v7326_v10 = vadd.f32 %v7325_v1, %v7324_v48 }
 0x354   :  { %v7393_v14 = vadd.f32 %v7392_v30, %v7391_v8  ;;  %v7394_v16 = vpop.f32.mrb[106].mxu0 }
 0x355   :  { %v7395_v53 = vpop.f32.mrb[107].mxu0  ;;  %v9352_v13 = vadd.f32 %v7390_v4, %v7326_v10 }
 0x356   :  { %v7396_v50 = vadd.f32 %v7395_v53, %v7394_v16 }
 0x357   :  { %v7327_v31 = vpop.f32.mrb[88].mxu1 }
 0x358   :  { %v7328_v60 = vpop.f32.mrb[89].mxu1 }
 0x359   :  { %v7329_v28 = vadd.f32 %v7328_v60, %v7327_v31  ;;  %v7330_v0 = vpop.f32.mrb[90].mxu1 }
 0x35a   :  { %v7331_v41 = vpop.f32.mrb[91].mxu1 }
 0x35b   :  { %v9354_v52 = vadd.f32 %v7393_v14, %v7329_v28  ;;  %v7332_v44 = vadd.f32 %v7331_v41, %v7330_v0 }
 0x35d   :  { %v9356_v54 = vadd.f32 %v7396_v50, %v7332_v44 }
 0x35e   :  { %v7397_v59 = vpop.f32.mrb[108].mxu0 }
 0x35f   :  { %v7398_v49 = vpop.f32.mrb[109].mxu0 }
 0x360   :  { %v7399_v27 = vadd.f32 %v7398_v49, %v7397_v59  ;;  %v7400_v22 = vpop.f32.mrb[110].mxu0  ;;  %v7333_v3 = vpop.f32.mrb[92].mxu1 }
 0x361   :  { %v7401_v47 = vpop.f32.mrb[111].mxu0  ;;  %v7334_v57 = vpop.f32.mrb[93].mxu1 }
 0x362   :  { %v7402_v21 = vadd.f32 %v7401_v47, %v7400_v22  ;;  %v7335_v36 = vadd.f32 %v7334_v57, %v7333_v3  ;;  %v7336_v56 = vpop.f32.mrb[94].mxu1 }
 0x363   :  { %v7337_v26 = vpop.f32.mrb[95].mxu1 }
 0x364   :  { %v9358_v7 = vadd.f32 %v7399_v27, %v7335_v36  ;;  %v7338_v19 = vadd.f32 %v7337_v26, %v7336_v56 }
 0x366   :  { %v7483_v37 = vpop.f32.mrb[112].mxu0  ;;  %v9360_v63 = vadd.f32 %v7402_v21, %v7338_v19 }
 0x367   :  { %v7484_v15 = vpop.f32.mrb[113].mxu0 }
 0x368   :  { %v7485_v55 = vadd.f32 %v7484_v15, %v7483_v37  ;;  %v7486_v39 = vpop.f32.mrb[114].mxu0 }
 0x369   :  { %v7487_v2 = vpop.f32.mrb[115].mxu0 }
 0x36a   :  { %v7488_v5 = vadd.f32 %v7487_v2, %v7486_v39 }
 0x36d   :  { %v7419_v32 = vpop.f32.mrb[96].mxu1 }
 0x36e   :  { %v7489_v61 = vpop.f32.mrb[116].mxu0  ;;  %v7420_v40 = vpop.f32.mrb[97].mxu1 }
 0x36f   :  { %v7490_v51 = vpop.f32.mrb[117].mxu0  ;;  %v7421_v6 = vadd.f32 %v7420_v40, %v7419_v32  ;;  %v7422_v23 = vpop.f32.mrb[98].mxu1 }
 0x370   :  { %v7491_v62 = vadd.f32 %v7490_v51, %v7489_v61  ;;  %v7492_v58 = vpop.f32.mrb[118].mxu0  ;;  %v7423_v38 = vpop.f32.mrb[99].mxu1 }
 0x371   :  { %v7493_v35 = vpop.f32.mrb[119].mxu0  ;;  %v6108_v4 = vadd.f32 %v7421_v6, %v9330_v11  ;;  %v7424_v18 = vadd.f32 %v7423_v38, %v7422_v23 }
 0x372   :  { %v7494_v24 = vadd.f32 %v7493_v35, %v7492_v58 }
 0x373   :  { %v6111_v34 = vadd.f32 %v7424_v18, %v9332_v25  ;;  %v9364_v8 = vadd.f32 %v7485_v55, %v6108_v4 }
 0x375   :  { %v9366_v30 = vadd.f32 %v7488_v5, %v6111_v34 }
 0x376   :  { %v7495_v48 = vpop.f32.mrb[120].mxu0 }
 0x377   :  { %v7496_v1 = vpop.f32.mrb[121].mxu0 }
 0x378   :  { %v7497_v14 = vadd.f32 %v7496_v1, %v7495_v48  ;;  %v7498_v10 = vpop.f32.mrb[122].mxu0 }
 0x379   :  { %v7425_v16 = vpop.f32.mrb[100].mxu1  ;;  %v7499_v53 = vpop.f32.mrb[123].mxu0 }
 0x37a   :  { %v7426_v50 = vpop.f32.mrb[101].mxu1  ;;  %v7500_v31 = vadd.f32 %v7499_v53, %v7498_v10 }
 0x37b   :  { %v7427_v60 = vadd.f32 %v7426_v50, %v7425_v16  ;;  %v7428_v28 = vpop.f32.mrb[102].mxu1 }
 0x37c   :  { %v7429_v0 = vpop.f32.mrb[103].mxu1 }
 0x37d   :  { %v6116_v11 = vadd.f32 %v7427_v60, %v9334_v20  ;;  %v7430_v41 = vadd.f32 %v7429_v0, %v7428_v28 }
 0x37f   :  { %v6119_v25 = vadd.f32 %v7430_v41, %v9336_v43  ;;  %v9370_v44 = vadd.f32 %v7491_v62, %v6116_v11 }
 0x381   :  { %v9372_v59 = vadd.f32 %v7494_v24, %v6119_v25 }
 0x384   :  { %v7431_v49 = vpop.f32.mrb[104].mxu1  ;;  %v7501_v22 = vpop.f32.mrb[124].mxu0 }
 0x385   :  { %v7432_v27 = vpop.f32.mrb[105].mxu1  ;;  %v7502_v21 = vpop.f32.mrb[125].mxu0 }
 0x386   :  { %v7433_v47 = vadd.f32 %v7432_v27, %v7431_v49  ;;  %v7434_v3 = vpop.f32.mrb[106].mxu1  ;;  %v7503_v57 = vadd.f32 %v7502_v21, %v7501_v22  ;;  %v7504_v56 = vpop.f32.mrb[126].mxu0 }
 0x387   :  { %v7435_v36 = vpop.f32.mrb[107].mxu1  ;;  %v7505_v20 = vpop.f32.mrb[127].mxu0 }
 0x388   :  { %v6124_v26 = vadd.f32 %v7433_v47, %v9338_v29  ;;  %v7436_v19 = vadd.f32 %v7435_v36, %v7434_v3  ;;  %v7506_v37 = vadd.f32 %v7505_v20, %v7504_v56 }
 0x38a   :  { %v6127_v43 = vadd.f32 %v7436_v19, %v9340_v12  ;;  %v9376_v15 = vadd.f32 %v7497_v14, %v6124_v26 }
 0x38c   :  { %v9378_v55 = vadd.f32 %v7500_v31, %v6127_v43 }
 0x38e   :  { %v7437_v39 = vpop.f32.mrb[108].mxu1  ;;  %v7507_v2 = vpop.f32.mrb[128].mxu0 }
 0x38f   :  { %v7438_v5 = vpop.f32.mrb[109].mxu1  ;;  %v7508_v32 = vpop.f32.mrb[129].mxu0 }
 0x390   :  { %v7439_v61 = vadd.f32 %v7438_v5, %v7437_v39  ;;  %v7440_v40 = vpop.f32.mrb[110].mxu1  ;;  %v7509_v51 = vadd.f32 %v7508_v32, %v7507_v2  ;;  %v7510_v6 = vpop.f32.mrb[130].mxu0 }
 0x391   :  { %v7441_v23 = vpop.f32.mrb[111].mxu1  ;;  %v7511_v62 = vpop.f32.mrb[131].mxu0 }
 0x392   :  { %v6132_v29 = vadd.f32 %v7439_v61, %v9342_v45  ;;  %v7442_v58 = vadd.f32 %v7441_v23, %v7440_v40  ;;  %v7512_v38 = vadd.f32 %v7511_v62, %v7510_v6 }
 0x394   :  { %v6135_v12 = vadd.f32 %v7442_v58, %v9344_v33  ;;  %v9382_v35 = vadd.f32 %v7503_v57, %v6132_v29 }
 0x396   :  { %v9384_v4 = vadd.f32 %v7506_v37, %v6135_v12 }
 0x399   :  { %v7513_v18 = vpop.f32.mrb[132].mxu0 }
 0x39a   :  { %v7514_v24 = vpop.f32.mrb[133].mxu0 }
 0x39b   :  { %v7443_v34 = vpop.f32.mrb[112].mxu1  ;;  %v7515_v48 = vadd.f32 %v7514_v24, %v7513_v18  ;;  %v7516_v1 = vpop.f32.mrb[134].mxu0 }
 0x39c   :  { %v7444_v14 = vpop.f32.mrb[113].mxu1  ;;  %v7517_v10 = vpop.f32.mrb[135].mxu0 }
 0x39d   :  { %v7445_v16 = vadd.f32 %v7444_v14, %v7443_v34  ;;  %v7446_v53 = vpop.f32.mrb[114].mxu1  ;;  %v7518_v50 = vadd.f32 %v7517_v10, %v7516_v1 }
 0x39e   :  { %v7447_v31 = vpop.f32.mrb[115].mxu1 }
 0x39f   :  { %v6140_v45 = vadd.f32 %v7445_v16, %v9346_v42  ;;  %v7448_v60 = vadd.f32 %v7447_v31, %v7446_v53 }
 0x3a1   :  { %v6143_v33 = vadd.f32 %v7448_v60, %v9348_v46  ;;  %v9388_v28 = vadd.f32 %v7509_v51, %v6140_v45 }
 0x3a3   :  { %v7519_v0 = vpop.f32.mrb[136].mxu0  ;;  %v9390_v11 = vadd.f32 %v7512_v38, %v6143_v33 }
 0x3a4   :  { %v7520_v41 = vpop.f32.mrb[137].mxu0 }
 0x3a5   :  { %v7521_v25 = vadd.f32 %v7520_v41, %v7519_v0  ;;  %v7522_v49 = vpop.f32.mrb[138].mxu0 }
 0x3a6   :  { %v7449_v27 = vpop.f32.mrb[116].mxu1  ;;  %v7523_v22 = vpop.f32.mrb[139].mxu0 }
 0x3a7   :  { %v7450_v47 = vpop.f32.mrb[117].mxu1  ;;  %v7524_v3 = vadd.f32 %v7523_v22, %v7522_v49 }
 0x3a8   :  { %v7451_v21 = vadd.f32 %v7450_v47, %v7449_v27  ;;  %v7452_v57 = vpop.f32.mrb[118].mxu1 }
 0x3a9   :  { %v7453_v36 = vpop.f32.mrb[119].mxu1 }
 0x3aa   :  { %v6148_v42 = vadd.f32 %v7451_v21, %v9350_v9  ;;  %v7454_v56 = vadd.f32 %v7453_v36, %v7452_v57 }
 0x3ac   :  { %v6151_v46 = vadd.f32 %v7454_v56, %v9352_v13  ;;  %v6245_v26 = vadd.f32 %v7515_v48, %v6148_v42 }
 0x3ae   :  { %v6248_v19 = vadd.f32 %v7518_v50, %v6151_v46 }
 0x3b1   :  { %v7455_v20 = vpop.f32.mrb[120].mxu1 }
 0x3b2   :  { %v7456_v37 = vpop.f32.mrb[121].mxu1  ;;  %v7525_v43 = vpop.f32.mrb[140].mxu0 }
 0x3b3   :  { %v7457_v39 = vadd.f32 %v7456_v37, %v7455_v20  ;;  %v7458_v2 = vpop.f32.mrb[122].mxu1  ;;  %v7526_v5 = vpop.f32.mrb[141].mxu0 }
 0x3b4   :  { %v7527_v32 = vadd.f32 %v7526_v5, %v7525_v43  ;;  %v7459_v61 = vpop.f32.mrb[123].mxu1  ;;  %v7528_v40 = vpop.f32.mrb[142].mxu0 }
 0x3b5   :  { %v6156_v51 = vadd.f32 %v7457_v39, %v9354_v52  ;;  %v7460_v6 = vadd.f32 %v7459_v61, %v7458_v2  ;;  %v7529_v23 = vpop.f32.mrb[143].mxu0 }
 0x3b6   :  { %v7530_v62 = vadd.f32 %v7529_v23, %v7528_v40 }
 0x3b7   :  { %v6159_v9 = vadd.f32 %v7460_v6, %v9356_v54  ;;  %v6253_v29 = vadd.f32 %v7521_v25, %v6156_v51 }
 0x3b9   :  { %v6256_v13 = vadd.f32 %v7524_v3, %v6159_v9  ;;  %v7461_v58 = vpop.f32.mrb[124].mxu1 }
 0x3ba   :  { %v7462_v38 = vpop.f32.mrb[125].mxu1 }
 0x3bb   :  { %v7463_v12 = vadd.f32 %v7462_v38, %v7461_v58  ;;  %v7464_v18 = vpop.f32.mrb[126].mxu1 }
 0x3bc   :  { %v7465_v24 = vpop.f32.mrb[127].mxu1 }
 0x3bd   :  { %v6164_v34 = vadd.f32 %v7463_v12, %v9358_v7  ;;  %v7466_v48 = vadd.f32 %v7465_v24, %v7464_v18 }
 0x3bf   :  { %v6167_v1 = vadd.f32 %v7466_v48, %v9360_v63  ;;  %v6261_v14 = vadd.f32 %v7527_v32, %v6164_v34 }
 0x3c1   :  { %v7597_v10 = vpop.f32.mrb[128].mxu1  ;;  %v6264_v52 = vadd.f32 %v7530_v62, %v6167_v1 }
 0x3c2   :  { %v9399_v16 = vadd.f32 %v7597_v10, %v9370_v44  ;;  %v6301_v53 = vpop.f32.mrb[129].mxu1 }
 0x3c3   :  { %v9402_v54 = vadd.f32 %v6301_v53, %v9364_v8  ;;  %v7598_v50 = vpop.f32.mrb[130].mxu1 }
 0x3c4   :  { %v9405_v31 = vadd.f32 %v7598_v50, %v9372_v59  ;;  %v6304_v45 = vpop.f32.mrb[131].mxu1 }
 0x3c5   :  { %v9408_v7 = vadd.f32 %v6304_v45, %v9366_v30 }
 0x3c7   :  { %v6366_v63 = vadd.f32 %v9408_v7, %v9402_v54 }
 0x3c9   :  { %v6367_v60 = vadd.f32 %v6366_v63, %v9399_v16  ;;  %v7601_v33 = vpop.f32.mrb[132].mxu1 }
 0x3ca   :  { %v9414_v44 = vadd.f32 %v7601_v33, %v9382_v35  ;;  %v6317_v0 = vpop.f32.mrb[133].mxu1 }
 0x3cb   :  { %v9417_v8 = vadd.f32 %v6317_v0, %v9376_v15  ;;  %v6368_v59 = vadd.f32 %v6367_v60, %v9405_v31  ;;  %v7602_v41 = vpop.f32.mrb[134].mxu1 }
 0x3cc   :  { %v9421_v25 = vadd.f32 %v7602_v41, %v9384_v4  ;;  %v6320_v30 = vpop.f32.mrb[135].mxu1 }
 0x3cd   :  { %v6369_v49 = vadd.f32 %v6368_v59, %v9417_v8  ;;  %v9425_v27 = vadd.f32 %v6320_v30, %v9378_v55 }
 0x3cf   :  { %v6370_v22 = vadd.f32 %v6369_v49, %v9425_v27 }
 0x3d1   :  { %v6371_v35 = vadd.f32 %v6370_v22, %v9414_v44  ;;  %v7605_v47 = vpop.f32.mrb[136].mxu1 }
 0x3d2   :  { %v9429_v3 = vadd.f32 %v7605_v47, %v6245_v26  ;;  %v6333_v15 = vpop.f32.mrb[137].mxu1 }
 0x3d3   :  { %v9432_v21 = vadd.f32 %v6333_v15, %v9388_v28  ;;  %v6372_v4 = vadd.f32 %v6371_v35, %v9421_v25  ;;  %v7606_v57 = vpop.f32.mrb[138].mxu1 }
 0x3d4   :  { %v9435_v36 = vadd.f32 %v7606_v57, %v6248_v19  ;;  %v6336_v42 = vpop.f32.mrb[139].mxu1 }
 0x3d5   :  { %v6373_v55 = vadd.f32 %v6372_v4, %v9432_v21  ;;  %v9439_v56 = vadd.f32 %v6336_v42, %v9390_v11 }
 0x3d7   :  { %v6374_v46 = vadd.f32 %v6373_v55, %v9439_v56 }
 0x3d9   :  { %v6375_v26 = vadd.f32 %v6374_v46, %v9429_v3  ;;  %v7609_v20 = vpop.f32.mrb[140].mxu1 }
 0x3da   :  { %v9443_v37 = vadd.f32 %v7609_v20, %v6261_v14  ;;  %v6349_v28 = vpop.f32.mrb[141].mxu1 }
 0x3db   :  { %v9445_v43 = vadd.f32 %v6349_v28, %v6253_v29  ;;  %v6376_v39 = vadd.f32 %v6375_v26, %v9435_v36  ;;  %v7610_v19 = vpop.f32.mrb[142].mxu1 }
 0x3dc   :  { %v9448_v2 = vadd.f32 %v7610_v19, %v6264_v52  ;;  %v6352_v5 = vpop.f32.mrb[143].mxu1 }
 0x3dd   :  { %v6377_v32 = vadd.f32 %v6376_v39, %v9445_v43  ;;  %v9451_v11 = vadd.f32 %v6352_v5, %v6256_v13 }
 0x3df   :  { %v6378_v61 = vadd.f32 %v6377_v32, %v9451_v11 }
 0x3e1   :  { %v6379_v40 = vadd.f32 %v6378_v61, %v9443_v37 }
 0x3e3   :  { %v6380_v51 = vadd.f32 %v6379_v40, %v9448_v2 }
 0x3e5   :  { %v6381_v6 = vrot.slane %v6380_v51, 4 }
 0x3e7   :  { %v6382_v23 = vadd.f32 %v6381_v6, %v6380_v51 }
 0x3e9   :  { %v6383_v62 = vrot.slane %v6382_v23, 2 }
 0x3eb   :  { %v6384_v9 = vadd.f32 %v6383_v62, %v6382_v23 }
 0x3ed   :  { %v6385_v29 = vrot.slane %v6384_v9, 1 }
 0x3ef   :  { %v6386_v58 = vadd.f32 %v6385_v29, %v6384_v9 }
 0x3f1   :  { %v6387_v38 = vmul.f32 0.0078125, %v6386_v58 }
 0x3f3   :  { %v6388_v12 = vsub.f32 %v9402_v54, %v6387_v38  ;;  %v6389_v18 = vsub.f32 %v9408_v7, %v6387_v38  ;;  %v6390_v13 = vsub.f32 %v9399_v16, %v6387_v38  ;;  %v6391_v48 = vsub.f32 %v9405_v31, %v6387_v38 }
 0x3f4   :  { %v6392_v1 = vsub.f32 %v9417_v8, %v6387_v38  ;;  %v6393_v52 = vsub.f32 %v9425_v27, %v6387_v38  ;;  %v6394_v45 = vsub.f32 %v9414_v44, %v6387_v38  ;;  %v6395_v33 = vsub.f32 %v9421_v25, %v6387_v38 }
 0x3f5   :  { %v6404_v24 = vmul.f32 %v6388_v12, %v6388_v12  ;;  %v6405_v34 = vmul.f32 %v6389_v18, %v6389_v18  ;;  %v6406_v14 = vmul.f32 %v6390_v13, %v6390_v13  ;;  %v6407_v53 = vmul.f32 %v6391_v48, %v6391_v48 }
 0x3f6   :  { %v6408_v63 = vmul.f32 %v6392_v1, %v6392_v1  ;;  %v6409_v0 = vmul.f32 %v6393_v52, %v6393_v52  ;;  %v6396_v41 = vsub.f32 %v9432_v21, %v6387_v38  ;;  %v6410_v30 = vmul.f32 %v6394_v45, %v6394_v45  ;;  %v6364_v52 = vld [vmem:[%s9561_s5] sm:$0x1] }
 0x3f7   :  { %v6420_v10 = vadd.f32 %v6405_v34, %v6404_v24  ;;  %v6397_v22 = vsub.f32 %v9439_v56, %v6387_v38  ;;  %v6411_v35 = vmul.f32 %v6395_v33, %v6395_v33  ;;  %v6398_v15 = vsub.f32 %v9429_v3, %v6387_v38  ;;  %v6365_v45 = vld [vmem:[%s9562_s6] sm:$0x1] }
 0x3f8   :  { %v6412_v4 = vmul.f32 %v6396_v41, %v6396_v41  ;;  %v6399_v42 = vsub.f32 %v9435_v36, %v6387_v38  ;;  %v6400_v26 = vsub.f32 %v9445_v43, %v6387_v38  ;;  %v6401_v39 = vsub.f32 %v9451_v11, %v6387_v38 }
 0x3f9   :  { %v6421_v50 = vadd.f32 %v6420_v10, %v6406_v14  ;;  %v6413_v55 = vmul.f32 %v6397_v22, %v6397_v22  ;;  %v6414_v20 = vmul.f32 %v6398_v15, %v6398_v15  ;;  %v6402_v32 = vsub.f32 %v9443_v37, %v6387_v38 }
 0x3fa   :  { %v6415_v19 = vmul.f32 %v6399_v42, %v6399_v42  ;;  %v6416_v61 = vmul.f32 %v6400_v26, %v6400_v26  ;;  %v6403_v51 = vsub.f32 %v9448_v2, %v6387_v38  ;;  %v6417_v6 = vmul.f32 %v6401_v39, %v6401_v39 }
 0x3fb   :  { %v6422_v60 = vadd.f32 %v6421_v50, %v6407_v53  ;;  %v6418_v62 = vmul.f32 %v6402_v32, %v6402_v32  ;;  %v7813_v32 = vld [vmem:[%s9556_s0 + $0x8] sm:$0xff] }
 0x3fc   :  { %v6419_v29 = vmul.f32 %v6403_v51, %v6403_v51 }
 0x3fd   :  { %v6423_v59 = vadd.f32 %v6422_v60, %v6408_v63 }
 0x3ff   :  { %v6424_v49 = vadd.f32 %v6423_v59, %v6409_v0 }
 0x401   :  { %v6425_v47 = vadd.f32 %v6424_v49, %v6410_v30 }
 0x403   :  { %v6426_v57 = vadd.f32 %v6425_v47, %v6411_v35 }
 0x405   :  { %v6427_v46 = vadd.f32 %v6426_v57, %v6412_v4 }
 0x407   :  { %v6428_v28 = vadd.f32 %v6427_v46, %v6413_v55 }
 0x409   :  { %v6429_v5 = vadd.f32 %v6428_v28, %v6414_v20 }
 0x40b   :  { %v6430_v40 = vadd.f32 %v6429_v5, %v6415_v19  ;;  %v7812_v19 = vld [vmem:[%s9556_s0] sm:$0xff] }
 0x40d   :  { %v6431_v23 = vadd.f32 %v6430_v40, %v6416_v61  ;;  %v7814_v40 = vld [vmem:[%s9556_s0 + $0x10] sm:$0xff] }
 0x40f   :  { %v6432_v9 = vadd.f32 %v6431_v23, %v6417_v6  ;;  %v7815_v6 = vld [vmem:[%s9556_s0 + $0x18] sm:$0xff] }
 0x411   :  { %v6433_v58 = vadd.f32 %v6432_v9, %v6418_v62  ;;  %v7816_v62 = vld [vmem:[%s9556_s0 + $0x20] sm:$0xff] }
 0x413   :  { %v6434_v12 = vadd.f32 %v6433_v58, %v6419_v29  ;;  %v7817_v29 = vld [vmem:[%s9556_s0 + $0x28] sm:$0xff] }
 0x415   :  { %v6435_v18 = vrot.slane %v6434_v12, 4 }
 0x417   :  { %v6436_v13 = vadd.f32 %v6435_v18, %v6434_v12  ;;  %v7818_v12 = vld [vmem:[%s9556_s0 + $0x30] sm:$0xff] }
 0x419   :  { %v6437_v24 = vrot.slane %v6436_v13, 2 }
 0x41b   :  { %v6438_v34 = vadd.f32 %v6437_v24, %v6436_v13  ;;  %v7819_v13 = vld [vmem:[%s9556_s0 + $0x38] sm:$0xff] }
 0x41d   :  { %v6439_v48 = vrot.slane %v6438_v34, 1 }
 0x41f   :  { %v6440_v1 = vadd.f32 %v6439_v48, %v6438_v34  ;;  %v7820_v34 = vld [vmem:[%s9556_s0 + $0x40] sm:$0xff] }
 0x421   :  { %v6441_v14 = vmul.f32 0.0078125, %v6440_v1  ;;  %v7821_v1 = vld [vmem:[%s9556_s0 + $0x48] sm:$0xff] }
 0x423   :  { %v6442_v10 = vadd.f32 1e-05, %v6441_v14 }
 0x425   :  { %7809 = vrsqrt.f32 %v6442_v10  ;;  %v7822_v10 = vld [vmem:[%s9556_s0 + $0x50] sm:$0xff] }
 0x42f   :  { %v7810_v53 = vpop.eup %7809 }
 0x430   :  { %v6444_v50 = vmul.f32 %v7810_v53, %v6364_v52  ;;  %v7823_v53 = vld [vmem:[%s9556_s0 + $0x58] sm:$0xff] }
 0x432   :  { %v6445_v63 = vmul.f32 %v6444_v50, %v6387_v38  ;;  %v6451_v60 = vrot.slane %v6444_v50, %v8745_v17 }
 0x434   :  { %v6446_v33 = vsub.f32 %v6365_v45, %v6445_v63  ;;  %v6466_v0 = vmul.f32 %v6451_v60, %v9451_v11  ;;  %v6453_v59 = vmul.f32 %v6451_v60, %v9402_v54  ;;  %v6454_v41 = vmul.f32 %v6451_v60, %v9408_v7  ;;  %v7824_v45 = vld [vmem:[%s9556_s0 + $0x60] sm:$0xff] }
 0x435   :  { %v6455_v30 = vmul.f32 %v6451_v60, %v9399_v16  ;;  %v6456_v49 = vmul.f32 %v6451_v60, %v9405_v31  ;;  %v6457_v22 = vmul.f32 %v6451_v60, %v9417_v8  ;;  %v6458_v35 = vmul.f32 %v6451_v60, %v9425_v27 }
 0x436   :  { %v6473_v47 = vrot.slane %v6446_v33, %v8745_v17  ;;  %v6459_v38 = vmul.f32 %v6451_v60, %v9414_v44  ;;  %v6460_v15 = vmul.f32 %v6451_v60, %v9421_v25  ;;  %v6461_v11 = vmul.f32 %v6451_v60, %v9432_v21  ;;  %v7811_v21 = vld [vmem:[%s9556_s0 + $0x68] sm:$0xff] }
 0x437   :  { %v6462_v54 = vmul.f32 %v6451_v60, %v9439_v56  ;;  %v6463_v7 = vmul.f32 %v6451_v60, %v9429_v3  ;;  %v6464_v16 = vmul.f32 %v6451_v60, %v9435_v36  ;;  %v6465_v31 = vmul.f32 %v6451_v60, %v9445_v43 }
 0x438   :  { %v6488_v4 = vadd.f32 %v6473_v47, %v6466_v0  ;;  %v6467_v8 = vmul.f32 %v6451_v60, %v9443_v37  ;;  %v6468_v27 = vmul.f32 %v6451_v60, %v9448_v2  ;;  %v6475_v17 = vadd.f32 %v6473_v47, %v6453_v59  ;;  %v7825_v60 = vld [vmem:[%s9556_s0 + $0x70] sm:$0xff]  ;;  %v7826_v0 = vld [vmem:[%s9556_s0 + $0x78] sm:$0xff]  ;;  %s7827_s0 = scalar_lea.vmem %s6545_s16, 2048 }
 0x439   :  { %v6476_v57 = vadd.f32 %v6473_v47, %v6454_v41  ;;  %v6477_v44 = vadd.f32 %v6473_v47, %v6455_v30  ;;  %v6478_v42 = vadd.f32 %v6473_v47, %v6456_v49  ;;  %v6479_v25 = vadd.f32 %v6473_v47, %v6457_v22  ;;  %p7828_p0 = scmp.ne.s32.totalorder %s6545_s16, %s7827_s0  ;;  %p7833_p2 = scmp.lt.s32.totalorder %s7827_s0, %s7827_s0 }
 0x43a   :  { %v6504_v56 = vadd.f32 %v7811_v21, %v6488_v4  ;;  %v6480_v3 = vadd.f32 %v6473_v47, %v6458_v35  ;;  %v6481_v55 = vadd.f32 %v6473_v47, %v6459_v38  ;;  %v6482_v36 = vadd.f32 %v6473_v47, %v6460_v15 }
 0x43b   :  { %v6483_v46 = vadd.f32 %v6473_v47, %v6461_v11  ;;  %v6484_v43 = vadd.f32 %v6473_v47, %v6462_v54  ;;  %v6485_v26 = vadd.f32 %v6473_v47, %v6463_v7  ;;  %v6486_v20 = vadd.f32 %v6473_v47, %v6464_v16  ;;  %p7834_p3 = por %p7833_p2, %p7832_p1 }
 0x43c   :  { %v6520_v37 = vmax.f32 %v6504_v56, 0.0  ;;  %v6487_v28 = vadd.f32 %v6473_v47, %v6465_v31  ;;  %v6489_v2 = vadd.f32 %v6473_v47, %v6467_v8  ;;  %v6490_v39 = vadd.f32 %v6473_v47, %v6468_v27 }
 0x43d   :  { %v6491_v5 = vadd.f32 %v7812_v19, %v6475_v17  ;;  %v6492_v61 = vadd.f32 %v7813_v32, %v6476_v57  ;;  %v6493_v51 = vadd.f32 %v7814_v40, %v6477_v44  ;;  %v6494_v23 = vadd.f32 %v7815_v6, %v6478_v42  ;;  %p7835_p4 = pnand %p7834_p3, %p7828_p0 }
 0x43e   :  { %6536 = vst [vmem:[#allocation4 + $0x68] sm:$0xff] %v6520_v37  ;;  %v6495_v9 = vadd.f32 %v7816_v62, %v6479_v25  ;;  %v6496_v58 = vadd.f32 %v7817_v29, %v6480_v3  ;;  %v6497_v18 = vadd.f32 %v7818_v12, %v6481_v55  ;;  %v6498_v24 = vadd.f32 %v7819_v13, %v6482_v36 }
 0x43f   :  { %v6499_v48 = vadd.f32 %v7820_v34, %v6483_v46  ;;  %v6500_v14 = vadd.f32 %v7821_v1, %v6484_v43  ;;  %v6501_v52 = vadd.f32 %v7822_v10, %v6485_v26  ;;  %v6502_v50 = vadd.f32 %v7823_v53, %v6486_v20 }
 0x440   :  { %v6503_v63 = vadd.f32 %v7824_v45, %v6487_v28  ;;  %v6505_v33 = vadd.f32 %v7825_v60, %v6489_v2  ;;  %v6506_v59 = vadd.f32 %v7826_v0, %v6490_v39  ;;  %v6507_v41 = vmax.f32 %v6491_v5, 0.0 }
 0x441   :  { %v6508_v30 = vmax.f32 %v6492_v61, 0.0  ;;  %v6509_v49 = vmax.f32 %v6493_v51, 0.0  ;;  %v6510_v22 = vmax.f32 %v6494_v23, 0.0  ;;  %v6511_v35 = vmax.f32 %v6495_v9, 0.0 }
 0x442   :  { %v6512_v47 = vmax.f32 %v6496_v58, 0.0  ;;  %v6513_v38 = vmax.f32 %v6497_v18, 0.0  ;;  %v6514_v15 = vmax.f32 %v6498_v24, 0.0  ;;  %v6515_v11 = vmax.f32 %v6499_v48, 0.0  ;;  %6523 = vst [vmem:[#allocation4] sm:$0xff] %v6507_v41 }
 0x443   :  { %v6516_v54 = vmax.f32 %v6500_v14, 0.0  ;;  %v6517_v7 = vmax.f32 %v6501_v52, 0.0  ;;  %v6518_v16 = vmax.f32 %v6502_v50, 0.0  ;;  %v6519_v31 = vmax.f32 %v6503_v63, 0.0  ;;  %6524 = vst [vmem:[#allocation4 + $0x8] sm:$0xff] %v6508_v30  ;;  %6525 = vst [vmem:[#allocation4 + $0x10] sm:$0xff] %v6509_v49 }
 0x444   :  { %6526 = vst [vmem:[#allocation4 + $0x18] sm:$0xff] %v6510_v22  ;;  %6527 = vst [vmem:[#allocation4 + $0x20] sm:$0xff] %v6511_v35  ;;  %v6521_v4 = vmax.f32 %v6505_v33, 0.0  ;;  %v6522_v8 = vmax.f32 %v6506_v59, 0.0 }
 0x445   :  { %6528 = vst [vmem:[#allocation4 + $0x28] sm:$0xff] %v6512_v47  ;;  %6529 = vst [vmem:[#allocation4 + $0x30] sm:$0xff] %v6513_v38 }
 0x446   :  { %6530 = vst [vmem:[#allocation4 + $0x38] sm:$0xff] %v6514_v15  ;;  %6531 = vst [vmem:[#allocation4 + $0x40] sm:$0xff] %v6515_v11 }
 0x447   :  { %6532 = vst [vmem:[#allocation4 + $0x48] sm:$0xff] %v6516_v54  ;;  %6533 = vst [vmem:[#allocation4 + $0x50] sm:$0xff] %v6517_v7 }
 0x448   :  { %6534 = vst [vmem:[#allocation4 + $0x58] sm:$0xff] %v6518_v16  ;;  %6535 = vst [vmem:[#allocation4 + $0x60] sm:$0xff] %v6519_v31 }
 0x449   :  { %6537 = vst [vmem:[#allocation4 + $0x70] sm:$0xff] %v6521_v4  ;;  %6538 = vst [vmem:[#allocation4 + $0x78] sm:$0xff] %v6522_v8 }
 0x44a   :  { %7838 = shalt.err (!%p7835_p4)
}
 0x44b   :  { %s7839_s19 = scalar_lea.hbm %s9563_s7, 2048 }
 0x44c   :  { %p7840_p5 = scmp.ne.s32.totalorder %s9563_s7, %s7839_s19  ;;  %p7843_p6 = scmp.lt.u32.totalorder %s7839_s19, %s9563_s7 }
 0x44e   :  { %p7845_p7 = pnand %p7843_p6, %p7840_p5 }
 0x450   :  { %7848 = shalt.err (!%p7845_p7)
}
 0x451   :  { %s7853_s24 = smov 128   ;;  %s7854_s25 = smov 8  }
 0x452   :  { %6550 = dma.vmem_to_hbm [thread:$0]  %s6545_s16, 2048, %s9563_s7, [#allocation5], %s7853_s24, %s7853_s24, %s7854_s25  }
 0x453   :  { %7849 = dma.done.wait [#allocation5], 2048  }
 0x454   :  { %7850 = vsyncadd [#allocation5], 4294965248 }
 0x455   :  { %6554 = vsyncpa [#allocation5], 1 }

</bundles_post_ra>
